<compile_context>
chip_gen: v6e
topology: v6e:2x2x1
jax: 0.10.0
libtpu: 0.0.40
codegen_flags: <defaults>
</compile_context>

<pallas_src>
import jax
import jax.numpy as jnp
from jax import lax
from jax.experimental import pallas as pl
from jax.experimental.pallas import tpu as pltpu

_EPS = 1e-5   # nn.LayerNorm default eps
_TB = 8       # timesteps per unrolled scan block (one f32 sublane tile)


def _softplus(z):
    return jnp.maximum(z, 0.0) + jnp.log(1.0 + jnp.exp(-jnp.abs(z)))


def _gelu_exact(z):
    # PyTorch nn.GELU() default (exact, erf-based)
    return 0.5 * z * (1.0 + lax.erf(z * 0.7071067811865476))


def _ffn_chunk(f):
    # hidden-dim tile for the FFN: overlap GELU (EUP) with the 2nd matmul (MXU)
    if f <= 512:
        return f
    for c in (512, 256, 128):
        if f % c == 0:
            return c
    return f


def _vmem_limit_bytes():
    cap = 64 * 1024 * 1024
    try:
        cap = int(pltpu.get_tpu_info().vmem_capacity_bytes)
    except Exception:
        pass
    # leave headroom for Mosaic internal scratch + the double-buffered x pipeline
    return min((cap * 3) // 4, 100 * 1024 * 1024)


def mamba_block_kernel(
    x_ref,
    ln1g_ref, ln1b_ref,
    wf_ref, bf_ref, a_ref, dskip_ref,
    ln2g_ref, ln2b_ref,
    w1_ref, b1_ref, w2_ref, b2_ref,
    o_ref,
    h_scr, dt_scr, u_scr, bc_scr, x1_scr, y_scr, decay_scr,
):
    # Reset the carried scan state at the start of each sequence.
    @pl.when(pl.program_id(1) == 0)
    def _():
        h_scr[...] = jnp.zeros_like(h_scr)

    x = x_ref[0]                       # (TL, D) f32 chunk of the sequence
    TL, D = x.shape
    N = a_ref.shape[0]

    # ---- LayerNorm 1 (f32) ----
    mu = jnp.mean(x, axis=-1, keepdims=True)
    xc = x - mu
    var = jnp.mean(xc * xc, axis=-1, keepdims=True)
    xn = xc * lax.rsqrt(var + _EPS) * ln1g_ref[...] + ln1b_ref[...]

    # ---- fused input projection [W_dt | W_B | W_C]: one lane-dense MXU matmul
    #      (bf16 operands, f32 accumulation) ----
    proj = jnp.dot(xn.astype(jnp.bfloat16), wf_ref[...],
                   preferred_element_type=jnp.float32) + bf_ref[...]   # (TL, D+2N)
    dt = _softplus(proj[:, :D])        # (TL, D)
    dt_scr[...] = dt
    u_scr[...] = dt * xn               # (TL, D)
    bc_scr[...] = proj[:, D:D + 2 * N]  # (TL, 2N) = [B | C]

    # residual-1 base: x + Dskip * xn (scan output y accumulates in y_scr)
    x1_scr[...] = x + dskip_ref[...] * xn

    A = a_ref[...]                     # (N, D), negative

    # ---- selective scan: blocks of _TB timesteps, inner steps unrolled ----
    def block_step(blk, h):
        base = pl.multiple_of(blk * _TB, _TB)
        dt_b = dt_scr[pl.ds(base, _TB), :]      # (TB, D)
        u_b = u_scr[pl.ds(base, _TB), :]        # (TB, D)
        # All TB decay factors in ONE EUP push; staged in VMEM to bound vregs
        # and keep exp off the serial h-recurrence critical path.
        decay_scr[...] = jnp.exp(dt_b[:, None, :] * A[None, :, :])   # (TB, N, D)
        # One small XLU transpose per block so per-step B/C values are sublane
        # columns (static slices below) -> no per-step MXU rank-1 / readout.
        bcT = bc_scr[pl.ds(base, _TB), :].T     # (2N, TB)
        ys = []
        for j in range(_TB):                    # static unroll: scheduler visibility
            u_t = u_b[j:j + 1, :]               # (1, D)
            b_col = bcT[0:N, j:j + 1]           # (N, 1)
            c_col = bcT[N:2 * N, j:j + 1]       # (N, 1)
            # recurrence step: VPU broadcast-multiplies only
            h = decay_scr[j] * h + b_col * u_t                       # (N, D)
            # readout: VPU multiply + XLU sublane reduce (no MXU pop stall)
            ys.append(jnp.sum(c_col * h, axis=0, keepdims=True))     # (1, D)
        y_scr[pl.ds(base, _TB), :] = jnp.concatenate(ys, axis=0)     # one slab store
        return h

    h_final = lax.fori_loop(0, TL // _TB, block_step, h_scr[...])
    h_scr[...] = h_final                        # carry scan state to next L-chunk

    # ---- residual 1 + LayerNorm 2 ----
    x1 = x1_scr[...] + y_scr[...]
    mu2 = jnp.mean(x1, axis=-1, keepdims=True)
    xc2 = x1 - mu2
    var2 = jnp.mean(xc2 * xc2, axis=-1, keepdims=True)
    xn2 = xc2 * lax.rsqrt(var2 + _EPS) * ln2g_ref[...] + ln2b_ref[...]
    xn2_bf = xn2.astype(jnp.bfloat16)

    # ---- FFN tiled over F (bf16 operands, f32 accumulation; exact GELU in f32)
    F = w1_ref.shape[1]
    fc = _ffn_chunk(F)
    ff = jnp.zeros_like(x1) + b2_ref[...]
    for c0 in range(0, F, fc):
        hc = jnp.dot(xn2_bf, w1_ref[:, c0:c0 + fc],
                     preferred_element_type=jnp.float32) + b1_ref[:, c0:c0 + fc]
        hc = _gelu_exact(hc)
        ff = ff + jnp.dot(hc.astype(jnp.bfloat16), w2_ref[c0:c0 + fc, :],
                          preferred_element_type=jnp.float32)

    o_ref[0] = (x1 + ff).astype(o_ref.dtype)


def mamba_block(x, p, *, tl=None):
    B, L, D = x.shape
    N = p["A"].shape[0]
    F = p["w1"].shape[1]
    if tl is None:
        tl = min(L, 256)
    assert L % tl == 0 and tl % _TB == 0, (L, tl)

    # Fuse [W_dt | W_B | W_C] into one weight (bf16 operands, f32 bias).
    wf = jnp.concatenate([p["wdt"], p["wb"], p["wc"]], axis=1).astype(jnp.bfloat16)
    bf = jnp.concatenate([p["bdt"], p["bb"], p["bc"]], axis=1).astype(jnp.float32)
    w1 = p["w1"].astype(jnp.bfloat16)
    w2 = p["w2"].astype(jnp.bfloat16)

    scratch = [
        pltpu.VMEM((N, D), jnp.float32),         # h: scan state carried across chunks
        pltpu.VMEM((tl, D), jnp.float32),        # dt
        pltpu.VMEM((tl, D), jnp.float32),        # u = dt * xn
        pltpu.VMEM((tl, 2 * N), jnp.float32),    # [B | C] projections
        pltpu.VMEM((tl, D), jnp.float32),        # x1 base = x + Dskip*xn
        pltpu.VMEM((tl, D), jnp.float32),        # y (scan outputs)
        pltpu.VMEM((_TB, N, D), jnp.float32),    # per-block decay factors
    ]

    def build(weight_mode):
        def fixed(shape):
            idx = lambda b, l, _n=len(shape): (0,) * _n
            if weight_mode is None:
                return pl.BlockSpec(shape, idx)
            return pl.BlockSpec(shape, idx, pipeline_mode=weight_mode)

        in_specs = [
            pl.BlockSpec((1, tl, D), lambda b, l: (b, l, 0)),   # x chunk
            fixed((1, D)), fixed((1, D)),                       # ln1 gamma/beta
            fixed((D, D + 2 * N)), fixed((1, D + 2 * N)),       # fused W, fused b
            fixed((N, D)), fixed((1, D)),                       # A, Dskip
            fixed((1, D)), fixed((1, D)),                       # ln2 gamma/beta
            fixed((D, F)), fixed((1, F)),                       # W1, b1
            fixed((F, D)), fixed((1, D)),                       # W2, b2
        ]
        out_specs = pl.BlockSpec((1, tl, D), lambda b, l: (b, l, 0))

        return pl.pallas_call(
            mamba_block_kernel,
            out_shape=jax.ShapeDtypeStruct((B, L, D), x.dtype),
            grid_spec=pltpu.PrefetchScalarGridSpec(
                num_scalar_prefetch=0,
                grid=(B, L // tl),
                in_specs=in_specs,
                out_specs=out_specs,
                scratch_shapes=scratch,
            ),
            compiler_params=pltpu.CompilerParams(
                dimension_semantics=("parallel", "arbitrary"),
                vmem_limit_bytes=_vmem_limit_bytes(),
            ),
        )

    args = (x, p["ln1_g"], p["ln1_b"], wf, bf, p["A"], p["Dskip"],
            p["ln2_g"], p["ln2_b"], w1, p["b1"], w2, p["b2"])

    try:
        # constant-index weights single-buffered (halves resident weight VMEM)
        return build(pl.Buffered(1))(*args)
    except Exception:
        # fallback: default double-buffered weights if Buffered(1) is unsupported
        return build(None)(*args)


# ---------------- pure-JAX reference for validation (full f32) ----------------
def mamba_block_ref(x, p):
    hi = lax.Precision.HIGHEST

    def ln(z, g, b):
        mu = jnp.mean(z, axis=-1, keepdims=True)
        var = jnp.mean((z - mu) ** 2, axis=-1, keepdims=True)
        return (z - mu) / jnp.sqrt(var + _EPS) * g + b

    xn = ln(x, p["ln1_g"], p["ln1_b"])                                   # (B,L,D)
    Bm = jnp.dot(xn, p["wb"], precision=hi) + p["bb"]                    # (B,L,N)
    Cm = jnp.dot(xn, p["wc"], precision=hi) + p["bc"]                    # (B,L,N)
    dt = _softplus(jnp.dot(xn, p["wdt"], precision=hi) + p["bdt"])       # (B,L,D)
    u = dt * xn
    A = p["A"]                                                           # (N,D)

    def scan_fn(h, inp):
        dt_t, u_t, b_t, c_t = inp
        decay = jnp.exp(dt_t[:, None, :] * A[None, :, :])                # (B,N,D)
        h = decay * h + b_t[:, :, None] * u_t[:, None, :]
        y = jnp.einsum("bn,bnd->bd", c_t, h, precision=hi)
        return h, y

    Bsz = x.shape[0]
    h0 = jnp.zeros((Bsz, A.shape[0], A.shape[1]), jnp.float32)
    inputs = (jnp.swapaxes(dt, 0, 1), jnp.swapaxes(u, 0, 1),
              jnp.swapaxes(Bm, 0, 1), jnp.swapaxes(Cm, 0, 1))
    _, ys = jax.lax.scan(scan_fn, h0, inputs)
    y = jnp.swapaxes(ys, 0, 1) + p["Dskip"] * xn

    x1 = x + y
    xn2 = ln(x1, p["ln2_g"], p["ln2_b"])
    hff = _gelu_exact(jnp.dot(xn2, p["w1"], precision=hi) + p["b1"])
    ff = jnp.dot(hff, p["w2"], precision=hi) + p["b2"]
    return x1 + ff


if __name__ == "__main__":
    B, L, D, N, F = 2, 16, 32, 16, 64   # batch, seq, d_model, d_state, d_ff
    key = jax.random.PRNGKey(0)
    ks = jax.random.split(key, 10)

    p = {
        "ln1_g": jnp.ones((1, D), jnp.float32),
        "ln1_b": jnp.zeros((1, D), jnp.float32),
        "wb":   0.05 * jax.random.normal(ks[1], (D, N), jnp.float32),
        "bb":   jnp.zeros((1, N), jnp.float32),
        "wc":   0.05 * jax.random.normal(ks[2], (D, N), jnp.float32),
        "bc":   jnp.zeros((1, N), jnp.float32),
        "wdt":  0.05 * jax.random.normal(ks[3], (D, D), jnp.float32),
        "bdt":  jnp.zeros((1, D), jnp.float32),
        "A":    -jnp.exp(0.5 * jax.random.normal(ks[4], (N, D), jnp.float32)),
        "Dskip": jnp.ones((1, D), jnp.float32),
        "ln2_g": jnp.ones((1, D), jnp.float32),
        "ln2_b": jnp.zeros((1, D), jnp.float32),
        "w1":   0.05 * jax.random.normal(ks[5], (D, F), jnp.float32),
        "b1":   jnp.zeros((1, F), jnp.float32),
        "w2":   0.05 * jax.random.normal(ks[6], (F, D), jnp.float32),
        "b2":   jnp.zeros((1, D), jnp.float32),
    }

    x = jax.random.normal(ks[0], (B, L, D), jnp.float32)

    # tl=8 exercises the cross-chunk scan-state carry (grid = (2, 2)).
    out = mamba_block(x, p, tl=8)
    out = jax.block_until_ready(out)

    ref = mamba_block_ref(x, p)
    assert out.shape == (B, L, D), out.shape
    max_diff = float(jnp.max(jnp.abs(out - ref)))
    assert jnp.allclose(out, ref, rtol=2e-2, atol=2e-2), max_diff

    print("KERNEL_OK")
</pallas_src>

<mosaic_0001>
module attributes {stable_mosaic.version = 11 : i64} {
  func.func @mamba_block_kernel(%arg0: i32, %arg1: i32, %arg2: memref<1x8x32xf32, #tpu.memory_space<vmem>>, %arg3: memref<1x32xf32, #tpu.memory_space<vmem>>, %arg4: memref<1x32xf32, #tpu.memory_space<vmem>>, %arg5: memref<32x64xbf16, #tpu.memory_space<vmem>>, %arg6: memref<1x64xf32, #tpu.memory_space<vmem>>, %arg7: memref<16x32xf32, #tpu.memory_space<vmem>>, %arg8: memref<1x32xf32, #tpu.memory_space<vmem>>, %arg9: memref<1x32xf32, #tpu.memory_space<vmem>>, %arg10: memref<1x32xf32, #tpu.memory_space<vmem>>, %arg11: memref<32x64xbf16, #tpu.memory_space<vmem>>, %arg12: memref<1x64xf32, #tpu.memory_space<vmem>>, %arg13: memref<64x32xbf16, #tpu.memory_space<vmem>>, %arg14: memref<1x32xf32, #tpu.memory_space<vmem>>, %arg15: memref<1x8x32xf32, #tpu.memory_space<vmem>>, %arg16: memref<16x32xf32, #tpu.memory_space<vmem>>, %arg17: memref<8x32xf32, #tpu.memory_space<vmem>>, %arg18: memref<8x32xf32, #tpu.memory_space<vmem>>, %arg19: memref<8x32xf32, #tpu.memory_space<vmem>>, %arg20: memref<8x32xf32, #tpu.memory_space<vmem>>, %arg21: memref<8x32xf32, #tpu.memory_space<vmem>>, %arg22: memref<8x16x32xf32, #tpu.memory_space<vmem>>) attributes {dimension_semantics = [#tpu.dimension_semantics<parallel>, #tpu.dimension_semantics<arbitrary>], iteration_bounds = array<i64: 2, 2>, scalar_prefetch = 0 : i64, scratch_operands = 7 : i64, tpu.core_type = #tpu.core_type<tc>, window_params = [{transform_indices = @transform_0, window_bounds = array<i64: 1, 8, 32>}, {pipeline_mode = #tpu.pipeline_mode<synchronous>, transform_indices = @transform_1, window_bounds = array<i64: 1, 32>}, {pipeline_mode = #tpu.pipeline_mode<synchronous>, transform_indices = @transform_2, window_bounds = array<i64: 1, 32>}, {pipeline_mode = #tpu.pipeline_mode<synchronous>, transform_indices = @transform_3, window_bounds = array<i64: 32, 64>}, {pipeline_mode = #tpu.pipeline_mode<synchronous>, transform_indices = @transform_4, window_bounds = array<i64: 1, 64>}, {pipeline_mode = #tpu.pipeline_mode<synchronous>, transform_indices = @transform_5, window_bounds = array<i64: 16, 32>}, {pipeline_mode = #tpu.pipeline_mode<synchronous>, transform_indices = @transform_6, window_bounds = array<i64: 1, 32>}, {pipeline_mode = #tpu.pipeline_mode<synchronous>, transform_indices = @transform_7, window_bounds = array<i64: 1, 32>}, {pipeline_mode = #tpu.pipeline_mode<synchronous>, transform_indices = @transform_8, window_bounds = array<i64: 1, 32>}, {pipeline_mode = #tpu.pipeline_mode<synchronous>, transform_indices = @transform_9, window_bounds = array<i64: 32, 64>}, {pipeline_mode = #tpu.pipeline_mode<synchronous>, transform_indices = @transform_10, window_bounds = array<i64: 1, 64>}, {pipeline_mode = #tpu.pipeline_mode<synchronous>, transform_indices = @transform_11, window_bounds = array<i64: 64, 32>}, {pipeline_mode = #tpu.pipeline_mode<synchronous>, transform_indices = @transform_12, window_bounds = array<i64: 1, 32>}, {transform_indices = @transform_13, window_bounds = array<i64: 1, 8, 32>}]} {
    %c0_i32 = arith.constant 0 : i32
    %0 = arith.cmpi eq, %arg1, %c0_i32 : i32
    %1 = arith.extui %0 : i1 to i32
    %c0_i32_0 = arith.constant 0 : i32
    %2 = arith.cmpi ne, %1, %c0_i32_0 : i32
    scf.if %2 {
      %cst_98 = arith.constant 0.000000e+00 : f32
      %239 = vector.broadcast %cst_98 : f32 to vector<16x32xf32>
      %c0_99 = arith.constant 0 : index
      %c0_100 = arith.constant 0 : index
      %240 = vector.load %arg16[%c0_99, %c0_100] : memref<16x32xf32, #tpu.memory_space<vmem>>, vector<16x32xf32>
      tpu.vector_store %arg16[%c0_99, %c0_100], %239 {strides = array<i32>} : memref<16x32xf32, #tpu.memory_space<vmem>>, vector<16x32xf32>,
    } else {
    }
    %c0 = arith.constant 0 : index
    %c0_1 = arith.constant 0 : index
    %c0_2 = arith.constant 0 : index
    %3 = vector.load %arg2[%c0, %c0_1, %c0_2] : memref<1x8x32xf32, #tpu.memory_space<vmem>>, vector<1x8x32xf32>
    %4 = vector.shape_cast %3 : vector<1x8x32xf32> to vector<8x32xf32>
    %cst = arith.constant dense<0.000000e+00> : vector<8xf32>
    %5 = vector.multi_reduction <add>, %4, %cst [1] : vector<8x32xf32> to vector<8xf32>
    %6 = vector.shape_cast %5 : vector<8xf32> to vector<8x1xf32>
    %cst_3 = arith.constant 3.200000e+01 : f32
    %7 = vector.broadcast %cst_3 : f32 to vector<8x1xf32>
    %8 = arith.divf %6, %7 : vector<8x1xf32>
    %9 = vector.broadcast %8 : vector<8x1xf32> to vector<8x32xf32>
    %10 = arith.subf %4, %9 : vector<8x32xf32>
    %11 = arith.mulf %10, %10 : vector<8x32xf32>
    %cst_4 = arith.constant dense<0.000000e+00> : vector<8xf32>
    %12 = vector.multi_reduction <add>, %11, %cst_4 [1] : vector<8x32xf32> to vector<8xf32>
    %13 = vector.shape_cast %12 : vector<8xf32> to vector<8x1xf32>
    %cst_5 = arith.constant 3.200000e+01 : f32
    %14 = vector.broadcast %cst_5 : f32 to vector<8x1xf32>
    %15 = arith.divf %13, %14 : vector<8x1xf32>
    %cst_6 = arith.constant 9.99999974E-6 : f32
    %16 = vector.broadcast %cst_6 : f32 to vector<8x1xf32>
    %17 = arith.addf %15, %16 : vector<8x1xf32>
    %18 = math.rsqrt %17 : vector<8x1xf32>
    %19 = vector.broadcast %18 : vector<8x1xf32> to vector<8x32xf32>
    %20 = arith.mulf %10, %19 : vector<8x32xf32>
    %c0_7 = arith.constant 0 : index
    %c0_8 = arith.constant 0 : index
    %21 = vector.load %arg3[%c0_7, %c0_8] : memref<1x32xf32, #tpu.memory_space<vmem>>, vector<1x32xf32>
    %22 = vector.broadcast %21 : vector<1x32xf32> to vector<8x32xf32>
    %23 = arith.mulf %20, %22 : vector<8x32xf32>
    %c0_9 = arith.constant 0 : index
    %c0_10 = arith.constant 0 : index
    %24 = vector.load %arg4[%c0_9, %c0_10] : memref<1x32xf32, #tpu.memory_space<vmem>>, vector<1x32xf32>
    %25 = vector.broadcast %24 : vector<1x32xf32> to vector<8x32xf32>
    %26 = arith.addf %23, %25 : vector<8x32xf32>
    %27 = arith.truncf %26 : vector<8x32xf32> to vector<8x32xbf16>
    %c0_11 = arith.constant 0 : index
    %c0_12 = arith.constant 0 : index
    %28 = vector.load %arg5[%c0_11, %c0_12] : memref<32x64xbf16, #tpu.memory_space<vmem>>, vector<32x64xbf16>
    %cst_13 = arith.constant dense<0.000000e+00> : vector<8x64xf32>
    %29 = tpu.matmul %27, %28, %cst_13 {dimension_numbers = #tpu.dot_dimension_numbers<[1], [0], [0], [1], [0, 0, 1, 1], [], []>} : vector<8x32xbf16>, vector<32x64xbf16>, vector<8x64xf32> -> vector<8x64xf32>
    %c0_14 = arith.constant 0 : index
    %c0_15 = arith.constant 0 : index
    %30 = vector.load %arg6[%c0_14, %c0_15] : memref<1x64xf32, #tpu.memory_space<vmem>>, vector<1x64xf32>
    %31 = vector.broadcast %30 : vector<1x64xf32> to vector<8x64xf32>
    %32 = arith.addf %29, %31 : vector<8x64xf32>
    %33 = vector.extract_strided_slice %32 {offsets = [0, 0], sizes = [8, 32], strides = [1, 1]} : vector<8x64xf32> to vector<8x32xf32>
    %cst_16 = arith.constant 0.000000e+00 : f32
    %34 = vector.broadcast %cst_16 : f32 to vector<8x32xf32>
    %35 = arith.maximumf %33, %34 : vector<8x32xf32>
    %36 = math.absf %33 : vector<8x32xf32>
    %cst_17 = arith.constant 0.000000e+00 : f32
    %37 = vector.broadcast %cst_17 : f32 to vector<8x32xf32>
    %38 = arith.subf %37, %36 : vector<8x32xf32>
    %39 = math.exp %38 : vector<8x32xf32>
    %cst_18 = arith.constant 1.000000e+00 : f32
    %40 = vector.broadcast %cst_18 : f32 to vector<8x32xf32>
    %41 = arith.addf %40, %39 : vector<8x32xf32>
    %42 = math.log %41 : vector<8x32xf32>
    %43 = arith.addf %35, %42 : vector<8x32xf32>
    %c0_19 = arith.constant 0 : index
    %c0_20 = arith.constant 0 : index
    %44 = vector.load %arg17[%c0_19, %c0_20] : memref<8x32xf32, #tpu.memory_space<vmem>>, vector<8x32xf32>
    tpu.vector_store %arg17[%c0_19, %c0_20], %43 {strides = array<i32>} : memref<8x32xf32, #tpu.memory_space<vmem>>, vector<8x32xf32>,
    %45 = arith.mulf %43, %26 : vector<8x32xf32>
    %c0_21 = arith.constant 0 : index
    %c0_22 = arith.constant 0 : index
    %46 = vector.load %arg18[%c0_21, %c0_22] : memref<8x32xf32, #tpu.memory_space<vmem>>, vector<8x32xf32>
    tpu.vector_store %arg18[%c0_21, %c0_22], %45 {strides = array<i32>} : memref<8x32xf32, #tpu.memory_space<vmem>>, vector<8x32xf32>,
    %47 = vector.extract_strided_slice %32 {offsets = [0, 32], sizes = [8, 32], strides = [1, 1]} : vector<8x64xf32> to vector<8x32xf32>
    %c0_23 = arith.constant 0 : index
    %c0_24 = arith.constant 0 : index
    %48 = vector.load %arg19[%c0_23, %c0_24] : memref<8x32xf32, #tpu.memory_space<vmem>>, vector<8x32xf32>
    tpu.vector_store %arg19[%c0_23, %c0_24], %47 {strides = array<i32>} : memref<8x32xf32, #tpu.memory_space<vmem>>, vector<8x32xf32>,
    %c0_25 = arith.constant 0 : index
    %c0_26 = arith.constant 0 : index
    %49 = vector.load %arg8[%c0_25, %c0_26] : memref<1x32xf32, #tpu.memory_space<vmem>>, vector<1x32xf32>
    %50 = vector.broadcast %49 : vector<1x32xf32> to vector<8x32xf32>
    %51 = arith.mulf %50, %26 : vector<8x32xf32>
    %52 = arith.addf %4, %51 : vector<8x32xf32>
    %c0_27 = arith.constant 0 : index
    %c0_28 = arith.constant 0 : index
    %53 = vector.load %arg20[%c0_27, %c0_28] : memref<8x32xf32, #tpu.memory_space<vmem>>, vector<8x32xf32>
    tpu.vector_store %arg20[%c0_27, %c0_28], %52 {strides = array<i32>} : memref<8x32xf32, #tpu.memory_space<vmem>>, vector<8x32xf32>,
    %c0_29 = arith.constant 0 : index
    %c0_30 = arith.constant 0 : index
    %54 = vector.load %arg7[%c0_29, %c0_30] : memref<16x32xf32, #tpu.memory_space<vmem>>, vector<16x32xf32>
    %c0_31 = arith.constant 0 : index
    %c0_32 = arith.constant 0 : index
    %55 = vector.load %arg16[%c0_31, %c0_32] : memref<16x32xf32, #tpu.memory_space<vmem>>, vector<16x32xf32>
    %c0_i32_33 = arith.constant 0 : i32
    %c8_i32 = arith.constant 8 : i32
    %56 = arith.muli %c0_i32_33, %c8_i32 : i32
    %57 = tpu.assume_multiple %56, 8 : i32
    %58 = arith.index_cast %57 : i32 to index
    %c0_34 = arith.constant 0 : index
    %59 = vector.load %arg17[%58, %c0_34] : memref<8x32xf32, #tpu.memory_space<vmem>>, vector<8x32xf32>
    %60 = arith.index_cast %57 : i32 to index
    %c0_35 = arith.constant 0 : index
    %61 = vector.load %arg18[%60, %c0_35] : memref<8x32xf32, #tpu.memory_space<vmem>>, vector<8x32xf32>
    %62 = vector.shape_cast %59 : vector<8x32xf32> to vector<8x1x32xf32>
    %63 = vector.shape_cast %54 : vector<16x32xf32> to vector<1x16x32xf32>
    %64 = vector.broadcast %62 : vector<8x1x32xf32> to vector<8x16x32xf32>
    %65 = vector.broadcast %63 : vector<1x16x32xf32> to vector<8x16x32xf32>
    %66 = arith.mulf %64, %65 : vector<8x16x32xf32>
    %67 = math.exp %66 : vector<8x16x32xf32>
    %c0_36 = arith.constant 0 : index
    %c0_37 = arith.constant 0 : index
    %c0_38 = arith.constant 0 : index
    %68 = vector.load %arg22[%c0_36, %c0_37, %c0_38] : memref<8x16x32xf32, #tpu.memory_space<vmem>>, vector<8x16x32xf32>
    tpu.vector_store %arg22[%c0_36, %c0_37, %c0_38], %67 {strides = array<i32>} : memref<8x16x32xf32, #tpu.memory_space<vmem>>, vector<8x16x32xf32>,
    %69 = arith.index_cast %57 : i32 to index
    %c0_39 = arith.constant 0 : index
    %70 = vector.load %arg19[%69, %c0_39] : memref<8x32xf32, #tpu.memory_space<vmem>>, vector<8x32xf32>
    %71 = tpu.transpose %70, [1, 0] : vector<8x32xf32> -> vector<32x8xf32>
    %72 = vector.extract_strided_slice %61 {offsets = [0, 0], sizes = [1, 32], strides = [1, 1]} : vector<8x32xf32> to vector<1x32xf32>
    %73 = vector.extract_strided_slice %71 {offsets = [0, 0], sizes = [16, 1], strides = [1, 1]} : vector<32x8xf32> to vector<16x1xf32>
    %74 = vector.extract_strided_slice %71 {offsets = [16, 0], sizes = [16, 1], strides = [1, 1]} : vector<32x8xf32> to vector<16x1xf32>
    %c0_40 = arith.constant 0 : index
    %c0_41 = arith.constant 0 : index
    %c0_42 = arith.constant 0 : index
    %75 = vector.load %arg22[%c0_40, %c0_41, %c0_42] : memref<8x16x32xf32, #tpu.memory_space<vmem>>, vector<1x16x32xf32>
    %76 = vector.shape_cast %75 : vector<1x16x32xf32> to vector<16x32xf32>
    %77 = arith.mulf %76, %55 : vector<16x32xf32>
    %78 = vector.broadcast %73 : vector<16x1xf32> to vector<16x32xf32>
    %79 = vector.broadcast %72 : vector<1x32xf32> to vector<16x32xf32>
    %80 = arith.mulf %78, %79 : vector<16x32xf32>
    %81 = arith.addf %77, %80 : vector<16x32xf32>
    %82 = vector.broadcast %74 : vector<16x1xf32> to vector<16x32xf32>
    %83 = arith.mulf %82, %81 : vector<16x32xf32>
    %cst_43 = arith.constant dense<0.000000e+00> : vector<32xf32>
    %84 = vector.multi_reduction <add>, %83, %cst_43 [0] : vector<16x32xf32> to vector<32xf32>
    %85 = vector.shape_cast %84 : vector<32xf32> to vector<1x32xf32>
    %86 = vector.extract_strided_slice %61 {offsets = [1, 0], sizes = [1, 32], strides = [1, 1]} : vector<8x32xf32> to vector<1x32xf32>
    %87 = vector.extract_strided_slice %71 {offsets = [0, 1], sizes = [16, 1], strides = [1, 1]} : vector<32x8xf32> to vector<16x1xf32>
    %88 = vector.extract_strided_slice %71 {offsets = [16, 1], sizes = [16, 1], strides = [1, 1]} : vector<32x8xf32> to vector<16x1xf32>
    %c1 = arith.constant 1 : index
    %c0_44 = arith.constant 0 : index
    %c0_45 = arith.constant 0 : index
    %89 = vector.load %arg22[%c1, %c0_44, %c0_45] : memref<8x16x32xf32, #tpu.memory_space<vmem>>, vector<1x16x32xf32>
    %90 = vector.shape_cast %89 : vector<1x16x32xf32> to vector<16x32xf32>
    %91 = arith.mulf %90, %81 : vector<16x32xf32>
    %92 = vector.broadcast %87 : vector<16x1xf32> to vector<16x32xf32>
    %93 = vector.broadcast %86 : vector<1x32xf32> to vector<16x32xf32>
    %94 = arith.mulf %92, %93 : vector<16x32xf32>
    %95 = arith.addf %91, %94 : vector<16x32xf32>
    %96 = vector.broadcast %88 : vector<16x1xf32> to vector<16x32xf32>
    %97 = arith.mulf %96, %95 : vector<16x32xf32>
    %cst_46 = arith.constant dense<0.000000e+00> : vector<32xf32>
    %98 = vector.multi_reduction <add>, %97, %cst_46 [0] : vector<16x32xf32> to vector<32xf32>
    %99 = vector.shape_cast %98 : vector<32xf32> to vector<1x32xf32>
    %100 = vector.extract_strided_slice %61 {offsets = [2, 0], sizes = [1, 32], strides = [1, 1]} : vector<8x32xf32> to vector<1x32xf32>
    %101 = vector.extract_strided_slice %71 {offsets = [0, 2], sizes = [16, 1], strides = [1, 1]} : vector<32x8xf32> to vector<16x1xf32>
    %102 = vector.extract_strided_slice %71 {offsets = [16, 2], sizes = [16, 1], strides = [1, 1]} : vector<32x8xf32> to vector<16x1xf32>
    %c2 = arith.constant 2 : index
    %c0_47 = arith.constant 0 : index
    %c0_48 = arith.constant 0 : index
    %103 = vector.load %arg22[%c2, %c0_47, %c0_48] : memref<8x16x32xf32, #tpu.memory_space<vmem>>, vector<1x16x32xf32>
    %104 = vector.shape_cast %103 : vector<1x16x32xf32> to vector<16x32xf32>
    %105 = arith.mulf %104, %95 : vector<16x32xf32>
    %106 = vector.broadcast %101 : vector<16x1xf32> to vector<16x32xf32>
    %107 = vector.broadcast %100 : vector<1x32xf32> to vector<16x32xf32>
    %108 = arith.mulf %106, %107 : vector<16x32xf32>
    %109 = arith.addf %105, %108 : vector<16x32xf32>
    %110 = vector.broadcast %102 : vector<16x1xf32> to vector<16x32xf32>
    %111 = arith.mulf %110, %109 : vector<16x32xf32>
    %cst_49 = arith.constant dense<0.000000e+00> : vector<32xf32>
    %112 = vector.multi_reduction <add>, %111, %cst_49 [0] : vector<16x32xf32> to vector<32xf32>
    %113 = vector.shape_cast %112 : vector<32xf32> to vector<1x32xf32>
    %114 = vector.extract_strided_slice %61 {offsets = [3, 0], sizes = [1, 32], strides = [1, 1]} : vector<8x32xf32> to vector<1x32xf32>
    %115 = vector.extract_strided_slice %71 {offsets = [0, 3], sizes = [16, 1], strides = [1, 1]} : vector<32x8xf32> to vector<16x1xf32>
    %116 = vector.extract_strided_slice %71 {offsets = [16, 3], sizes = [16, 1], strides = [1, 1]} : vector<32x8xf32> to vector<16x1xf32>
    %c3 = arith.constant 3 : index
    %c0_50 = arith.constant 0 : index
    %c0_51 = arith.constant 0 : index
    %117 = vector.load %arg22[%c3, %c0_50, %c0_51] : memref<8x16x32xf32, #tpu.memory_space<vmem>>, vector<1x16x32xf32>
    %118 = vector.shape_cast %117 : vector<1x16x32xf32> to vector<16x32xf32>
    %119 = arith.mulf %118, %109 : vector<16x32xf32>
    %120 = vector.broadcast %115 : vector<16x1xf32> to vector<16x32xf32>
    %121 = vector.broadcast %114 : vector<1x32xf32> to vector<16x32xf32>
    %122 = arith.mulf %120, %121 : vector<16x32xf32>
    %123 = arith.addf %119, %122 : vector<16x32xf32>
    %124 = vector.broadcast %116 : vector<16x1xf32> to vector<16x32xf32>
    %125 = arith.mulf %124, %123 : vector<16x32xf32>
    %cst_52 = arith.constant dense<0.000000e+00> : vector<32xf32>
    %126 = vector.multi_reduction <add>, %125, %cst_52 [0] : vector<16x32xf32> to vector<32xf32>
    %127 = vector.shape_cast %126 : vector<32xf32> to vector<1x32xf32>
    %128 = vector.extract_strided_slice %61 {offsets = [4, 0], sizes = [1, 32], strides = [1, 1]} : vector<8x32xf32> to vector<1x32xf32>
    %129 = vector.extract_strided_slice %71 {offsets = [0, 4], sizes = [16, 1], strides = [1, 1]} : vector<32x8xf32> to vector<16x1xf32>
    %130 = vector.extract_strided_slice %71 {offsets = [16, 4], sizes = [16, 1], strides = [1, 1]} : vector<32x8xf32> to vector<16x1xf32>
    %c4 = arith.constant 4 : index
    %c0_53 = arith.constant 0 : index
    %c0_54 = arith.constant 0 : index
    %131 = vector.load %arg22[%c4, %c0_53, %c0_54] : memref<8x16x32xf32, #tpu.memory_space<vmem>>, vector<1x16x32xf32>
    %132 = vector.shape_cast %131 : vector<1x16x32xf32> to vector<16x32xf32>
    %133 = arith.mulf %132, %123 : vector<16x32xf32>
    %134 = vector.broadcast %129 : vector<16x1xf32> to vector<16x32xf32>
    %135 = vector.broadcast %128 : vector<1x32xf32> to vector<16x32xf32>
    %136 = arith.mulf %134, %135 : vector<16x32xf32>
    %137 = arith.addf %133, %136 : vector<16x32xf32>
    %138 = vector.broadcast %130 : vector<16x1xf32> to vector<16x32xf32>
    %139 = arith.mulf %138, %137 : vector<16x32xf32>
    %cst_55 = arith.constant dense<0.000000e+00> : vector<32xf32>
    %140 = vector.multi_reduction <add>, %139, %cst_55 [0] : vector<16x32xf32> to vector<32xf32>
    %141 = vector.shape_cast %140 : vector<32xf32> to vector<1x32xf32>
    %142 = vector.extract_strided_slice %61 {offsets = [5, 0], sizes = [1, 32], strides = [1, 1]} : vector<8x32xf32> to vector<1x32xf32>
    %143 = vector.extract_strided_slice %71 {offsets = [0, 5], sizes = [16, 1], strides = [1, 1]} : vector<32x8xf32> to vector<16x1xf32>
    %144 = vector.extract_strided_slice %71 {offsets = [16, 5], sizes = [16, 1], strides = [1, 1]} : vector<32x8xf32> to vector<16x1xf32>
    %c5 = arith.constant 5 : index
    %c0_56 = arith.constant 0 : index
    %c0_57 = arith.constant 0 : index
    %145 = vector.load %arg22[%c5, %c0_56, %c0_57] : memref<8x16x32xf32, #tpu.memory_space<vmem>>, vector<1x16x32xf32>
    %146 = vector.shape_cast %145 : vector<1x16x32xf32> to vector<16x32xf32>
    %147 = arith.mulf %146, %137 : vector<16x32xf32>
    %148 = vector.broadcast %143 : vector<16x1xf32> to vector<16x32xf32>
    %149 = vector.broadcast %142 : vector<1x32xf32> to vector<16x32xf32>
    %150 = arith.mulf %148, %149 : vector<16x32xf32>
    %151 = arith.addf %147, %150 : vector<16x32xf32>
    %152 = vector.broadcast %144 : vector<16x1xf32> to vector<16x32xf32>
    %153 = arith.mulf %152, %151 : vector<16x32xf32>
    %cst_58 = arith.constant dense<0.000000e+00> : vector<32xf32>
    %154 = vector.multi_reduction <add>, %153, %cst_58 [0] : vector<16x32xf32> to vector<32xf32>
    %155 = vector.shape_cast %154 : vector<32xf32> to vector<1x32xf32>
    %156 = vector.extract_strided_slice %61 {offsets = [6, 0], sizes = [1, 32], strides = [1, 1]} : vector<8x32xf32> to vector<1x32xf32>
    %157 = vector.extract_strided_slice %71 {offsets = [0, 6], sizes = [16, 1], strides = [1, 1]} : vector<32x8xf32> to vector<16x1xf32>
    %158 = vector.extract_strided_slice %71 {offsets = [16, 6], sizes = [16, 1], strides = [1, 1]} : vector<32x8xf32> to vector<16x1xf32>
    %c6 = arith.constant 6 : index
    %c0_59 = arith.constant 0 : index
    %c0_60 = arith.constant 0 : index
    %159 = vector.load %arg22[%c6, %c0_59, %c0_60] : memref<8x16x32xf32, #tpu.memory_space<vmem>>, vector<1x16x32xf32>
    %160 = vector.shape_cast %159 : vector<1x16x32xf32> to vector<16x32xf32>
    %161 = arith.mulf %160, %151 : vector<16x32xf32>
    %162 = vector.broadcast %157 : vector<16x1xf32> to vector<16x32xf32>
    %163 = vector.broadcast %156 : vector<1x32xf32> to vector<16x32xf32>
    %164 = arith.mulf %162, %163 : vector<16x32xf32>
    %165 = arith.addf %161, %164 : vector<16x32xf32>
    %166 = vector.broadcast %158 : vector<16x1xf32> to vector<16x32xf32>
    %167 = arith.mulf %166, %165 : vector<16x32xf32>
    %cst_61 = arith.constant dense<0.000000e+00> : vector<32xf32>
    %168 = vector.multi_reduction <add>, %167, %cst_61 [0] : vector<16x32xf32> to vector<32xf32>
    %169 = vector.shape_cast %168 : vector<32xf32> to vector<1x32xf32>
    %170 = vector.extract_strided_slice %61 {offsets = [7, 0], sizes = [1, 32], strides = [1, 1]} : vector<8x32xf32> to vector<1x32xf32>
    %171 = vector.extract_strided_slice %71 {offsets = [0, 7], sizes = [16, 1], strides = [1, 1]} : vector<32x8xf32> to vector<16x1xf32>
    %172 = vector.extract_strided_slice %71 {offsets = [16, 7], sizes = [16, 1], strides = [1, 1]} : vector<32x8xf32> to vector<16x1xf32>
    %c7 = arith.constant 7 : index
    %c0_62 = arith.constant 0 : index
    %c0_63 = arith.constant 0 : index
    %173 = vector.load %arg22[%c7, %c0_62, %c0_63] : memref<8x16x32xf32, #tpu.memory_space<vmem>>, vector<1x16x32xf32>
    %174 = vector.shape_cast %173 : vector<1x16x32xf32> to vector<16x32xf32>
    %175 = arith.mulf %174, %165 : vector<16x32xf32>
    %176 = vector.broadcast %171 : vector<16x1xf32> to vector<16x32xf32>
    %177 = vector.broadcast %170 : vector<1x32xf32> to vector<16x32xf32>
    %178 = arith.mulf %176, %177 : vector<16x32xf32>
    %179 = arith.addf %175, %178 : vector<16x32xf32>
    %180 = vector.broadcast %172 : vector<16x1xf32> to vector<16x32xf32>
    %181 = arith.mulf %180, %179 : vector<16x32xf32>
    %cst_64 = arith.constant dense<0.000000e+00> : vector<32xf32>
    %182 = vector.multi_reduction <add>, %181, %cst_64 [0] : vector<16x32xf32> to vector<32xf32>
    %183 = vector.shape_cast %182 : vector<32xf32> to vector<1x32xf32>
    %184 = tpu.concatenate %85, %99, %113, %127, %141, %155, %169, %183 in 0 : vector<1x32xf32>, vector<1x32xf32>, vector<1x32xf32>, vector<1x32xf32>, vector<1x32xf32>, vector<1x32xf32>, vector<1x32xf32>, vector<1x32xf32> -> vector<8x32xf32>
    %185 = arith.index_cast %57 : i32 to index
    %c0_65 = arith.constant 0 : index
    %186 = vector.load %arg21[%185, %c0_65] : memref<8x32xf32, #tpu.memory_space<vmem>>, vector<8x32xf32>
    tpu.vector_store %arg21[%185, %c0_65], %184 {strides = array<i32>} : memref<8x32xf32, #tpu.memory_space<vmem>>, vector<8x32xf32>,
    %c1_i32 = arith.constant 1 : i32
    %c0_66 = arith.constant 0 : index
    %c0_67 = arith.constant 0 : index
    %187 = vector.load %arg16[%c0_66, %c0_67] : memref<16x32xf32, #tpu.memory_space<vmem>>, vector<16x32xf32>
    tpu.vector_store %arg16[%c0_66, %c0_67], %179 {strides = array<i32>} : memref<16x32xf32, #tpu.memory_space<vmem>>, vector<16x32xf32>,
    %c0_68 = arith.constant 0 : index
    %c0_69 = arith.constant 0 : index
    %188 = vector.load %arg20[%c0_68, %c0_69] : memref<8x32xf32, #tpu.memory_space<vmem>>, vector<8x32xf32>
    %c0_70 = arith.constant 0 : index
    %c0_71 = arith.constant 0 : index
    %189 = vector.load %arg21[%c0_70, %c0_71] : memref<8x32xf32, #tpu.memory_space<vmem>>, vector<8x32xf32>
    %190 = arith.addf %188, %189 : vector<8x32xf32>
    %cst_72 = arith.constant dense<0.000000e+00> : vector<8xf32>
    %191 = vector.multi_reduction <add>, %190, %cst_72 [1] : vector<8x32xf32> to vector<8xf32>
    %192 = vector.shape_cast %191 : vector<8xf32> to vector<8x1xf32>
    %cst_73 = arith.constant 3.200000e+01 : f32
    %193 = vector.broadcast %cst_73 : f32 to vector<8x1xf32>
    %194 = arith.divf %192, %193 : vector<8x1xf32>
    %195 = vector.broadcast %194 : vector<8x1xf32> to vector<8x32xf32>
    %196 = arith.subf %190, %195 : vector<8x32xf32>
    %197 = arith.mulf %196, %196 : vector<8x32xf32>
    %cst_74 = arith.constant dense<0.000000e+00> : vector<8xf32>
    %198 = vector.multi_reduction <add>, %197, %cst_74 [1] : vector<8x32xf32> to vector<8xf32>
    %199 = vector.shape_cast %198 : vector<8xf32> to vector<8x1xf32>
    %cst_75 = arith.constant 3.200000e+01 : f32
    %200 = vector.broadcast %cst_75 : f32 to vector<8x1xf32>
    %201 = arith.divf %199, %200 : vector<8x1xf32>
    %cst_76 = arith.constant 9.99999974E-6 : f32
    %202 = vector.broadcast %cst_76 : f32 to vector<8x1xf32>
    %203 = arith.addf %201, %202 : vector<8x1xf32>
    %204 = math.rsqrt %203 : vector<8x1xf32>
    %205 = vector.broadcast %204 : vector<8x1xf32> to vector<8x32xf32>
    %206 = arith.mulf %196, %205 : vector<8x32xf32>
    %c0_77 = arith.constant 0 : index
    %c0_78 = arith.constant 0 : index
    %207 = vector.load %arg9[%c0_77, %c0_78] : memref<1x32xf32, #tpu.memory_space<vmem>>, vector<1x32xf32>
    %208 = vector.broadcast %207 : vector<1x32xf32> to vector<8x32xf32>
    %209 = arith.mulf %206, %208 : vector<8x32xf32>
    %c0_79 = arith.constant 0 : index
    %c0_80 = arith.constant 0 : index
    %210 = vector.load %arg10[%c0_79, %c0_80] : memref<1x32xf32, #tpu.memory_space<vmem>>, vector<1x32xf32>
    %211 = vector.broadcast %210 : vector<1x32xf32> to vector<8x32xf32>
    %212 = arith.addf %209, %211 : vector<8x32xf32>
    %213 = arith.truncf %212 : vector<8x32xf32> to vector<8x32xbf16>
    %cst_81 = arith.constant 0.000000e+00 : f32
    %214 = vector.broadcast %cst_81 : f32 to vector<8x32xf32>
    %c0_82 = arith.constant 0 : index
    %c0_83 = arith.constant 0 : index
    %215 = vector.load %arg14[%c0_82, %c0_83] : memref<1x32xf32, #tpu.memory_space<vmem>>, vector<1x32xf32>
    %216 = vector.broadcast %215 : vector<1x32xf32> to vector<8x32xf32>
    %217 = arith.addf %214, %216 : vector<8x32xf32>
    %c0_84 = arith.constant 0 : index
    %c0_85 = arith.constant 0 : index
    %218 = vector.load %arg11[%c0_84, %c0_85] : memref<32x64xbf16, #tpu.memory_space<vmem>>, vector<32x64xbf16>
    %cst_86 = arith.constant dense<0.000000e+00> : vector<8x64xf32>
    %219 = tpu.matmul %213, %218, %cst_86 {dimension_numbers = #tpu.dot_dimension_numbers<[1], [0], [0], [1], [0, 0, 1, 1], [], []>} : vector<8x32xbf16>, vector<32x64xbf16>, vector<8x64xf32> -> vector<8x64xf32>
    %c0_87 = arith.constant 0 : index
    %c0_88 = arith.constant 0 : index
    %220 = vector.load %arg12[%c0_87, %c0_88] : memref<1x64xf32, #tpu.memory_space<vmem>>, vector<1x64xf32>
    %221 = vector.broadcast %220 : vector<1x64xf32> to vector<8x64xf32>
    %222 = arith.addf %219, %221 : vector<8x64xf32>
    %cst_89 = arith.constant 5.000000e-01 : f32
    %223 = vector.broadcast %cst_89 : f32 to vector<8x64xf32>
    %224 = arith.mulf %223, %222 : vector<8x64xf32>
    %cst_90 = arith.constant 0.707106769 : f32
    %225 = vector.broadcast %cst_90 : f32 to vector<8x64xf32>
    %226 = arith.mulf %222, %225 : vector<8x64xf32>
    %227 = math.erf %226 : vector<8x64xf32>
    %cst_91 = arith.constant 1.000000e+00 : f32
    %228 = vector.broadcast %cst_91 : f32 to vector<8x64xf32>
    %229 = arith.addf %228, %227 : vector<8x64xf32>
    %230 = arith.mulf %224, %229 : vector<8x64xf32>
    %231 = arith.truncf %230 : vector<8x64xf32> to vector<8x64xbf16>
    %c0_92 = arith.constant 0 : index
    %c0_93 = arith.constant 0 : index
    %232 = vector.load %arg13[%c0_92, %c0_93] : memref<64x32xbf16, #tpu.memory_space<vmem>>, vector<64x32xbf16>
    %cst_94 = arith.constant dense<0.000000e+00> : vector<8x32xf32>
    %233 = tpu.matmul %231, %232, %cst_94 {dimension_numbers = #tpu.dot_dimension_numbers<[1], [0], [0], [1], [0, 0, 1, 1], [], []>} : vector<8x64xbf16>, vector<64x32xbf16>, vector<8x32xf32> -> vector<8x32xf32>
    %234 = arith.addf %217, %233 : vector<8x32xf32>
    %235 = arith.addf %190, %234 : vector<8x32xf32>
    %c0_95 = arith.constant 0 : index
    %c0_96 = arith.constant 0 : index
    %c0_97 = arith.constant 0 : index
    %236 = vector.load %arg15[%c0_95, %c0_96, %c0_97] : memref<1x8x32xf32, #tpu.memory_space<vmem>>, vector<1x8x32xf32>
    %237 = vector.shape_cast %236 : vector<1x8x32xf32> to vector<8x32xf32>
    %238 = vector.shape_cast %235 : vector<8x32xf32> to vector<1x8x32xf32>
    tpu.vector_store %arg15[%c0_95, %c0_96, %c0_97], %238 {strides = array<i32>} : memref<1x8x32xf32, #tpu.memory_space<vmem>>, vector<1x8x32xf32>,
    return
  }
  func.func @transform_0(%arg0: i32, %arg1: i32) -> (i32, i32, i32) {
    %c0_i32 = arith.constant 0 : i32
    %c0_i32_0 = arith.constant 0 : i32
    return %arg0, %arg1, %c0_i32 : i32, i32, i32
  }
  func.func @transform_1(%arg0: i32, %arg1: i32) -> (i32, i32) {
    %c0_i32 = arith.constant 0 : i32
    %c0_i32_0 = arith.constant 0 : i32
    %c0_i32_1 = arith.constant 0 : i32
    return %c0_i32, %c0_i32_0 : i32, i32
  }
  func.func @transform_2(%arg0: i32, %arg1: i32) -> (i32, i32) {
    %c0_i32 = arith.constant 0 : i32
    %c0_i32_0 = arith.constant 0 : i32
    %c0_i32_1 = arith.constant 0 : i32
    return %c0_i32, %c0_i32_0 : i32, i32
  }
  func.func @transform_3(%arg0: i32, %arg1: i32) -> (i32, i32) {
    %c0_i32 = arith.constant 0 : i32
    %c0_i32_0 = arith.constant 0 : i32
    %c0_i32_1 = arith.constant 0 : i32
    return %c0_i32, %c0_i32_0 : i32, i32
  }
  func.func @transform_4(%arg0: i32, %arg1: i32) -> (i32, i32) {
    %c0_i32 = arith.constant 0 : i32
    %c0_i32_0 = arith.constant 0 : i32
    %c0_i32_1 = arith.constant 0 : i32
    return %c0_i32, %c0_i32_0 : i32, i32
  }
  func.func @transform_5(%arg0: i32, %arg1: i32) -> (i32, i32) {
    %c0_i32 = arith.constant 0 : i32
    %c0_i32_0 = arith.constant 0 : i32
    %c0_i32_1 = arith.constant 0 : i32
    return %c0_i32, %c0_i32_0 : i32, i32
  }
  func.func @transform_6(%arg0: i32, %arg1: i32) -> (i32, i32) {
    %c0_i32 = arith.constant 0 : i32
    %c0_i32_0 = arith.constant 0 : i32
    %c0_i32_1 = arith.constant 0 : i32
    return %c0_i32, %c0_i32_0 : i32, i32
  }
  func.func @transform_7(%arg0: i32, %arg1: i32) -> (i32, i32) {
    %c0_i32 = arith.constant 0 : i32
    %c0_i32_0 = arith.constant 0 : i32
    %c0_i32_1 = arith.constant 0 : i32
    return %c0_i32, %c0_i32_0 : i32, i32
  }
  func.func @transform_8(%arg0: i32, %arg1: i32) -> (i32, i32) {
    %c0_i32 = arith.constant 0 : i32
    %c0_i32_0 = arith.constant 0 : i32
    %c0_i32_1 = arith.constant 0 : i32
    return %c0_i32, %c0_i32_0 : i32, i32
  }
  func.func @transform_9(%arg0: i32, %arg1: i32) -> (i32, i32) {
    %c0_i32 = arith.constant 0 : i32
    %c0_i32_0 = arith.constant 0 : i32
    %c0_i32_1 = arith.constant 0 : i32
    return %c0_i32, %c0_i32_0 : i32, i32
  }
  func.func @transform_10(%arg0: i32, %arg1: i32) -> (i32, i32) {
    %c0_i32 = arith.constant 0 : i32
    %c0_i32_0 = arith.constant 0 : i32
    %c0_i32_1 = arith.constant 0 : i32
    return %c0_i32, %c0_i32_0 : i32, i32
  }
  func.func @transform_11(%arg0: i32, %arg1: i32) -> (i32, i32) {
    %c0_i32 = arith.constant 0 : i32
    %c0_i32_0 = arith.constant 0 : i32
    %c0_i32_1 = arith.constant 0 : i32
    return %c0_i32, %c0_i32_0 : i32, i32
  }
  func.func @transform_12(%arg0: i32, %arg1: i32) -> (i32, i32) {
    %c0_i32 = arith.constant 0 : i32
    %c0_i32_0 = arith.constant 0 : i32
    %c0_i32_1 = arith.constant 0 : i32
    return %c0_i32, %c0_i32_0 : i32, i32
  }
  func.func @transform_13(%arg0: i32, %arg1: i32) -> (i32, i32, i32) {
    %c0_i32 = arith.constant 0 : i32
    %c0_i32_0 = arith.constant 0 : i32
    return %arg0, %arg1, %c0_i32 : i32, i32, i32
  }
}

module attributes {stable_mosaic.version = 11 : i64} {
  func.func @mamba_block_kernel(%arg0: i32, %arg1: i32, %arg2: memref<1x8x32xf32, #tpu.memory_space<vmem>>, %arg3: memref<1x32xf32, #tpu.memory_space<vmem>>, %arg4: memref<1x32xf32, #tpu.memory_space<vmem>>, %arg5: memref<32x64xbf16, #tpu.memory_space<vmem>>, %arg6: memref<1x64xf32, #tpu.memory_space<vmem>>, %arg7: memref<16x32xf32, #tpu.memory_space<vmem>>, %arg8: memref<1x32xf32, #tpu.memory_space<vmem>>, %arg9: memref<1x32xf32, #tpu.memory_space<vmem>>, %arg10: memref<1x32xf32, #tpu.memory_space<vmem>>, %arg11: memref<32x64xbf16, #tpu.memory_space<vmem>>, %arg12: memref<1x64xf32, #tpu.memory_space<vmem>>, %arg13: memref<64x32xbf16, #tpu.memory_space<vmem>>, %arg14: memref<1x32xf32, #tpu.memory_space<vmem>>, %arg15: memref<1x8x32xf32, #tpu.memory_space<vmem>>, %arg16: memref<16x32xf32, #tpu.memory_space<vmem>>, %arg17: memref<8x32xf32, #tpu.memory_space<vmem>>, %arg18: memref<8x32xf32, #tpu.memory_space<vmem>>, %arg19: memref<8x32xf32, #tpu.memory_space<vmem>>, %arg20: memref<8x32xf32, #tpu.memory_space<vmem>>, %arg21: memref<8x32xf32, #tpu.memory_space<vmem>>, %arg22: memref<8x16x32xf32, #tpu.memory_space<vmem>>) attributes {dimension_semantics = [#tpu.dimension_semantics<parallel>, #tpu.dimension_semantics<arbitrary>], iteration_bounds = array<i64: 2, 2>, scalar_prefetch = 0 : i64, scratch_operands = 7 : i64, tpu.core_type = #tpu.core_type<tc>, window_params = [{transform_indices = @transform_0, window_bounds = array<i64: 1, 8, 32>}, {pipeline_mode = #tpu.pipeline_mode<synchronous>, transform_indices = @transform_1, window_bounds = array<i64: 1, 32>}, {pipeline_mode = #tpu.pipeline_mode<synchronous>, transform_indices = @transform_2, window_bounds = array<i64: 1, 32>}, {pipeline_mode = #tpu.pipeline_mode<synchronous>, transform_indices = @transform_3, window_bounds = array<i64: 32, 64>}, {pipeline_mode = #tpu.pipeline_mode<synchronous>, transform_indices = @transform_4, window_bounds = array<i64: 1, 64>}, {pipeline_mode = #tpu.pipeline_mode<synchronous>, transform_indices = @transform_5, window_bounds = array<i64: 16, 32>}, {pipeline_mode = #tpu.pipeline_mode<synchronous>, transform_indices = @transform_6, window_bounds = array<i64: 1, 32>}, {pipeline_mode = #tpu.pipeline_mode<synchronous>, transform_indices = @transform_7, window_bounds = array<i64: 1, 32>}, {pipeline_mode = #tpu.pipeline_mode<synchronous>, transform_indices = @transform_8, window_bounds = array<i64: 1, 32>}, {pipeline_mode = #tpu.pipeline_mode<synchronous>, transform_indices = @transform_9, window_bounds = array<i64: 32, 64>}, {pipeline_mode = #tpu.pipeline_mode<synchronous>, transform_indices = @transform_10, window_bounds = array<i64: 1, 64>}, {pipeline_mode = #tpu.pipeline_mode<synchronous>, transform_indices = @transform_11, window_bounds = array<i64: 64, 32>}, {pipeline_mode = #tpu.pipeline_mode<synchronous>, transform_indices = @transform_12, window_bounds = array<i64: 1, 32>}, {transform_indices = @transform_13, window_bounds = array<i64: 1, 8, 32>}]} {
    %c0_i32 = arith.constant 0 : i32
    %0 = arith.cmpi eq, %arg1, %c0_i32 : i32
    %1 = arith.extui %0 : i1 to i32
    %c0_i32_0 = arith.constant 0 : i32
    %2 = arith.cmpi ne, %1, %c0_i32_0 : i32
    scf.if %2 {
      %cst_98 = arith.constant 0.000000e+00 : f32
      %239 = vector.broadcast %cst_98 : f32 to vector<16x32xf32>
      %c0_99 = arith.constant 0 : index
      %c0_100 = arith.constant 0 : index
      %240 = vector.load %arg16[%c0_99, %c0_100] : memref<16x32xf32, #tpu.memory_space<vmem>>, vector<16x32xf32>
      tpu.vector_store %arg16[%c0_99, %c0_100], %239 {strides = array<i32>} : memref<16x32xf32, #tpu.memory_space<vmem>>, vector<16x32xf32>,
    } else {
    }
    %c0 = arith.constant 0 : index
    %c0_1 = arith.constant 0 : index
    %c0_2 = arith.constant 0 : index
    %3 = vector.load %arg2[%c0, %c0_1, %c0_2] : memref<1x8x32xf32, #tpu.memory_space<vmem>>, vector<1x8x32xf32>
    %4 = vector.shape_cast %3 : vector<1x8x32xf32> to vector<8x32xf32>
    %cst = arith.constant dense<0.000000e+00> : vector<8xf32>
    %5 = vector.multi_reduction <add>, %4, %cst [1] : vector<8x32xf32> to vector<8xf32>
    %6 = vector.shape_cast %5 : vector<8xf32> to vector<8x1xf32>
    %cst_3 = arith.constant 3.200000e+01 : f32
    %7 = vector.broadcast %cst_3 : f32 to vector<8x1xf32>
    %8 = arith.divf %6, %7 : vector<8x1xf32>
    %9 = vector.broadcast %8 : vector<8x1xf32> to vector<8x32xf32>
    %10 = arith.subf %4, %9 : vector<8x32xf32>
    %11 = arith.mulf %10, %10 : vector<8x32xf32>
    %cst_4 = arith.constant dense<0.000000e+00> : vector<8xf32>
    %12 = vector.multi_reduction <add>, %11, %cst_4 [1] : vector<8x32xf32> to vector<8xf32>
    %13 = vector.shape_cast %12 : vector<8xf32> to vector<8x1xf32>
    %cst_5 = arith.constant 3.200000e+01 : f32
    %14 = vector.broadcast %cst_5 : f32 to vector<8x1xf32>
    %15 = arith.divf %13, %14 : vector<8x1xf32>
    %cst_6 = arith.constant 9.99999974E-6 : f32
    %16 = vector.broadcast %cst_6 : f32 to vector<8x1xf32>
    %17 = arith.addf %15, %16 : vector<8x1xf32>
    %18 = math.rsqrt %17 : vector<8x1xf32>
    %19 = vector.broadcast %18 : vector<8x1xf32> to vector<8x32xf32>
    %20 = arith.mulf %10, %19 : vector<8x32xf32>
    %c0_7 = arith.constant 0 : index
    %c0_8 = arith.constant 0 : index
    %21 = vector.load %arg3[%c0_7, %c0_8] : memref<1x32xf32, #tpu.memory_space<vmem>>, vector<1x32xf32>
    %22 = vector.broadcast %21 : vector<1x32xf32> to vector<8x32xf32>
    %23 = arith.mulf %20, %22 : vector<8x32xf32>
    %c0_9 = arith.constant 0 : index
    %c0_10 = arith.constant 0 : index
    %24 = vector.load %arg4[%c0_9, %c0_10] : memref<1x32xf32, #tpu.memory_space<vmem>>, vector<1x32xf32>
    %25 = vector.broadcast %24 : vector<1x32xf32> to vector<8x32xf32>
    %26 = arith.addf %23, %25 : vector<8x32xf32>
    %27 = arith.truncf %26 : vector<8x32xf32> to vector<8x32xbf16>
    %c0_11 = arith.constant 0 : index
    %c0_12 = arith.constant 0 : index
    %28 = vector.load %arg5[%c0_11, %c0_12] : memref<32x64xbf16, #tpu.memory_space<vmem>>, vector<32x64xbf16>
    %cst_13 = arith.constant dense<0.000000e+00> : vector<8x64xf32>
    %29 = tpu.matmul %27, %28, %cst_13 {dimension_numbers = #tpu.dot_dimension_numbers<[1], [0], [0], [1], [0, 0, 1, 1], [], []>} : vector<8x32xbf16>, vector<32x64xbf16>, vector<8x64xf32> -> vector<8x64xf32>
    %c0_14 = arith.constant 0 : index
    %c0_15 = arith.constant 0 : index
    %30 = vector.load %arg6[%c0_14, %c0_15] : memref<1x64xf32, #tpu.memory_space<vmem>>, vector<1x64xf32>
    %31 = vector.broadcast %30 : vector<1x64xf32> to vector<8x64xf32>
    %32 = arith.addf %29, %31 : vector<8x64xf32>
    %33 = vector.extract_strided_slice %32 {offsets = [0, 0], sizes = [8, 32], strides = [1, 1]} : vector<8x64xf32> to vector<8x32xf32>
    %cst_16 = arith.constant 0.000000e+00 : f32
    %34 = vector.broadcast %cst_16 : f32 to vector<8x32xf32>
    %35 = arith.maximumf %33, %34 : vector<8x32xf32>
    %36 = math.absf %33 : vector<8x32xf32>
    %cst_17 = arith.constant 0.000000e+00 : f32
    %37 = vector.broadcast %cst_17 : f32 to vector<8x32xf32>
    %38 = arith.subf %37, %36 : vector<8x32xf32>
    %39 = math.exp %38 : vector<8x32xf32>
    %cst_18 = arith.constant 1.000000e+00 : f32
    %40 = vector.broadcast %cst_18 : f32 to vector<8x32xf32>
    %41 = arith.addf %40, %39 : vector<8x32xf32>
    %42 = math.log %41 : vector<8x32xf32>
    %43 = arith.addf %35, %42 : vector<8x32xf32>
    %c0_19 = arith.constant 0 : index
    %c0_20 = arith.constant 0 : index
    %44 = vector.load %arg17[%c0_19, %c0_20] : memref<8x32xf32, #tpu.memory_space<vmem>>, vector<8x32xf32>
    tpu.vector_store %arg17[%c0_19, %c0_20], %43 {strides = array<i32>} : memref<8x32xf32, #tpu.memory_space<vmem>>, vector<8x32xf32>,
    %45 = arith.mulf %43, %26 : vector<8x32xf32>
    %c0_21 = arith.constant 0 : index
    %c0_22 = arith.constant 0 : index
    %46 = vector.load %arg18[%c0_21, %c0_22] : memref<8x32xf32, #tpu.memory_space<vmem>>, vector<8x32xf32>
    tpu.vector_store %arg18[%c0_21, %c0_22], %45 {strides = array<i32>} : memref<8x32xf32, #tpu.memory_space<vmem>>, vector<8x32xf32>,
    %47 = vector.extract_strided_slice %32 {offsets = [0, 32], sizes = [8, 32], strides = [1, 1]} : vector<8x64xf32> to vector<8x32xf32>
    %c0_23 = arith.constant 0 : index
    %c0_24 = arith.constant 0 : index
    %48 = vector.load %arg19[%c0_23, %c0_24] : memref<8x32xf32, #tpu.memory_space<vmem>>, vector<8x32xf32>
    tpu.vector_store %arg19[%c0_23, %c0_24], %47 {strides = array<i32>} : memref<8x32xf32, #tpu.memory_space<vmem>>, vector<8x32xf32>,
    %c0_25 = arith.constant 0 : index
    %c0_26 = arith.constant 0 : index
    %49 = vector.load %arg8[%c0_25, %c0_26] : memref<1x32xf32, #tpu.memory_space<vmem>>, vector<1x32xf32>
    %50 = vector.broadcast %49 : vector<1x32xf32> to vector<8x32xf32>
    %51 = arith.mulf %50, %26 : vector<8x32xf32>
    %52 = arith.addf %4, %51 : vector<8x32xf32>
    %c0_27 = arith.constant 0 : index
    %c0_28 = arith.constant 0 : index
    %53 = vector.load %arg20[%c0_27, %c0_28] : memref<8x32xf32, #tpu.memory_space<vmem>>, vector<8x32xf32>
    tpu.vector_store %arg20[%c0_27, %c0_28], %52 {strides = array<i32>} : memref<8x32xf32, #tpu.memory_space<vmem>>, vector<8x32xf32>,
    %c0_29 = arith.constant 0 : index
    %c0_30 = arith.constant 0 : index
    %54 = vector.load %arg7[%c0_29, %c0_30] : memref<16x32xf32, #tpu.memory_space<vmem>>, vector<16x32xf32>
    %c0_31 = arith.constant 0 : index
    %c0_32 = arith.constant 0 : index
    %55 = vector.load %arg16[%c0_31, %c0_32] : memref<16x32xf32, #tpu.memory_space<vmem>>, vector<16x32xf32>
    %c0_i32_33 = arith.constant 0 : i32
    %c8_i32 = arith.constant 8 : i32
    %56 = arith.muli %c0_i32_33, %c8_i32 : i32
    %57 = tpu.assume_multiple %56, 8 : i32
    %58 = arith.index_cast %57 : i32 to index
    %c0_34 = arith.constant 0 : index
    %59 = vector.load %arg17[%58, %c0_34] : memref<8x32xf32, #tpu.memory_space<vmem>>, vector<8x32xf32>
    %60 = arith.index_cast %57 : i32 to index
    %c0_35 = arith.constant 0 : index
    %61 = vector.load %arg18[%60, %c0_35] : memref<8x32xf32, #tpu.memory_space<vmem>>, vector<8x32xf32>
    %62 = vector.shape_cast %59 : vector<8x32xf32> to vector<8x1x32xf32>
    %63 = vector.shape_cast %54 : vector<16x32xf32> to vector<1x16x32xf32>
    %64 = vector.broadcast %62 : vector<8x1x32xf32> to vector<8x16x32xf32>
    %65 = vector.broadcast %63 : vector<1x16x32xf32> to vector<8x16x32xf32>
    %66 = arith.mulf %64, %65 : vector<8x16x32xf32>
    %67 = math.exp %66 : vector<8x16x32xf32>
    %c0_36 = arith.constant 0 : index
    %c0_37 = arith.constant 0 : index
    %c0_38 = arith.constant 0 : index
    %68 = vector.load %arg22[%c0_36, %c0_37, %c0_38] : memref<8x16x32xf32, #tpu.memory_space<vmem>>, vector<8x16x32xf32>
    tpu.vector_store %arg22[%c0_36, %c0_37, %c0_38], %67 {strides = array<i32>} : memref<8x16x32xf32, #tpu.memory_space<vmem>>, vector<8x16x32xf32>,
    %69 = arith.index_cast %57 : i32 to index
    %c0_39 = arith.constant 0 : index
    %70 = vector.load %arg19[%69, %c0_39] : memref<8x32xf32, #tpu.memory_space<vmem>>, vector<8x32xf32>
    %71 = tpu.transpose %70, [1, 0] : vector<8x32xf32> -> vector<32x8xf32>
    %72 = vector.extract_strided_slice %61 {offsets = [0, 0], sizes = [1, 32], strides = [1, 1]} : vector<8x32xf32> to vector<1x32xf32>
    %73 = vector.extract_strided_slice %71 {offsets = [0, 0], sizes = [16, 1], strides = [1, 1]} : vector<32x8xf32> to vector<16x1xf32>
    %74 = vector.extract_strided_slice %71 {offsets = [16, 0], sizes = [16, 1], strides = [1, 1]} : vector<32x8xf32> to vector<16x1xf32>
    %c0_40 = arith.constant 0 : index
    %c0_41 = arith.constant 0 : index
    %c0_42 = arith.constant 0 : index
    %75 = vector.load %arg22[%c0_40, %c0_41, %c0_42] : memref<8x16x32xf32, #tpu.memory_space<vmem>>, vector<1x16x32xf32>
    %76 = vector.shape_cast %75 : vector<1x16x32xf32> to vector<16x32xf32>
    %77 = arith.mulf %76, %55 : vector<16x32xf32>
    %78 = vector.broadcast %73 : vector<16x1xf32> to vector<16x32xf32>
    %79 = vector.broadcast %72 : vector<1x32xf32> to vector<16x32xf32>
    %80 = arith.mulf %78, %79 : vector<16x32xf32>
    %81 = arith.addf %77, %80 : vector<16x32xf32>
    %82 = vector.broadcast %74 : vector<16x1xf32> to vector<16x32xf32>
    %83 = arith.mulf %82, %81 : vector<16x32xf32>
    %cst_43 = arith.constant dense<0.000000e+00> : vector<32xf32>
    %84 = vector.multi_reduction <add>, %83, %cst_43 [0] : vector<16x32xf32> to vector<32xf32>
    %85 = vector.shape_cast %84 : vector<32xf32> to vector<1x32xf32>
    %86 = vector.extract_strided_slice %61 {offsets = [1, 0], sizes = [1, 32], strides = [1, 1]} : vector<8x32xf32> to vector<1x32xf32>
    %87 = vector.extract_strided_slice %71 {offsets = [0, 1], sizes = [16, 1], strides = [1, 1]} : vector<32x8xf32> to vector<16x1xf32>
    %88 = vector.extract_strided_slice %71 {offsets = [16, 1], sizes = [16, 1], strides = [1, 1]} : vector<32x8xf32> to vector<16x1xf32>
    %c1 = arith.constant 1 : index
    %c0_44 = arith.constant 0 : index
    %c0_45 = arith.constant 0 : index
    %89 = vector.load %arg22[%c1, %c0_44, %c0_45] : memref<8x16x32xf32, #tpu.memory_space<vmem>>, vector<1x16x32xf32>
    %90 = vector.shape_cast %89 : vector<1x16x32xf32> to vector<16x32xf32>
    %91 = arith.mulf %90, %81 : vector<16x32xf32>
    %92 = vector.broadcast %87 : vector<16x1xf32> to vector<16x32xf32>
    %93 = vector.broadcast %86 : vector<1x32xf32> to vector<16x32xf32>
    %94 = arith.mulf %92, %93 : vector<16x32xf32>
    %95 = arith.addf %91, %94 : vector<16x32xf32>
    %96 = vector.broadcast %88 : vector<16x1xf32> to vector<16x32xf32>
    %97 = arith.mulf %96, %95 : vector<16x32xf32>
    %cst_46 = arith.constant dense<0.000000e+00> : vector<32xf32>
    %98 = vector.multi_reduction <add>, %97, %cst_46 [0] : vector<16x32xf32> to vector<32xf32>
    %99 = vector.shape_cast %98 : vector<32xf32> to vector<1x32xf32>
    %100 = vector.extract_strided_slice %61 {offsets = [2, 0], sizes = [1, 32], strides = [1, 1]} : vector<8x32xf32> to vector<1x32xf32>
    %101 = vector.extract_strided_slice %71 {offsets = [0, 2], sizes = [16, 1], strides = [1, 1]} : vector<32x8xf32> to vector<16x1xf32>
    %102 = vector.extract_strided_slice %71 {offsets = [16, 2], sizes = [16, 1], strides = [1, 1]} : vector<32x8xf32> to vector<16x1xf32>
    %c2 = arith.constant 2 : index
    %c0_47 = arith.constant 0 : index
    %c0_48 = arith.constant 0 : index
    %103 = vector.load %arg22[%c2, %c0_47, %c0_48] : memref<8x16x32xf32, #tpu.memory_space<vmem>>, vector<1x16x32xf32>
    %104 = vector.shape_cast %103 : vector<1x16x32xf32> to vector<16x32xf32>
    %105 = arith.mulf %104, %95 : vector<16x32xf32>
    %106 = vector.broadcast %101 : vector<16x1xf32> to vector<16x32xf32>
    %107 = vector.broadcast %100 : vector<1x32xf32> to vector<16x32xf32>
    %108 = arith.mulf %106, %107 : vector<16x32xf32>
    %109 = arith.addf %105, %108 : vector<16x32xf32>
    %110 = vector.broadcast %102 : vector<16x1xf32> to vector<16x32xf32>
    %111 = arith.mulf %110, %109 : vector<16x32xf32>
    %cst_49 = arith.constant dense<0.000000e+00> : vector<32xf32>
    %112 = vector.multi_reduction <add>, %111, %cst_49 [0] : vector<16x32xf32> to vector<32xf32>
    %113 = vector.shape_cast %112 : vector<32xf32> to vector<1x32xf32>
    %114 = vector.extract_strided_slice %61 {offsets = [3, 0], sizes = [1, 32], strides = [1, 1]} : vector<8x32xf32> to vector<1x32xf32>
    %115 = vector.extract_strided_slice %71 {offsets = [0, 3], sizes = [16, 1], strides = [1, 1]} : vector<32x8xf32> to vector<16x1xf32>
    %116 = vector.extract_strided_slice %71 {offsets = [16, 3], sizes = [16, 1], strides = [1, 1]} : vector<32x8xf32> to vector<16x1xf32>
    %c3 = arith.constant 3 : index
    %c0_50 = arith.constant 0 : index
    %c0_51 = arith.constant 0 : index
    %117 = vector.load %arg22[%c3, %c0_50, %c0_51] : memref<8x16x32xf32, #tpu.memory_space<vmem>>, vector<1x16x32xf32>
    %118 = vector.shape_cast %117 : vector<1x16x32xf32> to vector<16x32xf32>
    %119 = arith.mulf %118, %109 : vector<16x32xf32>
    %120 = vector.broadcast %115 : vector<16x1xf32> to vector<16x32xf32>
    %121 = vector.broadcast %114 : vector<1x32xf32> to vector<16x32xf32>
    %122 = arith.mulf %120, %121 : vector<16x32xf32>
    %123 = arith.addf %119, %122 : vector<16x32xf32>
    %124 = vector.broadcast %116 : vector<16x1xf32> to vector<16x32xf32>
    %125 = arith.mulf %124, %123 : vector<16x32xf32>
    %cst_52 = arith.constant dense<0.000000e+00> : vector<32xf32>
    %126 = vector.multi_reduction <add>, %125, %cst_52 [0] : vector<16x32xf32> to vector<32xf32>
    %127 = vector.shape_cast %126 : vector<32xf32> to vector<1x32xf32>
    %128 = vector.extract_strided_slice %61 {offsets = [4, 0], sizes = [1, 32], strides = [1, 1]} : vector<8x32xf32> to vector<1x32xf32>
    %129 = vector.extract_strided_slice %71 {offsets = [0, 4], sizes = [16, 1], strides = [1, 1]} : vector<32x8xf32> to vector<16x1xf32>
    %130 = vector.extract_strided_slice %71 {offsets = [16, 4], sizes = [16, 1], strides = [1, 1]} : vector<32x8xf32> to vector<16x1xf32>
    %c4 = arith.constant 4 : index
    %c0_53 = arith.constant 0 : index
    %c0_54 = arith.constant 0 : index
    %131 = vector.load %arg22[%c4, %c0_53, %c0_54] : memref<8x16x32xf32, #tpu.memory_space<vmem>>, vector<1x16x32xf32>
    %132 = vector.shape_cast %131 : vector<1x16x32xf32> to vector<16x32xf32>
    %133 = arith.mulf %132, %123 : vector<16x32xf32>
    %134 = vector.broadcast %129 : vector<16x1xf32> to vector<16x32xf32>
    %135 = vector.broadcast %128 : vector<1x32xf32> to vector<16x32xf32>
    %136 = arith.mulf %134, %135 : vector<16x32xf32>
    %137 = arith.addf %133, %136 : vector<16x32xf32>
    %138 = vector.broadcast %130 : vector<16x1xf32> to vector<16x32xf32>
    %139 = arith.mulf %138, %137 : vector<16x32xf32>
    %cst_55 = arith.constant dense<0.000000e+00> : vector<32xf32>
    %140 = vector.multi_reduction <add>, %139, %cst_55 [0] : vector<16x32xf32> to vector<32xf32>
    %141 = vector.shape_cast %140 : vector<32xf32> to vector<1x32xf32>
    %142 = vector.extract_strided_slice %61 {offsets = [5, 0], sizes = [1, 32], strides = [1, 1]} : vector<8x32xf32> to vector<1x32xf32>
    %143 = vector.extract_strided_slice %71 {offsets = [0, 5], sizes = [16, 1], strides = [1, 1]} : vector<32x8xf32> to vector<16x1xf32>
    %144 = vector.extract_strided_slice %71 {offsets = [16, 5], sizes = [16, 1], strides = [1, 1]} : vector<32x8xf32> to vector<16x1xf32>
    %c5 = arith.constant 5 : index
    %c0_56 = arith.constant 0 : index
    %c0_57 = arith.constant 0 : index
    %145 = vector.load %arg22[%c5, %c0_56, %c0_57] : memref<8x16x32xf32, #tpu.memory_space<vmem>>, vector<1x16x32xf32>
    %146 = vector.shape_cast %145 : vector<1x16x32xf32> to vector<16x32xf32>
    %147 = arith.mulf %146, %137 : vector<16x32xf32>
    %148 = vector.broadcast %143 : vector<16x1xf32> to vector<16x32xf32>
    %149 = vector.broadcast %142 : vector<1x32xf32> to vector<16x32xf32>
    %150 = arith.mulf %148, %149 : vector<16x32xf32>
    %151 = arith.addf %147, %150 : vector<16x32xf32>
    %152 = vector.broadcast %144 : vector<16x1xf32> to vector<16x32xf32>
    %153 = arith.mulf %152, %151 : vector<16x32xf32>
    %cst_58 = arith.constant dense<0.000000e+00> : vector<32xf32>
    %154 = vector.multi_reduction <add>, %153, %cst_58 [0] : vector<16x32xf32> to vector<32xf32>
    %155 = vector.shape_cast %154 : vector<32xf32> to vector<1x32xf32>
    %156 = vector.extract_strided_slice %61 {offsets = [6, 0], sizes = [1, 32], strides = [1, 1]} : vector<8x32xf32> to vector<1x32xf32>
    %157 = vector.extract_strided_slice %71 {offsets = [0, 6], sizes = [16, 1], strides = [1, 1]} : vector<32x8xf32> to vector<16x1xf32>
    %158 = vector.extract_strided_slice %71 {offsets = [16, 6], sizes = [16, 1], strides = [1, 1]} : vector<32x8xf32> to vector<16x1xf32>
    %c6 = arith.constant 6 : index
    %c0_59 = arith.constant 0 : index
    %c0_60 = arith.constant 0 : index
    %159 = vector.load %arg22[%c6, %c0_59, %c0_60] : memref<8x16x32xf32, #tpu.memory_space<vmem>>, vector<1x16x32xf32>
    %160 = vector.shape_cast %159 : vector<1x16x32xf32> to vector<16x32xf32>
    %161 = arith.mulf %160, %151 : vector<16x32xf32>
    %162 = vector.broadcast %157 : vector<16x1xf32> to vector<16x32xf32>
    %163 = vector.broadcast %156 : vector<1x32xf32> to vector<16x32xf32>
    %164 = arith.mulf %162, %163 : vector<16x32xf32>
    %165 = arith.addf %161, %164 : vector<16x32xf32>
    %166 = vector.broadcast %158 : vector<16x1xf32> to vector<16x32xf32>
    %167 = arith.mulf %166, %165 : vector<16x32xf32>
    %cst_61 = arith.constant dense<0.000000e+00> : vector<32xf32>
    %168 = vector.multi_reduction <add>, %167, %cst_61 [0] : vector<16x32xf32> to vector<32xf32>
    %169 = vector.shape_cast %168 : vector<32xf32> to vector<1x32xf32>
    %170 = vector.extract_strided_slice %61 {offsets = [7, 0], sizes = [1, 32], strides = [1, 1]} : vector<8x32xf32> to vector<1x32xf32>
    %171 = vector.extract_strided_slice %71 {offsets = [0, 7], sizes = [16, 1], strides = [1, 1]} : vector<32x8xf32> to vector<16x1xf32>
    %172 = vector.extract_strided_slice %71 {offsets = [16, 7], sizes = [16, 1], strides = [1, 1]} : vector<32x8xf32> to vector<16x1xf32>
    %c7 = arith.constant 7 : index
    %c0_62 = arith.constant 0 : index
    %c0_63 = arith.constant 0 : index
    %173 = vector.load %arg22[%c7, %c0_62, %c0_63] : memref<8x16x32xf32, #tpu.memory_space<vmem>>, vector<1x16x32xf32>
    %174 = vector.shape_cast %173 : vector<1x16x32xf32> to vector<16x32xf32>
    %175 = arith.mulf %174, %165 : vector<16x32xf32>
    %176 = vector.broadcast %171 : vector<16x1xf32> to vector<16x32xf32>
    %177 = vector.broadcast %170 : vector<1x32xf32> to vector<16x32xf32>
    %178 = arith.mulf %176, %177 : vector<16x32xf32>
    %179 = arith.addf %175, %178 : vector<16x32xf32>
    %180 = vector.broadcast %172 : vector<16x1xf32> to vector<16x32xf32>
    %181 = arith.mulf %180, %179 : vector<16x32xf32>
    %cst_64 = arith.constant dense<0.000000e+00> : vector<32xf32>
    %182 = vector.multi_reduction <add>, %181, %cst_64 [0] : vector<16x32xf32> to vector<32xf32>
    %183 = vector.shape_cast %182 : vector<32xf32> to vector<1x32xf32>
    %184 = tpu.concatenate %85, %99, %113, %127, %141, %155, %169, %183 in 0 : vector<1x32xf32>, vector<1x32xf32>, vector<1x32xf32>, vector<1x32xf32>, vector<1x32xf32>, vector<1x32xf32>, vector<1x32xf32>, vector<1x32xf32> -> vector<8x32xf32>
    %185 = arith.index_cast %57 : i32 to index
    %c0_65 = arith.constant 0 : index
    %186 = vector.load %arg21[%185, %c0_65] : memref<8x32xf32, #tpu.memory_space<vmem>>, vector<8x32xf32>
    tpu.vector_store %arg21[%185, %c0_65], %184 {strides = array<i32>} : memref<8x32xf32, #tpu.memory_space<vmem>>, vector<8x32xf32>,
    %c1_i32 = arith.constant 1 : i32
    %c0_66 = arith.constant 0 : index
    %c0_67 = arith.constant 0 : index
    %187 = vector.load %arg16[%c0_66, %c0_67] : memref<16x32xf32, #tpu.memory_space<vmem>>, vector<16x32xf32>
    tpu.vector_store %arg16[%c0_66, %c0_67], %179 {strides = array<i32>} : memref<16x32xf32, #tpu.memory_space<vmem>>, vector<16x32xf32>,
    %c0_68 = arith.constant 0 : index
    %c0_69 = arith.constant 0 : index
    %188 = vector.load %arg20[%c0_68, %c0_69] : memref<8x32xf32, #tpu.memory_space<vmem>>, vector<8x32xf32>
    %c0_70 = arith.constant 0 : index
    %c0_71 = arith.constant 0 : index
    %189 = vector.load %arg21[%c0_70, %c0_71] : memref<8x32xf32, #tpu.memory_space<vmem>>, vector<8x32xf32>
    %190 = arith.addf %188, %189 : vector<8x32xf32>
    %cst_72 = arith.constant dense<0.000000e+00> : vector<8xf32>
    %191 = vector.multi_reduction <add>, %190, %cst_72 [1] : vector<8x32xf32> to vector<8xf32>
    %192 = vector.shape_cast %191 : vector<8xf32> to vector<8x1xf32>
    %cst_73 = arith.constant 3.200000e+01 : f32
    %193 = vector.broadcast %cst_73 : f32 to vector<8x1xf32>
    %194 = arith.divf %192, %193 : vector<8x1xf32>
    %195 = vector.broadcast %194 : vector<8x1xf32> to vector<8x32xf32>
    %196 = arith.subf %190, %195 : vector<8x32xf32>
    %197 = arith.mulf %196, %196 : vector<8x32xf32>
    %cst_74 = arith.constant dense<0.000000e+00> : vector<8xf32>
    %198 = vector.multi_reduction <add>, %197, %cst_74 [1] : vector<8x32xf32> to vector<8xf32>
    %199 = vector.shape_cast %198 : vector<8xf32> to vector<8x1xf32>
    %cst_75 = arith.constant 3.200000e+01 : f32
    %200 = vector.broadcast %cst_75 : f32 to vector<8x1xf32>
    %201 = arith.divf %199, %200 : vector<8x1xf32>
    %cst_76 = arith.constant 9.99999974E-6 : f32
    %202 = vector.broadcast %cst_76 : f32 to vector<8x1xf32>
    %203 = arith.addf %201, %202 : vector<8x1xf32>
    %204 = math.rsqrt %203 : vector<8x1xf32>
    %205 = vector.broadcast %204 : vector<8x1xf32> to vector<8x32xf32>
    %206 = arith.mulf %196, %205 : vector<8x32xf32>
    %c0_77 = arith.constant 0 : index
    %c0_78 = arith.constant 0 : index
    %207 = vector.load %arg9[%c0_77, %c0_78] : memref<1x32xf32, #tpu.memory_space<vmem>>, vector<1x32xf32>
    %208 = vector.broadcast %207 : vector<1x32xf32> to vector<8x32xf32>
    %209 = arith.mulf %206, %208 : vector<8x32xf32>
    %c0_79 = arith.constant 0 : index
    %c0_80 = arith.constant 0 : index
    %210 = vector.load %arg10[%c0_79, %c0_80] : memref<1x32xf32, #tpu.memory_space<vmem>>, vector<1x32xf32>
    %211 = vector.broadcast %210 : vector<1x32xf32> to vector<8x32xf32>
    %212 = arith.addf %209, %211 : vector<8x32xf32>
    %213 = arith.truncf %212 : vector<8x32xf32> to vector<8x32xbf16>
    %cst_81 = arith.constant 0.000000e+00 : f32
    %214 = vector.broadcast %cst_81 : f32 to vector<8x32xf32>
    %c0_82 = arith.constant 0 : index
    %c0_83 = arith.constant 0 : index
    %215 = vector.load %arg14[%c0_82, %c0_83] : memref<1x32xf32, #tpu.memory_space<vmem>>, vector<1x32xf32>
    %216 = vector.broadcast %215 : vector<1x32xf32> to vector<8x32xf32>
    %217 = arith.addf %214, %216 : vector<8x32xf32>
    %c0_84 = arith.constant 0 : index
    %c0_85 = arith.constant 0 : index
    %218 = vector.load %arg11[%c0_84, %c0_85] : memref<32x64xbf16, #tpu.memory_space<vmem>>, vector<32x64xbf16>
    %cst_86 = arith.constant dense<0.000000e+00> : vector<8x64xf32>
    %219 = tpu.matmul %213, %218, %cst_86 {dimension_numbers = #tpu.dot_dimension_numbers<[1], [0], [0], [1], [0, 0, 1, 1], [], []>} : vector<8x32xbf16>, vector<32x64xbf16>, vector<8x64xf32> -> vector<8x64xf32>
    %c0_87 = arith.constant 0 : index
    %c0_88 = arith.constant 0 : index
    %220 = vector.load %arg12[%c0_87, %c0_88] : memref<1x64xf32, #tpu.memory_space<vmem>>, vector<1x64xf32>
    %221 = vector.broadcast %220 : vector<1x64xf32> to vector<8x64xf32>
    %222 = arith.addf %219, %221 : vector<8x64xf32>
    %cst_89 = arith.constant 5.000000e-01 : f32
    %223 = vector.broadcast %cst_89 : f32 to vector<8x64xf32>
    %224 = arith.mulf %223, %222 : vector<8x64xf32>
    %cst_90 = arith.constant 0.707106769 : f32
    %225 = vector.broadcast %cst_90 : f32 to vector<8x64xf32>
    %226 = arith.mulf %222, %225 : vector<8x64xf32>
    %227 = math.erf %226 : vector<8x64xf32>
    %cst_91 = arith.constant 1.000000e+00 : f32
    %228 = vector.broadcast %cst_91 : f32 to vector<8x64xf32>
    %229 = arith.addf %228, %227 : vector<8x64xf32>
    %230 = arith.mulf %224, %229 : vector<8x64xf32>
    %231 = arith.truncf %230 : vector<8x64xf32> to vector<8x64xbf16>
    %c0_92 = arith.constant 0 : index
    %c0_93 = arith.constant 0 : index
    %232 = vector.load %arg13[%c0_92, %c0_93] : memref<64x32xbf16, #tpu.memory_space<vmem>>, vector<64x32xbf16>
    %cst_94 = arith.constant dense<0.000000e+00> : vector<8x32xf32>
    %233 = tpu.matmul %231, %232, %cst_94 {dimension_numbers = #tpu.dot_dimension_numbers<[1], [0], [0], [1], [0, 0, 1, 1], [], []>} : vector<8x64xbf16>, vector<64x32xbf16>, vector<8x32xf32> -> vector<8x32xf32>
    %234 = arith.addf %217, %233 : vector<8x32xf32>
    %235 = arith.addf %190, %234 : vector<8x32xf32>
    %c0_95 = arith.constant 0 : index
    %c0_96 = arith.constant 0 : index
    %c0_97 = arith.constant 0 : index
    %236 = vector.load %arg15[%c0_95, %c0_96, %c0_97] : memref<1x8x32xf32, #tpu.memory_space<vmem>>, vector<1x8x32xf32>
    %237 = vector.shape_cast %236 : vector<1x8x32xf32> to vector<8x32xf32>
    %238 = vector.shape_cast %235 : vector<8x32xf32> to vector<1x8x32xf32>
    tpu.vector_store %arg15[%c0_95, %c0_96, %c0_97], %238 {strides = array<i32>} : memref<1x8x32xf32, #tpu.memory_space<vmem>>, vector<1x8x32xf32>,
    return
  }
  func.func @transform_0(%arg0: i32, %arg1: i32) -> (i32, i32, i32) {
    %c0_i32 = arith.constant 0 : i32
    %c0_i32_0 = arith.constant 0 : i32
    return %arg0, %arg1, %c0_i32 : i32, i32, i32
  }
  func.func @transform_1(%arg0: i32, %arg1: i32) -> (i32, i32) {
    %c0_i32 = arith.constant 0 : i32
    %c0_i32_0 = arith.constant 0 : i32
    %c0_i32_1 = arith.constant 0 : i32
    return %c0_i32, %c0_i32_0 : i32, i32
  }
  func.func @transform_2(%arg0: i32, %arg1: i32) -> (i32, i32) {
    %c0_i32 = arith.constant 0 : i32
    %c0_i32_0 = arith.constant 0 : i32
    %c0_i32_1 = arith.constant 0 : i32
    return %c0_i32, %c0_i32_0 : i32, i32
  }
  func.func @transform_3(%arg0: i32, %arg1: i32) -> (i32, i32) {
    %c0_i32 = arith.constant 0 : i32
    %c0_i32_0 = arith.constant 0 : i32
    %c0_i32_1 = arith.constant 0 : i32
    return %c0_i32, %c0_i32_0 : i32, i32
  }
  func.func @transform_4(%arg0: i32, %arg1: i32) -> (i32, i32) {
    %c0_i32 = arith.constant 0 : i32
    %c0_i32_0 = arith.constant 0 : i32
    %c0_i32_1 = arith.constant 0 : i32
    return %c0_i32, %c0_i32_0 : i32, i32
  }
  func.func @transform_5(%arg0: i32, %arg1: i32) -> (i32, i32) {
    %c0_i32 = arith.constant 0 : i32
    %c0_i32_0 = arith.constant 0 : i32
    %c0_i32_1 = arith.constant 0 : i32
    return %c0_i32, %c0_i32_0 : i32, i32
  }
  func.func @transform_6(%arg0: i32, %arg1: i32) -> (i32, i32) {
    %c0_i32 = arith.constant 0 : i32
    %c0_i32_0 = arith.constant 0 : i32
    %c0_i32_1 = arith.constant 0 : i32
    return %c0_i32, %c0_i32_0 : i32, i32
  }
  func.func @transform_7(%arg0: i32, %arg1: i32) -> (i32, i32) {
    %c0_i32 = arith.constant 0 : i32
    %c0_i32_0 = arith.constant 0 : i32
    %c0_i32_1 = arith.constant 0 : i32
    return %c0_i32, %c0_i32_0 : i32, i32
  }
  func.func @transform_8(%arg0: i32, %arg1: i32) -> (i32, i32) {
    %c0_i32 = arith.constant 0 : i32
    %c0_i32_0 = arith.constant 0 : i32
    %c0_i32_1 = arith.constant 0 : i32
    return %c0_i32, %c0_i32_0 : i32, i32
  }
  func.func @transform_9(%arg0: i32, %arg1: i32) -> (i32, i32) {
    %c0_i32 = arith.constant 0 : i32
    %c0_i32_0 = arith.constant 0 : i32
    %c0_i32_1 = arith.constant 0 : i32
    return %c0_i32, %c0_i32_0 : i32, i32
  }
  func.func @transform_10(%arg0: i32, %arg1: i32) -> (i32, i32) {
    %c0_i32 = arith.constant 0 : i32
    %c0_i32_0 = arith.constant 0 : i32
    %c0_i32_1 = arith.constant 0 : i32
    return %c0_i32, %c0_i32_0 : i32, i32
  }
  func.func @transform_11(%arg0: i32, %arg1: i32) -> (i32, i32) {
    %c0_i32 = arith.constant 0 : i32
    %c0_i32_0 = arith.constant 0 : i32
    %c0_i32_1 = arith.constant 0 : i32
    return %c0_i32, %c0_i32_0 : i32, i32
  }
  func.func @transform_12(%arg0: i32, %arg1: i32) -> (i32, i32) {
    %c0_i32 = arith.constant 0 : i32
    %c0_i32_0 = arith.constant 0 : i32
    %c0_i32_1 = arith.constant 0 : i32
    return %c0_i32, %c0_i32_0 : i32, i32
  }
  func.func @transform_13(%arg0: i32, %arg1: i32) -> (i32, i32, i32) {
    %c0_i32 = arith.constant 0 : i32
    %c0_i32_0 = arith.constant 0 : i32
    return %arg0, %arg1, %c0_i32 : i32, i32, i32
  }
}

</mosaic_0001>

<bundles_post_ra>
// kernel: tpu_custom_call.1
= control target key start
LH: loop header
LB: loop body
LE: loop exit
PB: predicated region body
PF: predicated region fallthrough
CT: control target
= control target key end

     0   :  { %s2563_s0 = inlined_call_operand.vmem [shape: f32[2,16,32], index: 0, kind: input, shape index: {}]   ;;  %s2564_s1 = inlined_call_operand.vmem [shape: f32[1,32], index: 1, kind: input, shape index: {}]   ;;  %s2565_s2 = inlined_call_operand.vmem [shape: f32[1,32], index: 2, kind: input, shape index: {}]   ;;  %s2566_s3 = inlined_call_operand.vmem [shape: bf16[32,64], index: 3, kind: input, shape index: {}]   ;;  %s2567_s4 = inlined_call_operand.vmem [shape: f32[1,64], index: 4, kind: input, shape index: {}]   ;;  %s2568_s5 = inlined_call_operand.hbm [shape: f32[16,32], index: 5, kind: input, shape index: {}]   ;;  %s2569_s6 = inlined_call_operand.vmem [shape: f32[1,32], index: 6, kind: input, shape index: {}]   ;;  %s2570_s7 = inlined_call_operand.hbm [shape: f32[1,32], index: 7, kind: input, shape index: {}]   ;;  %s2571_s8 = inlined_call_operand.hbm [shape: f32[1,32], index: 8, kind: input, shape index: {}]   ;;  %s2572_s9 = inlined_call_operand.hbm [shape: bf16[32,64], index: 9, kind: input, shape index: {}]   ;;  %s2573_s10 = inlined_call_operand.hbm [shape: f32[1,64], index: 10, kind: input, shape index: {}]   ;;  %s2574_s11 = inlined_call_operand.vmem [shape: bf16[64,32], index: 11, kind: input, shape index: {}]   ;;  %s2575_s12 = inlined_call_operand.vmem [shape: f32[1,32], index: 12, kind: input, shape index: {}]   ;;  %s2576_s13 = inlined_call_operand.hbm [shape: f32[2,16,32], index: 13, kind: output, shape index: {}]  }
   0x1   :  { %2589 = sst [smem:[#allocation31_spill]] %s2570_s7 }
   0x2   :  { %2590 = sst [smem:[#allocation32_spill]] %s2572_s9 }
   0x3   :  { %2591 = sst [smem:[#allocation33_spill]] %s2576_s13 }
   0x4   :  { %18 = vsyncpa [#allocation10], 0 }
   0x5   :  { %19 = vsyncpa [#allocation13], 0 }
   0x6   :  { %20 = vsyncpa [#allocation16], 0 }
   0x7   :  { %21 = vsyncpa [#allocation11], 0 }
   0x8   :  { %23 = vsyncpa [#allocation11 + $0x1], 0  ;;  %s2167_s25 = smov 0   ;;  %s2169_s26 = smov 0  }
   0x9   :  { %s2171_s27 = smov 0   ;;  %s2173_s28 = smov 0  }
   0xa   :  { %s2175_s29 = smov 0   ;;  %s2177_s30 = smov 0  }
   0xb   :  { %s2179_s14 = smov 0   ;;  %s2181_s15 = smov 0  }
   0xc LB: > { %2592 = sst [smem:[#allocation23_spill]] %s2044_s25  ;;  %s1534_s16 = sadd.s32 4294967295, %s2072_s15   ;;  %s2072_s15 = sphi %s2181_s15, %s29_s15   ;;  %s2068_s14 = sphi %s2179_s14, %s2621_s14   ;;  %s2064_s30 = sphi %s2177_s30, %s2620_s30   ;;  %s2060_s29 = sphi %s2175_s29, %s2619_s29   ;;  %s2056_s28 = sphi %s2173_s28, %s2618_s28   ;;  %s2052_s27 = sphi %s2171_s27, %s2617_s27   ;;  %s2048_s26 = sphi %s2169_s26, %s2623_s26   ;;  %s2044_s25 = sphi %s2167_s25, %s2622_s25  }
   0xd   : > { %2593 = sst [smem:[#allocation24_spill]] %s2052_s27  ;;  %s1535_s17 = sadd.s32 4294967294, %s2072_s15  }
   0xe   : > { %2594 = sst [smem:[#allocation25_spill]] %s2064_s30  ;;  %s38_s18 = sadd.s32 1, %s2064_s30 }
   0xf   : > { %2595 = sst [smem:[#allocation26_spill]] %s2068_s14  ;;  %s41_s19 = sadd.s32 1, %s2068_s14 }
  0x10   : > { %p39_p0 = scmp.ge.s32.totalorder %s38_s18, 2  ;;  %s330_s20 = sadd.s32 1, %s2052_s27 }
  0x11   : > { %p340_p1 = scmp.ne.s32.totalorder %s2052_s27, %s2048_s26  ;;  %p341_p2 = scmp.eq.s32.totalorder %s1534_s16, 3 }
  0x12   : > { %s2625_s18 = smov (%p39_p0, %s38_s18), 0  ;;  %s2627_s19 = smov (!%p39_p0, %s41_s19), %s2068_s14 }
  0x13   : > { %2596 = sst [smem:[#allocation27_spill]] %s2625_s18  ;;  %s326_s21 = ssub.s32 %s2064_s30, %s2625_s18 }
  0x14   : > { %p2219_p3 = por %p341_p2, %p340_p1  ;;  %p43_p4 = scmp.ge.s32.totalorder %s2627_s19, 2 }
  0x15   : > { %p346_p5 = scmp.ne.s32.totalorder %s2048_s26, %s2044_s25  ;;  %p347_p6 = scmp.eq.s32.totalorder %s1535_s17, 3 }
  0x16   : > { %s2597_s22 = scalar_select %p2219_p3, 1, 0 }
  0x17   : > { %p1536_p7 = scmp.ge.s32.totalorder %s2072_s15, 1  ;;  %s2629_s19 = smov (%p43_p4, %s2627_s19), 0 }
  0x18   : > { %2598 = sst [smem:[#allocation28_spill]] %s2629_s19  ;;  %p2228_p8 = por %p347_p6, %p346_p5 }
  0x19   : > { %p354_p9 = scmp.lt.s32.totalorder %s2072_s15, 5  ;;  %s325_s24 = ssub.s32 %s2068_s14, %s2629_s19 }
  0x1a   : > { %s2599_s23 = scalar_select %p2228_p8, 1, 0 }
  0x1b   : > { %s327_s13 = sor.u32 %s326_s21, %s325_s24  ;;  %p2235_p10 = pnand %p1536_p7, %p354_p9 }
  0x1c   : > { %2600 = sst [smem:[#allocation29_spill]] %s2599_s23  ;;  %p328_p11 = scmp.eq.s32.totalorder %s327_s13, 0 }
  0x1d   : > { %s2601_s18 = scalar_select %p2235_p10, 1, 0 }
  0x1e   : > { %p2239_p12 = scmp.eq.s32.totalorder %s1534_s16, 0  ;;  %p1638_p13 = pneg %p2235_p10 }
  0x1f   : > { %s2246_s17 = scalar_select %p328_p11, %s2052_s27, %s330_s20  }
  0x20   : > { %s2602_s30 = scalar_select %p2239_p12, 1, 0 }
  0x21   : > { %2603 = sst [smem:[#allocation30_spill]] %s2246_s17  ;;  %p2250_p0 = pnand %p2239_p12, %p1638_p13 }
  0x22   : > { %s2074_s21 = smov [#allocation12]   ;;  %s2075_s19 = smov [#allocation15]  }
  0x23   : > { %s395_s24 = sshll.u32 %s2074_s21, 4  ;;  %s416_s13 = sshll.u32 %s2075_s19, 4  ;;  %s396_s24 = int_to_ptr.vmem [resolvable:$true] %s395_s24  ;;  %s417_s13 = int_to_ptr.vmem [resolvable:$true] %s416_s13 }
  0x24   : > { %p2256_p1 = pneg %p2250_p0  ;;  %s1849_s14 = scalar_lea.vmem %s396_s24, 16 }
  0x25   : > { %p1850_p2 = scmp.ne.s32.totalorder %s396_s24, %s1849_s14  ;;  %s1856_s20 = scalar_lea.vmem %s396_s24, 32 }
  0x26   : > { %p1857_p6 = scmp.lt.s32.totalorder %s396_s24, %s396_s24  ;;  %p1858_p7 = scmp.lt.s32.totalorder %s1856_s20, %s1849_s14 }
  0x27   : > { %p1852_p4 = pnand %p1850_p2, %p2256_p1 }
  0x28   : > { %p1859_p9 = por %p1858_p7, %p1857_p6 }
  0x29   : > { %p1853_p5 = pneg %p1852_p4 }
  0x2b   : > { %p1860_p11 = pnand %p1859_p9, %p1853_p5 }
  0x2d   : > { %1863 = shalt.err (!%p1860_p11)
}
  0x2e   : > { %s2606_s7 = sld [smem:[#allocation31_spill]]  ;;  %s1875_s17 = scalar_lea.vmem %s417_s13, 256 }
  0x2f   : > { %p1876_p13 = scmp.ne.s32.totalorder %s417_s13, %s1875_s17  ;;  %p1883_p4 = scmp.lt.s32.totalorder %s417_s13, %s417_s13 }
  0x30   : > { %p1884_p3 = scmp.lt.s32.totalorder %s1875_s17, %s1875_s17 }
  0x31   : > { %p1878_p8 = pnand %p1876_p13, %p2256_p1 }
  0x32   : > { %p1885_p12 = por %p1884_p3, %p1883_p4 }
  0x33   : > { %p1879_p2 = pneg %p1878_p8 }
  0x34   : > { %1644 = dma.hbm_to_vmem [thread:$0]  (!%p2250_p0), %s2606_s7, 16, %s396_s24, [#allocation13]  }
  0x35   : > { %p1886_p10 = pnand %p1885_p12, %p1879_p2 }
  0x37   : > { %1889 = shalt.err (!%p1886_p10)
}
  0x38   : > { %s2076_s14 = smov 64   ;;  %s2077_s20 = smov 4  }
  0x39   : > { %s2607_s9 = sld [smem:[#allocation32_spill]]  ;;  %s2078_s24 = smov [#allocation9]  }
  0x3a   : > { %s378_s21 = sshll.u32 %s2078_s24, 4  ;;  %s379_s21 = int_to_ptr.vmem [resolvable:$true] %s378_s21 }
  0x3b   : > { %s1901_s7 = scalar_lea.vmem %s379_s21, 256  ;;  %p1909_p3 = scmp.lt.s32.totalorder %s379_s21, %s379_s21 }
  0x3c   : > { %p1902_p5 = scmp.ne.s32.totalorder %s379_s21, %s1901_s7  ;;  %p1910_p12 = scmp.lt.s32.totalorder %s1901_s7, %s1901_s7 }
  0x3e   : > { %p1904_p8 = pnand %p1902_p5, %p2256_p1  ;;  %p1911_p10 = por %p1910_p12, %p1909_p3 }
  0x3f   : > { %1650 = dma.hbm_to_vmem [thread:$0]  (!%p2250_p0), %s2607_s9, 256, %s417_s13, [#allocation16], %s2076_s14, %s2076_s14, %s2077_s20  }
  0x40   : > { %p1905_p6 = pneg %p1904_p8 }
  0x42   : > { %p1912_p7 = pnand %p1911_p10, %p1905_p6 }
  0x44   : > { %1915 = shalt.err (!%p1912_p7)
}
  0x45   : > { %s2079_s17 = smov 128   ;;  %s2080_s25 = smov 8  }
  0x46   : > { %1641 = dma.hbm_to_vmem [thread:$0]  (!%p2250_p0), %s2568_s5, 256, %s379_s21, [#allocation10], %s2079_s17, %s2079_s17, %s2080_s25  }
  0x47   : > { %s2081_s14 = smov [#allocation14]   ;;  %s2082_s19 = smov [#allocation17]  }
  0x48   : > { %s406_s20 = sshll.u32 %s2081_s14, 4  ;;  %s430_s24 = sshll.u32 %s2082_s19, 4  ;;  %s407_s20 = int_to_ptr.vmem [resolvable:$true] %s406_s20  ;;  %s431_s24 = int_to_ptr.vmem [resolvable:$true] %s430_s24 }
  0x49   : > { %s1927_s9 = scalar_lea.vmem %s407_s20, 16  ;;  %s1934_s7 = scalar_lea.vmem %s407_s20, 32 }
  0x4a   : > { %p1928_p9 = scmp.ne.s32.totalorder %s407_s20, %s1927_s9  ;;  %p1935_p2 = scmp.lt.s32.totalorder %s407_s20, %s407_s20 }
  0x4b   : > { %p1936_p4 = scmp.lt.s32.totalorder %s1934_s7, %s1927_s9 }
  0x4c   : > { %p1930_p11 = pnand %p1928_p9, %p2256_p1 }
  0x4d   : > { %p1937_p5 = por %p1936_p4, %p1935_p2 }
  0x4e   : > { %p1931_p13 = pneg %p1930_p11 }
  0x50   : > { %p1938_p8 = pnand %p1937_p5, %p1931_p13 }
  0x52   : > { %1941 = shalt.err (!%p1938_p8)
}
  0x53   : > { %1647 = dma.hbm_to_vmem [thread:$0]  (!%p2250_p0), %s2571_s8, 16, %s407_s20, [#allocation13]  }
  0x54   : > { %s1953_s17 = scalar_lea.vmem %s431_s24, 16  ;;  %s1960_s27 = scalar_lea.vmem %s431_s24, 32 }
  0x55   : > { %p1954_p6 = scmp.ne.s32.totalorder %s431_s24, %s1953_s17  ;;  %p1961_p10 = scmp.lt.s32.totalorder %s431_s24, %s431_s24 }
  0x56   : > { %p1962_p7 = scmp.lt.s32.totalorder %s1960_s27, %s1953_s17 }
  0x57   : > { %p1956_p3 = pnand %p1954_p6, %p2256_p1 }
  0x58   : > { %p1963_p9 = por %p1962_p7, %p1961_p10 }
  0x59   : > { %p1957_p12 = pneg %p1956_p3 }
  0x5b   : > { %p1964_p11 = pnand %p1963_p9, %p1957_p12 }
  0x5d   : > { %1967 = shalt.err (!%p1964_p11)
}
  0x5e   : > { %1653 = dma.hbm_to_vmem [thread:$0]  (!%p2250_p0), %s2573_s10, 16, %s431_s24, [#allocation16]  }
  0x5f   : > { %p2608_p13 = scmp.ne.s32.totalorder %s2601_s18, 0 }
  0x60   : > { %p2609_p2 = scmp.ne.s32.totalorder (!%p2608_p13), %s2602_s30, 0 }
  0x61   : > { %460 = sbr.rel (%p2608_p13) target bundleno = 1845 (0x735), region = 72 }
  0x66   : > { %2027 = dma.done.wait (%p2609_p2), [#allocation10], 256  }
  0x67   : > { %2029 = vsyncadd (%p2609_p2), [#allocation10], 4294967040 }
  0x68   : > { %2031 = dma.done.wait (%p2609_p2), [#allocation13], 32  }
  0x69   : > { %2033 = vsyncadd (%p2609_p2), [#allocation13], 4294967264 }
  0x6a   : > { %2035 = dma.done.wait (%p2609_p2), [#allocation16], 272  }
  0x6b   : > { %2037 = vsyncadd (%p2609_p2), [#allocation16], 4294967024  ;;  %s520_s18 = sand.u32 1, %s2048_s26   ;;  %p523_p0 = scmp.lt.s32.totalorder %s2060_s29, 1 }
  0x6c   : > { %s2313_s23 = sshll.u32 %s520_s18, 3  ;;  %p525_p1 = scmp.lt.s32.totalorder %s2056_s28, 1 }
  0x6d   : > { %s524_s16 = scalar_select %p523_p0, %s2060_s29, 1 }
  0x6e   : > { %s526_s14 = scalar_select %p525_p1, %s2056_s28, 1 }
  0x6f   : > { %s1550_s20 = sshll.u32 %s524_s16, 1  ;;  %s522_s21 = scalar_lea.vmem [#allocation18], %s2313_s23 }
  0x70   : > { %s528_s19 = sadd.s32 %s1550_s20, %s526_s14  ;;  %p1552_p4 = scmp.ne.s32.totalorder %s2056_s28, 0 }
  0x71   : > { %s1551_s24 = sshll.u32 %s528_s19, 3 }
  0x72   : > { %s530_s25 = scalar_lea.vmem %s2563_s0, %s1551_s24  ;;  %535 = sbr.rel (%p1552_p4) target bundleno = 121 (0x79), region = 96 }
  0x77   : > { %vm536_vm0 = vcmask 261120   ;;  %v2083_v0 = vmov 0.0  }
  0x78   : > { %537 = vst.msk [vmem:[#allocation2] sm:$0xff] %vm536_vm0, %v2083_v0  ;;  %538 = vst.msk [vmem:[#allocation2 + $0x8] sm:$0xff] %vm536_vm0, %v2083_v0 }
  0x79 PF: > { %v539_v1 = vld [vmem:[%s530_s25] sm:$0xff]  ;;  %vm540_vm1 = vcmask 261120   ;;  %v1787_v8 = vld [vmem:[%s2566_s3 + $0x8] sm:$0xff]   ;;  %v2084_v9 = vmov 0.0   ;;  %vm2085_vm2 = vmmov 0   ;;  %v2086_v25 = vmov 0  }
  0x7a   : > { %v541_v2 = vsel %vm540_vm1, %v539_v1, 0.0  ;;  %1588 = vmatprep.subr.bf16.mxu1 %v2084_v9  ;;  %1604 = vmatprep.subr.bf16.mxu0 %v2084_v9  ;;  %v1788_v10 = vld [vmem:[%s2566_s3] sm:$0xff]   ;;  %s2087_s17 = smov 96   ;;  %v2088_v39 = vmov 1966171168   ;;  %v676_v41 = vlaneseq  ;;  %v665_v58 = vld [vmem:[#allocation9] sm:$0xff] }
  0x7b   : > { %542 = vadd.xlane.f32.xlu0 %v541_v2  ;;  %1589 = vmatpush3.bf16.msra.mxu1 %v1787_v8  ;;  %v1553_v15 = vld [vmem:[%s2564_s1] ss:$0 sm:$0xff]  ;;  %v674_v40 = vunpack.c.l.s4 %v2088_v39  ;;  %vm1181_vm3 = vcmask 1040384   ;;  %vm1183_vm4 = vcmask 1041408   ;;  %vm1185_vm5 = vcmask 1042432   ;;  %s1573_s30 = sshll.u32 %s2060_s29, 1 }
  0x7c   : > { %1592 = vmatprep.mubr.msk.bf16.mxu1 %vm2085_vm2, %v2084_v9  ;;  %1590 = vmatprep.subr.bf16.mxu1 %v2084_v9  ;;  %v1554_v17 = vld [vmem:[%s2565_s2] ss:$0 sm:$0xff]  ;;  %v2357_v45 = vshrl.u32 %v676_v41, 7  ;;  %vm1187_vm6 = vcmask 1043456   ;;  %vm1189_vm7 = vcmask 1044480   ;;  %vm1191_vm8 = vcmask 1045504   ;;  %s1402_s7 = sadd.s32 %s2056_s28, %s1573_s30 }
  0x7d   : > { %1612 = vmatprep.mubr.msk.bf16.mxu0 %vm2085_vm2, %v2084_v9  ;;  %v1559_v19 = vld [vmem:[%s2569_s6] ss:$0 sm:$0xff]  ;;  %1755 = vset.pattern.permute.xlu0 %v2086_v25  ;;  %v675_v44 = vunpack.c.0.s8 %v674_v40  ;;  %vm1193_vm9 = vcmask 1046528   ;;  %vm1343_vm10 = vcmask 523264   ;;  %s1574_s27 = sshll.u32 %s1402_s7, 7  ;;  %s1406_s9 = sshll.u32 %s522_s21, 4  ;;  %s2508_s9 = int_to_ptr.vmem [resolvable:$true] %s1406_s9 }
  0x7e   : > { %v1555_v24 = vld [vmem:[%s2567_s4] ss:$0 sm:$0xff]  ;;  %v2362_v53 = vsub.s32 0, %v2357_v45  ;;  %s2610_s14 = sld [smem:[#allocation33_spill]]  ;;  %s1391_s28 = scalar_lea.sflag [#allocation11], %s520_s18 }
  0x7f   : > { %1591 = vmatpush3.bf16.msra.mxu1 %v1788_v10  ;;  %v678_v46 = vsub.s32 %v675_v44, %v2357_v45  ;;  %v666_v59 = vld [vmem:[#allocation9 + $0x8] sm:$0xff]  ;;  %s1968_s29 = scalar_lea.vmem %s2508_s9, 128  ;;  %p2612_p8 = scmp.ne.s32.totalorder %s2597_s22, 0 }
  0x80   : > { %1596 = vmatprep.subr.bf16.mxu1 %v2084_v9  ;;  %p1969_p5 = scmp.ne.s32.totalorder %s2508_s9, %s1968_s29  ;;  %s2096_s24 = smov [#allocation18]  }
  0x81   : > { %s1972_s30 = sshll.u32 %s2096_s24, 4  ;;  %s1973_s30 = int_to_ptr.vmem [resolvable:$false] %s1972_s30 }
  0x82   : > { %p1970_p6 = pnand %p1969_p5, %p2612_p8  ;;  %s1974_s7 = scalar_lea.vmem %s1973_s30, 256 }
  0x83   : > { %p1975_p12 = scmp.lt.s32.totalorder %s2508_s9, %s1973_s30  ;;  %p1976_p10 = scmp.lt.s32.totalorder %s1974_s7, %s1968_s29 }
  0x84   : > { %s2611_s20 = smov %s2610_s14  ;;  %s2506_s19 = scalar_lea.hbm %s2610_s14, %s1574_s27 }
  0x85   : > { %p1971_p3 = pneg %p1970_p6  ;;  %p1977_p7 = por %p1976_p10, %p1975_p12 }
  0x87   : > { %p1978_p9 = pnand %p1977_p7, %p1971_p3 }
 0x104   : > { %v543_v3 = vpop.xlane.xlu0 %542 }
 0x105   : > { %v545_v4 = vmul.f32 0.03125, %v543_v3 }
 0x107   : > { %v546_v5 = vsub.f32 %v539_v1, %v545_v4 }
 0x109   : > { %v547_v6 = vmul.f32 %v546_v5, %v546_v5 }
 0x10b   : > { %v548_v7 = vsel %vm540_vm1, %v547_v6, 0.0 }
 0x10c   : > { %549 = vadd.xlane.f32.xlu0 %v548_v7 }
 0x195   : > { %v550_v11 = vpop.xlane.xlu0 %549 }
 0x196   : > { %v551_v12 = vmul.f32 0.03125, %v550_v11 }
 0x198   : > { %v552_v13 = vadd.f32 1e-05, %v551_v12 }
 0x19a   : > { %1796 = vrsqrt.f32 %v552_v13 }
 0x1a7   : > { %v1797_v14 = vpop.eup %1796 }
 0x1a8   : > { %v554_v16 = vmul.f32 %v1797_v14, %v546_v5 }
 0x1aa   : > { %v562_v18 = vmul.f32 %v1553_v15, %v554_v16 }
 0x1ac   : > { %v570_v20 = vadd.f32 %v1554_v17, %v562_v18 }
 0x1ae   : > { %v571_v21 = vpack.c.bf16 %v570_v20, %v570_v20  ;;  %v662_v22 = vmul.f32 %v1559_v19, %v570_v20 }
 0x1b0   : > { %1593 = vmatmul.mubr.msk.bf16.vlgmr.msra.gmra.mxu1 %vm540_vm1, %v571_v21  ;;  %v663_v23 = vadd.f32 %v662_v22, %v539_v1 }
 0x1b1   : > { %1600 = vmatprep.mubr.msk.bf16.mxu1 %vm2085_vm2, %v2084_v9 }
 0x1b2   : > { %664 = vst.msk [vmem:[#allocation6] sm:$0xff] %vm540_vm1, %v663_v23 }
 0x270   : > { %v632_v26 = vpop.f32.mrf.mxu1 }
 0x271   : > { %v633_v27 = vadd.f32 %v1555_v24, %v632_v26 }
 0x272   : > { %v1594_v28 = vpop.f32.mrf.mxu1 }
 0x273   : > { %v639_v29 = vand.u32 2147483647, %v633_v27  ;;  %651 = vrot.lane.b32.xlu1 %v633_v27, %s2087_s17  ;;  %v638_v37 = vmax.f32 %v633_v27, 0.0 }
 0x274   : > { %v635_v30 = vpop.f32.mrf.mxu1 }
 0x275   : > { %v640_v31 = vsub.f32 0.0, %v639_v29 }
 0x276   : > { %v1595_v32 = vpop.f32.mrf.mxu1 }
 0x277   : > { %v641_v33 = vmul.f32 1.442695, %v640_v31 }
 0x279   : > { %1798 = vpow2.f32 %v641_v33 }
 0x286   : > { %v1799_v34 = vpop.eup %1798 }
 0x287   : > { %v643_v35 = vadd.f32 1.0, %v1799_v34 }
 0x289   : > { %1800 = vlog2.f32 %v643_v35 }
 0x296   : > { %v1801_v36 = vpop.eup %1800 }
 0x297   : > { %v645_v38 = vmul.f32 0.6931472, %v1801_v36 }
 0x299   : > { %v646_v42 = vadd.f32 %v645_v38, %v638_v37 }
 0x29b   : > { %647 = vst.msk [vmem:[#allocation3] sm:$0xff] %vm540_vm1, %v646_v42  ;;  %v648_v43 = vmul.f32 %v646_v42, %v570_v20 }
 0x29d   : > { %649 = vst.msk [vmem:[#allocation4] sm:$0xff] %vm540_vm1, %v648_v43 }
 0x2a2   : > { %v669_v47 = vld [vmem:[#allocation3] sm:$0xff] }
 0x2a3   : > { %v672_v48 = vcombine.high %v669_v47, %v669_v47  ;;  %v679_v49 = vrot.slane %v669_v47, %v678_v46 }
 0x2a5   : > { %v686_v50 = vrot.slane %v672_v48, %v678_v46  ;;  %v687_v51 = vcombine.high %v679_v49, %v679_v49  ;;  %v695_v52 = vrot.slane %v679_v49, %v678_v46 }
 0x2a7   : > { %v688_v54 = vcombine.high %v686_v50, %v686_v50  ;;  %v702_v55 = vrot.slane %v686_v50, %v678_v46  ;;  %v709_v56 = vrot.slane %v687_v51, %v678_v46  ;;  %v717_v57 = vcombine.high %v695_v52, %v695_v52 }
 0x2a8   : > { %v724_v60 = vrot.slane %v695_v52, %v2362_v53 }
 0x2a9   : > { %v719_v61 = vcombine.high %v709_v56, %v709_v56  ;;  %v728_v62 = vrot.slane %v709_v56, %v2362_v53  ;;  %v716_v63 = vrot.slane %v688_v54, %v678_v46  ;;  %v732_v0 = vrot.slane %v717_v57, %v2362_v53 }
 0x2aa   : > { %v740_v1 = vrot.slane %v702_v55, %v2362_v53  ;;  %v761_v2 = vmul.f32 %v724_v60, %v665_v58  ;;  %v762_v3 = vmul.f32 %v724_v60, %v666_v59  ;;  %v718_v4 = vcombine.high %v702_v55, %v702_v55 }
 0x2ab   : > { %v763_v5 = vmul.f32 %v728_v62, %v665_v58  ;;  %v764_v6 = vmul.f32 %v728_v62, %v666_v59  ;;  %v736_v7 = vrot.slane %v719_v61, %v2362_v53  ;;  %v765_v8 = vmul.f32 %v732_v0, %v665_v58 }
 0x2ac   : > { %v720_v10 = vcombine.high %v716_v63, %v716_v63  ;;  %v744_v11 = vrot.slane %v716_v63, %v2362_v53  ;;  %v766_v12 = vmul.f32 %v732_v0, %v666_v59  ;;  %v769_v13 = vmul.f32 %v740_v1, %v665_v58 }
 0x2ad   : > { %v777_v14 = vmul.f32 1.442695, %v761_v2  ;;  %v779_v15 = vmul.f32 1.442695, %v762_v3  ;;  %v781_v16 = vmul.f32 1.442695, %v763_v5  ;;  %v748_v17 = vrot.slane %v718_v4, %v2362_v53 }
 0x2ae   : > { %v770_v18 = vmul.f32 %v740_v1, %v666_v59  ;;  %v783_v19 = vmul.f32 1.442695, %v764_v6  ;;  %v768_v20 = vmul.f32 %v736_v7, %v666_v59  ;;  %v785_v21 = vmul.f32 1.442695, %v765_v8 }
 0x2af   : > { %1802 = vpow2.f32 %v777_v14  ;;  %v752_v22 = vrot.slane %v720_v10, %v2362_v53  ;;  %v767_v23 = vmul.f32 %v736_v7, %v665_v58  ;;  %v787_v24 = vmul.f32 1.442695, %v766_v12  ;;  %v667_v10 = vld [vmem:[#allocation2] sm:$0xff] }
 0x2b0   : > { %1804 = vpow2.f32 %v779_v15  ;;  %v771_v26 = vmul.f32 %v744_v11, %v665_v58  ;;  %v793_v27 = vmul.f32 1.442695, %v769_v13  ;;  %v773_v28 = vmul.f32 %v748_v17, %v665_v58 }
 0x2b1   : > { %1806 = vpow2.f32 %v781_v16  ;;  %v795_v29 = vmul.f32 1.442695, %v770_v18  ;;  %v772_v30 = vmul.f32 %v744_v11, %v666_v59  ;;  %v791_v31 = vmul.f32 1.442695, %v768_v20 }
 0x2b2   : > { %1808 = vpow2.f32 %v783_v19  ;;  %v789_v32 = vmul.f32 1.442695, %v767_v23  ;;  %v775_v33 = vmul.f32 %v752_v22, %v665_v58  ;;  %v774_v34 = vmul.f32 %v748_v17, %v666_v59 }
 0x2b3   : > { %1810 = vpow2.f32 %v785_v21  ;;  %v797_v35 = vmul.f32 1.442695, %v771_v26  ;;  %v801_v36 = vmul.f32 1.442695, %v773_v28  ;;  %v776_v37 = vmul.f32 %v752_v22, %v666_v59 }
 0x2b4   : > { %1812 = vpow2.f32 %v787_v24  ;;  %v799_v38 = vmul.f32 1.442695, %v772_v30  ;;  %v805_v39 = vmul.f32 1.442695, %v775_v33  ;;  %v803_v40 = vmul.f32 1.442695, %v774_v34 }
 0x2b5   : > { %1814 = vpow2.f32 %v793_v27  ;;  %v807_v41 = vmul.f32 1.442695, %v776_v37  ;;  %v2089_v62 = vmov 4   ;;  %v2090_v0 = vmov 5  }
 0x2b6   : > { %1816 = vpow2.f32 %v795_v29  ;;  %v2091_v1 = vmov 1   ;;  %v2092_v2 = vmov 7   ;;  %v2093_v3 = vmov 2  }
 0x2b7   : > { %1818 = vpow2.f32 %v791_v31  ;;  %v2094_v5 = vmov 3   ;;  %v2095_v6 = vmov 6   ;;  %v916_v15 = vsub.s32 1, %v2357_v45 }
 0x2b8   : > { %1820 = vpow2.f32 %v789_v32  ;;  %v956_v23 = vsub.s32 2, %v2357_v45  ;;  %v996_v31 = vsub.s32 3, %v2357_v45 }
 0x2b9   : > { %1822 = vpow2.f32 %v797_v35  ;;  %v1036_v35 = vsub.s32 4, %v2357_v45 }
 0x2ba   : > { %1824 = vpow2.f32 %v801_v36 }
 0x2bb   : > { %1826 = vpow2.f32 %v799_v38 }
 0x2bc   : > { %v1803_v42 = vpop.eup %1802  ;;  %1828 = vpow2.f32 %v805_v39 }
 0x2bd   : > { %v1805_v43 = vpop.eup %1804  ;;  %809 = vst.msk [vmem:[#allocation8] sm:$0xff] %vm540_vm1, %v1803_v42  ;;  %1830 = vpow2.f32 %v803_v40  ;;  %v668_v42 = vld [vmem:[#allocation2 + $0x8] sm:$0xff] }
 0x2be   : > { %v1807_v44 = vpop.eup %1806  ;;  %810 = vst.msk [vmem:[#allocation8 + $0x8] sm:$0xff] %vm540_vm1, %v1805_v43  ;;  %1832 = vpow2.f32 %v807_v41 }
 0x2bf   : > { %v1809_v46 = vpop.eup %1808  ;;  %811 = vst.msk [vmem:[#allocation8 + $0x10] sm:$0xff] %vm540_vm1, %v1807_v44 }
 0x2c0   : > { %v1811_v47 = vpop.eup %1810  ;;  %812 = vst.msk [vmem:[#allocation8 + $0x18] sm:$0xff] %vm540_vm1, %v1809_v46  ;;  %v1076_v46 = vsub.s32 5, %v2357_v45 }
 0x2c1   : > { %v1813_v48 = vpop.eup %1812  ;;  %813 = vst.msk [vmem:[#allocation8 + $0x20] sm:$0xff] %vm540_vm1, %v1811_v47 }
 0x2c2   : > { %v1815_v49 = vpop.eup %1814  ;;  %814 = vst.msk [vmem:[#allocation8 + $0x28] sm:$0xff] %vm540_vm1, %v1813_v48 }
 0x2c3   : > { %v1817_v50 = vpop.eup %1816  ;;  %817 = vst.msk [vmem:[#allocation8 + $0x40] sm:$0xff] %vm540_vm1, %v1815_v49 }
 0x2c4   : > { %v1819_v51 = vpop.eup %1818  ;;  %818 = vst.msk [vmem:[#allocation8 + $0x48] sm:$0xff] %vm540_vm1, %v1817_v50  ;;  %v858_v11 = vld [vmem:[#allocation8] sm:$0xff] }
 0x2c5   : > { %v1821_v52 = vpop.eup %1820  ;;  %816 = vst.msk [vmem:[#allocation8 + $0x38] sm:$0xff] %vm540_vm1, %v1819_v51  ;;  %v860_v17 = vmul.f32 %v858_v11, %v667_v10  ;;  %v859_v43 = vld [vmem:[#allocation8 + $0x8] sm:$0xff] }
 0x2c6   : > { %v1823_v54 = vpop.eup %1822  ;;  %815 = vst.msk [vmem:[#allocation8 + $0x30] sm:$0xff] %vm540_vm1, %v1821_v52  ;;  %v902_v20 = vld [vmem:[#allocation8 + $0x10] sm:$0xff]  ;;  %v861_v51 = vmul.f32 %v859_v43, %v668_v42 }
 0x2c7   : > { %v1825_v55 = vpop.eup %1824  ;;  %819 = vst.msk [vmem:[#allocation8 + $0x50] sm:$0xff] %vm540_vm1, %v1823_v54 }
 0x2c8   : > { %v1827_v56 = vpop.eup %1826  ;;  %821 = vst.msk [vmem:[#allocation8 + $0x60] sm:$0xff] %vm540_vm1, %v1825_v55  ;;  %v942_v28 = vld [vmem:[#allocation8 + $0x20] sm:$0xff] }
 0x2c9   : > { %v1829_v57 = vpop.eup %1828  ;;  %820 = vst.msk [vmem:[#allocation8 + $0x58] sm:$0xff] %vm540_vm1, %v1827_v56 }
 0x2ca   : > { %v1831_v58 = vpop.eup %1830  ;;  %823 = vst.msk [vmem:[#allocation8 + $0x70] sm:$0xff] %vm540_vm1, %v1829_v57  ;;  %v1022_v49 = vld [vmem:[#allocation8 + $0x40] sm:$0xff] }
 0x2cb   : > { %v1833_v59 = vpop.eup %1832  ;;  %822 = vst.msk [vmem:[#allocation8 + $0x68] sm:$0xff] %vm540_vm1, %v1831_v58  ;;  %v1116_v58 = vsub.s32 6, %v2357_v45 }
 0x2cc   : > { %824 = vst.msk [vmem:[#allocation8 + $0x78] sm:$0xff] %vm540_vm1, %v1833_v59 }
 0x2cd   : > { %v982_v37 = vld [vmem:[#allocation8 + $0x30] sm:$0xff] }
 0x2e5   : > { %v652_v60 = vpop.permute.xlu1 %651 }
 0x2e6   : > { %654 = vst.msk [vmem:[#allocation5] sm:$0xff] %vm540_vm1, %v652_v60  ;;  %v1062_v60 = vld [vmem:[#allocation8 + $0x50] sm:$0xff] }
 0x2ed   : > { %v825_v61 = vld [vmem:[#allocation5] sm:$0xff] }
 0x2ee   : > { %826 = vxpose.xlu1.b32.start.end [1/1] (short) (narrow) %v825_v61, 32 }
 0x30c   : > { %1759 = vset.pattern.permute.xlu1 %v2089_v62 }
 0x36a   : > { %v842_v63 = vpop.trf.xlu1 }
 0x36b   : > { %1027 = vperm.xlu1 %1759, %v842_v63   ;;  %864 = vperm.xlu0 %1755, %v842_v63  }
 0x36e   : > { %v843_v4 = vpop.trf.xlu1 }
 0x36f   : > { %1760 = vset.pattern.permute.xlu1 %v2090_v0  ;;  %1756 = vset.pattern.permute.xlu0 %v2091_v1 }
 0x370   : > { %1067 = vperm.xlu1 %1760, %v842_v63   ;;  %907 = vperm.xlu0 %1756, %v842_v63  }
 0x372   : > { %v844_v7 = vpop.trf.xlu1 }
 0x374   : > { %1762 = vset.pattern.permute.xlu1 %v2092_v2  ;;  %1757 = vset.pattern.permute.xlu0 %v2093_v3 }
 0x375   : > { %1147 = vperm.xlu1 %1762, %v842_v63   ;;  %947 = vperm.xlu0 %1757, %v842_v63  }
 0x376   : > { %v845_v8 = vpop.trf.xlu1 }
 0x379   : > { %1763 = vset.pattern.permute.xlu1 %v2086_v25  ;;  %1758 = vset.pattern.permute.xlu0 %v2094_v5 }
 0x37a   : > { %987 = vperm.xlu0 %1758, %v842_v63   ;;  %869 = vperm.xlu1 %1763, %v843_v4  }
 0x37e   : > { %1761 = vset.pattern.permute.xlu0 %v2095_v6  ;;  %1768 = vset.pattern.permute.xlu1 %v2090_v0 }
 0x37f   : > { %1107 = vperm.xlu0 %1761, %v842_v63   ;;  %1071 = vperm.xlu1 %1768, %v843_v4   ;;  %v1156_v63 = vsub.s32 7, %v2357_v45 }
 0x383   : > { %1764 = vset.pattern.permute.xlu0 %v2091_v1  ;;  %1769 = vset.pattern.permute.xlu1 %v2095_v6 }
 0x384   : > { %911 = vperm.xlu0 %1764, %v843_v4   ;;  %1111 = vperm.xlu1 %1769, %v843_v4  }
 0x388   : > { %1765 = vset.pattern.permute.xlu0 %v2093_v3  ;;  %1770 = vset.pattern.permute.xlu1 %v2092_v2 }
 0x389   : > { %951 = vperm.xlu0 %1765, %v843_v4   ;;  %1151 = vperm.xlu1 %1770, %v843_v4  }
 0x38d   : > { %1766 = vset.pattern.permute.xlu0 %v2094_v5  ;;  %1771 = vset.pattern.permute.xlu1 %v2086_v25 }
 0x38e   : > { %991 = vperm.xlu0 %1766, %v843_v4   ;;  %882 = vperm.xlu1 %1771, %v844_v7  }
 0x392   : > { %1767 = vset.pattern.permute.xlu0 %v2089_v62  ;;  %1772 = vset.pattern.permute.xlu1 %v2091_v1 }
 0x393   : > { %1031 = vperm.xlu0 %1767, %v843_v4   ;;  %923 = vperm.xlu1 %1772, %v844_v7  }
 0x397   : > { %1773 = vset.pattern.permute.xlu0 %v2093_v3  ;;  %1774 = vset.pattern.permute.xlu1 %v2094_v5 }
 0x398   : > { %963 = vperm.xlu0 %1773, %v844_v7   ;;  %1003 = vperm.xlu1 %1774, %v844_v7  }
 0x39c   : > { %1775 = vset.pattern.permute.xlu0 %v2089_v62  ;;  %1776 = vset.pattern.permute.xlu1 %v2090_v0 }
 0x39d   : > { %1043 = vperm.xlu0 %1775, %v844_v7   ;;  %1083 = vperm.xlu1 %1776, %v844_v7  }
 0x3a1   : > { %1778 = vset.pattern.permute.xlu0 %v2086_v25  ;;  %1777 = vset.pattern.permute.xlu1 %v2095_v6  ;;  %v2396_v25 = vld [vmem:[#allocation4] sm:$0xff] }
 0x3a2   : > { %1123 = vperm.xlu1 %1777, %v844_v7   ;;  %887 = vperm.xlu0 %1778, %v845_v8   ;;  %v875_v12 = vrot.slane %v2396_v25, %v2362_v53  ;;  %v917_v19 = vrot.slane %v2396_v25, %v916_v15  ;;  %v957_v53 = vrot.slane %v2396_v25, %v956_v23  ;;  %v983_v23 = vld [vmem:[#allocation8 + $0x38] sm:$0xff] }
 0x3a3   : > { %v997_v36 = vrot.slane %v2396_v25, %v996_v31  ;;  %v1037_v44 = vrot.slane %v2396_v25, %v1036_v35  ;;  %v1077_v56 = vrot.slane %v2396_v25, %v1076_v46  ;;  %v1103_v46 = vld [vmem:[#allocation8 + $0x68] sm:$0xff] }
 0x3a6   : > { %1779 = vset.pattern.permute.xlu1 %v2091_v1  ;;  %1781 = vset.pattern.permute.xlu0 %v2094_v5  ;;  %v903_v1 = vld [vmem:[#allocation8 + $0x18] sm:$0xff] }
 0x3a7   : > { %927 = vperm.xlu1 %1779, %v845_v8   ;;  %1007 = vperm.xlu0 %1781, %v845_v8  }
 0x3ab   : > { %1780 = vset.pattern.permute.xlu1 %v2093_v3  ;;  %1783 = vset.pattern.permute.xlu0 %v2090_v0  ;;  %v1117_v3 = vrot.slane %v2396_v25, %v1116_v58 }
 0x3ac   : > { %967 = vperm.xlu1 %1780, %v845_v8   ;;  %1087 = vperm.xlu0 %1783, %v845_v8  }
 0x3b0   : > { %1782 = vset.pattern.permute.xlu1 %v2089_v62  ;;  %1784 = vset.pattern.permute.xlu0 %v2092_v2 }
 0x3b1   : > { %1047 = vperm.xlu1 %1782, %v845_v8   ;;  %1163 = vperm.xlu0 %1784, %v844_v7   ;;  %v1102_v7 = vld [vmem:[#allocation8 + $0x60] sm:$0xff] }
 0x3b5   : > { %1785 = vset.pattern.permute.xlu1 %v2095_v6 }
 0x3b6   : > { %1127 = vperm.xlu1 %1785, %v845_v8  }
 0x3ba   : > { %1786 = vset.pattern.permute.xlu1 %v2092_v2 }
 0x3bb   : > { %1167 = vperm.xlu1 %1786, %v845_v8  }
 0x3e6   : > { %v865_v13 = vpop.permute.xlu0 %864  ;;  %v1028_v14 = vpop.permute.xlu1 %1027 }
 0x3e7   : > { %v876_v16 = vmul.f32 %v875_v12, %v865_v13  ;;  %v1038_v50 = vmul.f32 %v1037_v44, %v1028_v14  ;;  %v1157_v13 = vrot.slane %v2396_v25, %v1156_v63 }
 0x3e9   : > { %v2401_v18 = vadd.f32 %v876_v16, %v860_v17 }
 0x3eb   : > { %v908_v21 = vpop.permute.xlu0 %907  ;;  %v1068_v22 = vpop.permute.xlu1 %1067  ;;  %v904_v24 = vmul.f32 %v902_v20, %v2401_v18  ;;  %v1142_v20 = vld [vmem:[#allocation8 + $0x70] sm:$0xff] }
 0x3ec   : > { %v918_v26 = vmul.f32 %v917_v19, %v908_v21  ;;  %v1078_v61 = vmul.f32 %v1077_v56, %v1068_v22 }
 0x3ee   : > { %v2406_v27 = vadd.f32 %v918_v26, %v904_v24 }
 0x3f0   : > { %v948_v29 = vpop.permute.xlu0 %947  ;;  %v1148_v30 = vpop.permute.xlu1 %1147  ;;  %v944_v32 = vmul.f32 %v942_v28, %v2406_v27 }
 0x3f1   : > { %v958_v33 = vmul.f32 %v957_v53, %v948_v29  ;;  %v1158_v21 = vmul.f32 %v1157_v13, %v1148_v30 }
 0x3f3   : > { %v2411_v34 = vadd.f32 %v958_v33, %v944_v32  ;;  %v1023_v32 = vld [vmem:[#allocation8 + $0x48] sm:$0xff] }
 0x3f5   : > { %v988_v38 = vpop.permute.xlu0 %987  ;;  %v870_v39 = vpop.permute.xlu1 %869  ;;  %v984_v40 = vmul.f32 %v982_v37, %v2411_v34 }
 0x3f6   : > { %v998_v41 = vmul.f32 %v997_v36, %v988_v38  ;;  %v877_v47 = vmul.f32 %v875_v12, %v870_v39  ;;  %v943_v12 = vld [vmem:[#allocation8 + $0x28] sm:$0xff]  ;;  %v1063_v38 = vld [vmem:[#allocation8 + $0x58] sm:$0xff] }
 0x3f8   : > { %v2418_v48 = vadd.f32 %v998_v41, %v984_v40  ;;  %v879_v57 = vadd.f32 %v877_v47, %v861_v51 }
 0x3fa   : > { %v1108_v52 = vpop.permute.xlu0 %1107  ;;  %v1072_v54 = vpop.permute.xlu1 %1071  ;;  %v1024_v55 = vmul.f32 %v1022_v49, %v2418_v48  ;;  %v905_v4 = vmul.f32 %v903_v1, %v879_v57 }
 0x3fb   : > { %v1118_v8 = vmul.f32 %v1117_v3, %v1108_v52  ;;  %v1079_v39 = vmul.f32 %v1077_v56, %v1072_v54  ;;  %v1143_v52 = vld [vmem:[#allocation8 + $0x78] sm:$0xff] }
 0x3fc   : > { %v2423_v59 = vadd.f32 %v1038_v50, %v1024_v55 }
 0x3fe   : > { %v1064_v62 = vmul.f32 %v1062_v60, %v2423_v59 }
 0x3ff   : > { %v912_v0 = vpop.permute.xlu0 %911  ;;  %v1112_v2 = vpop.permute.xlu1 %1111 }
 0x400   : > { %v919_v5 = vmul.f32 %v917_v19, %v912_v0  ;;  %v2428_v6 = vadd.f32 %v1078_v61, %v1064_v62 }
 0x402   : > { %v921_v10 = vadd.f32 %v919_v5, %v905_v4  ;;  %v1104_v11 = vmul.f32 %v1102_v7, %v2428_v6 }
 0x404   : > { %v952_v14 = vpop.permute.xlu0 %951  ;;  %v945_v15 = vmul.f32 %v943_v12, %v921_v10  ;;  %v1152_v45 = vpop.permute.xlu1 %1151  ;;  %v2432_v16 = vadd.f32 %v1118_v8, %v1104_v11 }
 0x405   : > { %v959_v17 = vmul.f32 %v957_v53, %v952_v14  ;;  %v1159_v55 = vmul.f32 %v1157_v13, %v1152_v45 }
 0x406   : > { %v1144_v19 = vmul.f32 %v1142_v20, %v2432_v16 }
 0x407   : > { %v961_v22 = vadd.f32 %v959_v17, %v945_v15 }
 0x408   : > { %v2435_v24 = vadd.f32 %v1158_v21, %v1144_v19 }
 0x409   : > { %v992_v26 = vpop.permute.xlu0 %991  ;;  %v985_v28 = vmul.f32 %v983_v23, %v961_v22  ;;  %v883_v29 = vpop.permute.xlu1 %882 }
 0x40a   : > { %v999_v31 = vmul.f32 %v997_v36, %v992_v26  ;;  %1196 = vst.msk [vmem:[#allocation2] sm:$0xff] %vm540_vm1, %v2435_v24  ;;  %v1119_v36 = vmul.f32 %v1117_v3, %v1112_v2  ;;  %v890_v58 = vmul.f32 %v883_v29, %v2401_v18 }
 0x40c   : > { %v1001_v25 = vadd.f32 %v999_v31, %v985_v28  ;;  %v892_v62 = vsel %vm540_vm1, %v890_v58, 0.0 }
 0x40e   : > { %v1032_v33 = vpop.permute.xlu0 %1031  ;;  %v1025_v35 = vmul.f32 %v1023_v32, %v1001_v25  ;;  %v924_v53 = vpop.permute.xlu1 %923 }
 0x40f   : > { %v1039_v37 = vmul.f32 %v1037_v44, %v1032_v33  ;;  %v930_v63 = vmul.f32 %v924_v53, %v2406_v27 }
 0x411   : > { %v2439_v30 = vadd.f32 %v1039_v37, %v1025_v35  ;;  %v932_v8 = vsel %vm540_vm1, %v930_v63, 0.0 }
 0x413   : > { %v964_v40 = vpop.permute.xlu0 %963  ;;  %v1004_v41 = vpop.permute.xlu1 %1003  ;;  %v1065_v42 = vmul.f32 %v1063_v38, %v2439_v30 }
 0x414   : > { %v1010_v0 = vmul.f32 %v1004_v41, %v2418_v48 }
 0x415   : > { %v1081_v43 = vadd.f32 %v1079_v39, %v1065_v42 }
 0x416   : > { %v1012_v11 = vsel %vm540_vm1, %v1010_v0, 0.0 }
 0x417   : > { %v1105_v47 = vmul.f32 %v1103_v46, %v1081_v43 }
 0x418   : > { %v1044_v49 = vpop.permute.xlu0 %1043  ;;  %v1084_v50 = vpop.permute.xlu1 %1083 }
 0x419   : > { %v2442_v51 = vadd.f32 %v1119_v36, %v1105_v47  ;;  %v1090_v12 = vmul.f32 %v1084_v50, %v2428_v6  ;;  %v1050_v32 = vmul.f32 %v1044_v49, %v2423_v59 }
 0x41b   : > { %v1145_v44 = vmul.f32 %v1143_v52, %v2442_v51  ;;  %v1092_v26 = vsel %vm540_vm1, %v1090_v12, 0.0 }
 0x41d   : > { %v888_v60 = vpop.permute.xlu0 %887  ;;  %v1124_v54 = vpop.permute.xlu1 %1123  ;;  %v2446_v56 = vadd.f32 %v1159_v55, %v1145_v44 }
 0x41e   : > { %v891_v61 = vmul.f32 %v888_v60, %v879_v57  ;;  %v970_v57 = vmul.f32 %v964_v40, %v2411_v34  ;;  %v1130_v47 = vmul.f32 %v1124_v54, %v2432_v16 }
 0x41f   : > { %1197 = vst.msk [vmem:[#allocation2 + $0x8] sm:$0xff] %vm540_vm1, %v2446_v56 }
 0x420   : > { %v893_v1 = vsel %vm540_vm1, %v891_v61, 0.0  ;;  %v972_v34 = vsel %vm540_vm1, %v970_v57, 0.0 }
 0x421   : > { %v894_v2 = vadd.f32 %v893_v1, %v892_v62  ;;  %v1132_v1 = vsel %vm540_vm1, %v1130_v47, 0.0  ;;  %v1790_v47 = vld [vmem:[#allocation15 + $0x8] sm:$0xff]  }
 0x422   : > { %v1008_v3 = vpop.permute.xlu0 %1007  ;;  %v928_v4 = vpop.permute.xlu1 %927  ;;  %1597 = vmatpush3.bf16.msra.mxu1 %v1790_v47 }
 0x423   : > { %v895_v18 = vrot.slane %v894_v2, 4  ;;  %v1011_v5 = vmul.f32 %v1008_v3, %v1001_v25  ;;  %v931_v7 = vmul.f32 %v928_v4, %v921_v10  ;;  %1598 = vmatprep.subr.bf16.mxu1 %v2084_v9 }
 0x425   : > { %v896_v13 = vadd.f32 %v895_v18, %v894_v2  ;;  %v1013_v27 = vsel %vm540_vm1, %v1011_v5, 0.0  ;;  %v933_v48 = vsel %vm540_vm1, %v931_v7, 0.0 }
 0x426   : > { %v1014_v14 = vadd.f32 %v1013_v27, %v1012_v11  ;;  %v934_v15 = vadd.f32 %v933_v48, %v932_v8 }
 0x427   : > { %v897_v45 = vrot.slane %v896_v13, 2  ;;  %v1088_v17 = vpop.permute.xlu0 %1087  ;;  %v968_v20 = vpop.permute.xlu1 %967 }
 0x428   : > { %v1015_v21 = vrot.slane %v1014_v14, 4  ;;  %v935_v10 = vrot.slane %v934_v15, 4  ;;  %v1091_v19 = vmul.f32 %v1088_v17, %v1081_v43  ;;  %v971_v23 = vmul.f32 %v968_v20, %v961_v22 }
 0x429   : > { %v898_v28 = vadd.f32 %v897_v45, %v896_v13  ;;  %v1052_v43 = vsel %vm540_vm1, %v1050_v32, 0.0 }
 0x42a   : > { %v1016_v6 = vadd.f32 %v1015_v21, %v1014_v14  ;;  %v936_v29 = vadd.f32 %v935_v10, %v934_v15  ;;  %v1093_v31 = vsel %vm540_vm1, %v1091_v19, 0.0  ;;  %v973_v25 = vsel %vm540_vm1, %v971_v23, 0.0 }
 0x42b   : > { %v1094_v33 = vadd.f32 %v1093_v31, %v1092_v26  ;;  %v974_v35 = vadd.f32 %v973_v25, %v972_v34  ;;  %v899_v40 = vrot.slane %v898_v28, 1 }
 0x42c   : > { %v1017_v53 = vrot.slane %v1016_v6, 2  ;;  %v937_v37 = vrot.slane %v936_v29, 2  ;;  %v1048_v38 = vpop.permute.xlu1 %1047  ;;  %v1164_v63 = vpop.permute.xlu0 %1163 }
 0x42d   : > { %v1095_v39 = vrot.slane %v1094_v33, 4  ;;  %v975_v22 = vrot.slane %v974_v35, 4  ;;  %v1051_v42 = vmul.f32 %v1048_v38, %v2439_v30  ;;  %v900_v58 = vadd.f32 %v899_v40, %v898_v28  ;;  %v1198_v38 = vld [vmem:[#allocation6] sm:$0xff] }
 0x42e   : > { %v938_v41 = vadd.f32 %v937_v37, %v936_v29  ;;  %v1018_v50 = vadd.f32 %v1017_v53, %v1016_v6  ;;  %v1170_v7 = vmul.f32 %v1164_v63, %v2435_v24  ;;  %v1792_v63 = vld [vmem:[%s2574_s11 + $0x18] sm:$0xff]  }
 0x42f   : > { %v1096_v46 = vadd.f32 %v1095_v39, %v1094_v33  ;;  %v976_v36 = vadd.f32 %v975_v22, %v974_v35  ;;  %v1053_v59 = vsel %vm540_vm1, %v1051_v42, 0.0  ;;  %1605 = vmatpush3.bf16.msra.mxu0 %v1792_v63 }
 0x430   : > { %v939_v52 = vrot.slane %v938_v41, 1  ;;  %v1054_v55 = vadd.f32 %v1053_v59, %v1052_v43  ;;  %v1019_v2 = vrot.slane %v1018_v50, 1  ;;  %v1172_v45 = vsel %vm540_vm1, %v1170_v7, 0.0  ;;  %1606 = vmatprep.subr.bf16.mxu0 %v2084_v9 }
 0x431   : > { %v977_v49 = vrot.slane %v976_v36, 2  ;;  %v1128_v44 = vpop.permute.xlu1 %1127  ;;  %v1097_v61 = vrot.slane %v1096_v46, 2 }
 0x432   : > { %v940_v60 = vadd.f32 %v939_v52, %v938_v41  ;;  %v1131_v62 = vmul.f32 %v1128_v44, %v2442_v51  ;;  %v1055_v0 = vrot.slane %v1054_v55, 4  ;;  %v1020_v12 = vadd.f32 %v1019_v2, %v1018_v50  ;;  %v1791_v50 = vld [vmem:[#allocation15] sm:$0xff]   ;;  %v1560_v44 = vld [vmem:[#allocation12] ss:$0 sm:$0xff]  ;;  %v1795_v2 = vld [vmem:[%s2574_s11] sm:$0xff]  }
 0x433   : > { %v978_v30 = vadd.f32 %v977_v49, %v976_v36  ;;  %v1098_v5 = vadd.f32 %v1097_v61, %v1096_v46  ;;  %1599 = vmatpush3.bf16.msra.mxu1 %v1791_v50 }
 0x434   : > { %v1182_v16 = vsel %vm1181_vm3, %v900_v58, %v940_v60  ;;  %v1133_v54 = vsel %vm540_vm1, %v1131_v62, 0.0  ;;  %v1056_v4 = vadd.f32 %v1055_v0, %v1054_v55  ;;  %v1561_v60 = vld [vmem:[#allocation14] ss:$0 sm:$0xff]  ;;  %v1793_v0 = vld [vmem:[%s2574_s11 + $0x10] sm:$0xff]  }
 0x435   : > { %v979_v3 = vrot.slane %v978_v30, 1  ;;  %v1134_v18 = vadd.f32 %v1133_v54, %v1132_v1  ;;  %v1099_v15 = vrot.slane %v1098_v5, 1  ;;  %1607 = vmatpush3.bf16.msra.mxu0 %v1793_v0  ;;  %v1794_v1 = vld [vmem:[%s2574_s11 + $0x8] sm:$0xff]  }
 0x436   : > { %v1168_v8 = vpop.permute.xlu1 %1167  ;;  %v1057_v51 = vrot.slane %v1056_v4, 2  ;;  %1608 = vmatprep.subr.bf16.mxu0 %v2084_v9 }
 0x437   : > { %v980_v57 = vadd.f32 %v979_v3, %v978_v30  ;;  %v1135_v11 = vrot.slane %v1134_v18, 4  ;;  %v1171_v13 = vmul.f32 %v1168_v8, %v2446_v56  ;;  %v1100_v26 = vadd.f32 %v1099_v15, %v1098_v5 }
 0x438   : > { %v1058_v48 = vadd.f32 %v1057_v51, %v1056_v4 }
 0x439   : > { %v1184_v27 = vsel %vm1183_vm4, %v1182_v16, %v980_v57  ;;  %v1136_v14 = vadd.f32 %v1135_v11, %v1134_v18  ;;  %v1173_v20 = vsel %vm540_vm1, %v1171_v13, 0.0  ;;  %1609 = vmatpush3.bf16.msra.mxu0 %v1794_v1  ;;  %v1563_v16 = vld [vmem:[#allocation17] ss:$0 sm:$0xff] }
 0x43a   : > { %v1186_v17 = vsel %vm1185_vm5, %v1184_v27, %v1020_v12  ;;  %v1059_v21 = vrot.slane %v1058_v48, 1  ;;  %v1174_v24 = vadd.f32 %v1173_v20, %v1172_v45  ;;  %1610 = vmatprep.subr.bf16.mxu0 %v2084_v9  ;;  %v1562_v9 = vld [vmem:[%s2575_s12] ss:$0 sm:$0xff] }
 0x43b   : > { %v1137_v10 = vrot.slane %v1136_v14, 2 }
 0x43c   : > { %v1060_v19 = vadd.f32 %v1059_v21, %v1058_v48  ;;  %v1175_v34 = vrot.slane %v1174_v24, 4 }
 0x43d   : > { %v1138_v23 = vadd.f32 %v1137_v10, %v1136_v14  ;;  %1611 = vmatpush3.bf16.msra.mxu0 %v1795_v2 }
 0x43e   : > { %v1188_v28 = vsel %vm1187_vm6, %v1186_v17, %v1060_v19  ;;  %v1176_v6 = vadd.f32 %v1175_v34, %v1174_v24 }
 0x43f   : > { %v1139_v56 = vrot.slane %v1138_v23, 1  ;;  %v1190_v29 = vsel %vm1189_vm7, %v1188_v28, %v1100_v26 }
 0x440   : > { %v1177_v25 = vrot.slane %v1176_v6, 2 }
 0x441   : > { %v1140_v31 = vadd.f32 %v1139_v56, %v1138_v23 }
 0x442   : > { %v1178_v33 = vadd.f32 %v1177_v25, %v1176_v6 }
 0x443   : > { %v1192_v32 = vsel %vm1191_vm8, %v1190_v29, %v1140_v31 }
 0x444   : > { %v1179_v35 = vrot.slane %v1178_v33, 1 }
 0x446   : > { %v1180_v53 = vadd.f32 %v1179_v35, %v1178_v33 }
 0x448   : > { %v1194_v37 = vsel %vm1193_vm9, %v1192_v32, %v1180_v53 }
 0x449   : > { %1195 = vst.msk [vmem:[#allocation7] sm:$0xff] %vm540_vm1, %v1194_v37 }
 0x450   : > { %v1199_v39 = vld [vmem:[#allocation7] sm:$0xff] }
 0x451   : > { %v1200_v22 = vadd.f32 %v1199_v39, %v1198_v38 }
 0x453   : > { %v1201_v40 = vsel %vm540_vm1, %v1200_v22, 0.0 }
 0x454   : > { %1202 = vadd.xlane.f32.xlu1 %v1201_v40 }
 0x4dd   : > { %v1203_v41 = vpop.xlane.xlu1 %1202 }
 0x4de   : > { %v1204_v42 = vmul.f32 0.03125, %v1203_v41 }
 0x4e0   : > { %v1205_v43 = vsub.f32 %v1200_v22, %v1204_v42 }
 0x4e2   : > { %v1206_v46 = vmul.f32 %v1205_v43, %v1205_v43 }
 0x4e4   : > { %v1207_v36 = vsel %vm540_vm1, %v1206_v46, 0.0 }
 0x4e5   : > { %1208 = vadd.xlane.f32.xlu0 %v1207_v36 }
 0x56e   : > { %v1209_v52 = vpop.xlane.xlu0 %1208 }
 0x56f   : > { %v1210_v59 = vmul.f32 0.03125, %v1209_v52 }
 0x571   : > { %v1211_v49 = vadd.f32 1e-05, %v1210_v59 }
 0x573   : > { %1834 = vrsqrt.f32 %v1211_v49 }
 0x580   : > { %v1835_v55 = vpop.eup %1834 }
 0x581   : > { %v1213_v58 = vmul.f32 %v1835_v55, %v1205_v43 }
 0x583   : > { %v1221_v61 = vmul.f32 %v1560_v44, %v1213_v58 }
 0x585   : > { %v1229_v62 = vadd.f32 %v1561_v60, %v1221_v61 }
 0x587   : > { %v1230_v30 = vpack.c.bf16 %v1229_v62, %v1229_v62 }
 0x589   : > { %1601 = vmatmul.mubr.msk.bf16.vlgmr.msra.gmra.mxu1 %vm540_vm1, %v1230_v30 }
 0x649   : > { %v1299_v54 = vpop.f32.mrf.mxu1 }
 0x64a   : > { %v1300_v3 = vadd.f32 %v1563_v16, %v1299_v54 }
 0x64b   : > { %v1602_v4 = vpop.f32.mrf.mxu1 }
 0x64c   : > { %v1306_v18 = vmul.f32 0.70710677, %v1300_v3  ;;  %v1305_v57 = vmul.f32 0.5, %v1300_v3 }
 0x64d   : > { %v1302_v5 = vpop.f32.mrf.mxu1 }
 0x64e   : > { %1836 = verf.f32 %v1306_v18 }
 0x64f   : > { %v1603_v7 = vpop.f32.mrf.mxu1 }
 0x65b   : > { %v1837_v8 = vpop.eup %1836 }
 0x65c   : > { %v1308_v51 = vadd.f32 1.0, %v1837_v8 }
 0x65e   : > { %v1309_v11 = vmul.f32 %v1308_v51, %v1305_v57 }
 0x660   : > { %v1310_v12 = vpack.c.bf16 %v1309_v11, %v1309_v11 }
 0x662   : > { %1613 = vmatmul.mubr.msk.bf16.vlgmr.msra.gmra.mxu0 %vm1343_vm10, %v1310_v12 }
 0x722   : > { %v1381_v13 = vpop.f32.mrf.mxu0 }
 0x723   : > { %v1387_v27 = vadd.f32 %v1562_v9, %v1381_v13 }
 0x724   : > { %v1614_v48 = vpop.f32.mrf.mxu0 }
 0x725   : > { %v1388_v14 = vadd.f32 %v1387_v27, %v1200_v22 }
 0x726   : > { %v1384_v15 = vpop.f32.mrf.mxu0 }
 0x727   : > { %1389 = vst.msk [vmem:[%s522_s21] sm:$0xff] %vm540_vm1, %v1388_v14 }
 0x728   : > { %v1615_v45 = vpop.f32.mrf.mxu0 }
 0x729   : > { %1981 = shalt.err (!%p1978_p9)
}
 0x72a   : > { %s1982_s23 = scalar_lea.hbm %s2506_s19, 128  ;;  %s1986_s25 = scalar_lea.hbm %s2611_s20, 512 }
 0x72b   : > { %p1983_p11 = scmp.ne.s32.totalorder %s2506_s19, %s1982_s23  ;;  %p1987_p0 = scmp.lt.s32.totalorder %s2506_s19, %s2611_s20 }
 0x72c   : > { %p1988_p1 = scmp.lt.s32.totalorder %s1986_s25, %s1982_s23 }
 0x72d   : > { %p1984_p13 = pnand %p1983_p11, %p2612_p8 }
 0x72e   : > { %p1989_p4 = por %p1988_p1, %p1987_p0 }
 0x72f   : > { %p1985_p2 = pneg %p1984_p13 }
 0x731   : > { %p1990_p5 = pnand %p1989_p4, %p1985_p2 }
 0x733   : > { %1993 = shalt.err (!%p1990_p5)
}
 0x734   : > { %1636 = dma.vmem_to_hbm [thread:$0]  (%p2612_p8), %s2508_s9, 128, %s2506_s19, %s1391_s28  }
 0x735 PF: > { %s2613_s13 = sld [smem:[#allocation23_spill]]  ;;  %p1668_p6 = scmp.ge.s32.totalorder %s2072_s15, 2 }
 0x736   : > { %s2614_s16 = sld [smem:[#allocation29_spill]] }
 0x73b   : > { %s1418_s14 = sand.u32 1, %s2613_s13  }
 0x73c   : > { %p2615_p3 = scmp.ne.s32.totalorder %s2614_s16, 0  ;;  %s1419_s29 = scalar_lea.sflag [#allocation11], %s1418_s14 }
 0x73e   : > { %p1655_p12 = pnand %p1668_p6, %p2615_p3 }
 0x740   : > { %p1656_p10 = pneg %p1655_p12 }
 0x742   : > { %2039 = dma.done.wait (%p1656_p10), %s1419_s29, 128  }
 0x743   : > { %2041 = vsyncadd (%p1656_p10), %s1419_s29, 4294967168  ;;  %s29_s15 = sadd.s32 1, %s2072_s15   ;;  %s2616_s22 = sld [smem:[#allocation24_spill]] }
 0x744   : > { %p26_p7 = scmp.ge.s32.totalorder %s29_s15, 6   ;;  %s2617_s27 = sld [smem:[#allocation30_spill]] }
 0x745   : > { %s2618_s28 = sld [smem:[#allocation25_spill]]  ;;  %s2622_s25 = smov %s2048_s26 }
 0x746   : > { %s2619_s29 = sld [smem:[#allocation26_spill]]  ;;  %28 = sbr.rel (!%p26_p7) target bundleno = 12 (0xc), region = 139 }
 0x747   : > { %s2620_s30 = sld [smem:[#allocation27_spill]] }
 0x748   : > { %s2621_s14 = sld [smem:[#allocation28_spill]] }
 0x749   : > { %s2623_s26 = smov %s2616_s22 }
 0x74b   :  { %1424 = vsyncpa [#allocation10], 1 }
 0x74c   :  { %1426 = vsyncpa [#allocation10 + $0x1], 1 }
 0x74d   :  { %1427 = vsyncpa [#allocation13], 1 }
 0x74e   :  { %1428 = vsyncpa [#allocation16], 1 }
 0x74f   :  { %1429 = vsyncpa [#allocation11], 1 }
 0x750   :  { %1431 = vsyncpa [#allocation11 + $0x1], 1 }

// kernel: tpu_custom_call.1
= control target key start
LH: loop header
LB: loop body
LE: loop exit
PB: predicated region body
PF: predicated region fallthrough
CT: control target
= control target key end

     0   :  { %s2563_s0 = inlined_call_operand.vmem [shape: f32[2,16,32], index: 0, kind: input, shape index: {}]   ;;  %s2564_s1 = inlined_call_operand.vmem [shape: f32[1,32], index: 1, kind: input, shape index: {}]   ;;  %s2565_s2 = inlined_call_operand.vmem [shape: f32[1,32], index: 2, kind: input, shape index: {}]   ;;  %s2566_s3 = inlined_call_operand.vmem [shape: bf16[32,64], index: 3, kind: input, shape index: {}]   ;;  %s2567_s4 = inlined_call_operand.vmem [shape: f32[1,64], index: 4, kind: input, shape index: {}]   ;;  %s2568_s5 = inlined_call_operand.hbm [shape: f32[16,32], index: 5, kind: input, shape index: {}]   ;;  %s2569_s6 = inlined_call_operand.vmem [shape: f32[1,32], index: 6, kind: input, shape index: {}]   ;;  %s2570_s7 = inlined_call_operand.hbm [shape: f32[1,32], index: 7, kind: input, shape index: {}]   ;;  %s2571_s8 = inlined_call_operand.hbm [shape: f32[1,32], index: 8, kind: input, shape index: {}]   ;;  %s2572_s9 = inlined_call_operand.hbm [shape: bf16[32,64], index: 9, kind: input, shape index: {}]   ;;  %s2573_s10 = inlined_call_operand.hbm [shape: f32[1,64], index: 10, kind: input, shape index: {}]   ;;  %s2574_s11 = inlined_call_operand.vmem [shape: bf16[64,32], index: 11, kind: input, shape index: {}]   ;;  %s2575_s12 = inlined_call_operand.vmem [shape: f32[1,32], index: 12, kind: input, shape index: {}]   ;;  %s2576_s13 = inlined_call_operand.hbm [shape: f32[2,16,32], index: 13, kind: output, shape index: {}]  }
   0x1   :  { %2589 = sst [smem:[#allocation31_spill]] %s2570_s7 }
   0x2   :  { %2590 = sst [smem:[#allocation32_spill]] %s2572_s9 }
   0x3   :  { %2591 = sst [smem:[#allocation33_spill]] %s2576_s13 }
   0x4   :  { %18 = vsyncpa [#allocation10], 0 }
   0x5   :  { %19 = vsyncpa [#allocation13], 0 }
   0x6   :  { %20 = vsyncpa [#allocation16], 0 }
   0x7   :  { %21 = vsyncpa [#allocation11], 0 }
   0x8   :  { %23 = vsyncpa [#allocation11 + $0x1], 0  ;;  %s2167_s25 = smov 0   ;;  %s2169_s26 = smov 0  }
   0x9   :  { %s2171_s27 = smov 0   ;;  %s2173_s28 = smov 0  }
   0xa   :  { %s2175_s29 = smov 0   ;;  %s2177_s30 = smov 0  }
   0xb   :  { %s2179_s14 = smov 0   ;;  %s2181_s15 = smov 0  }
   0xc LB: > { %2592 = sst [smem:[#allocation23_spill]] %s2044_s25  ;;  %s1534_s16 = sadd.s32 4294967295, %s2072_s15   ;;  %s2072_s15 = sphi %s2181_s15, %s29_s15   ;;  %s2068_s14 = sphi %s2179_s14, %s2621_s14   ;;  %s2064_s30 = sphi %s2177_s30, %s2620_s30   ;;  %s2060_s29 = sphi %s2175_s29, %s2619_s29   ;;  %s2056_s28 = sphi %s2173_s28, %s2618_s28   ;;  %s2052_s27 = sphi %s2171_s27, %s2617_s27   ;;  %s2048_s26 = sphi %s2169_s26, %s2623_s26   ;;  %s2044_s25 = sphi %s2167_s25, %s2622_s25  }
   0xd   : > { %2593 = sst [smem:[#allocation24_spill]] %s2052_s27  ;;  %s1535_s17 = sadd.s32 4294967294, %s2072_s15  }
   0xe   : > { %2594 = sst [smem:[#allocation25_spill]] %s2064_s30  ;;  %s38_s18 = sadd.s32 1, %s2064_s30 }
   0xf   : > { %2595 = sst [smem:[#allocation26_spill]] %s2068_s14  ;;  %s41_s19 = sadd.s32 1, %s2068_s14 }
  0x10   : > { %p39_p0 = scmp.ge.s32.totalorder %s38_s18, 2  ;;  %s330_s20 = sadd.s32 1, %s2052_s27 }
  0x11   : > { %p340_p1 = scmp.ne.s32.totalorder %s2052_s27, %s2048_s26  ;;  %p341_p2 = scmp.eq.s32.totalorder %s1534_s16, 3 }
  0x12   : > { %s2625_s18 = smov (%p39_p0, %s38_s18), 0  ;;  %s2627_s19 = smov (!%p39_p0, %s41_s19), %s2068_s14 }
  0x13   : > { %2596 = sst [smem:[#allocation27_spill]] %s2625_s18  ;;  %s326_s21 = ssub.s32 %s2064_s30, %s2625_s18 }
  0x14   : > { %p2219_p3 = por %p341_p2, %p340_p1  ;;  %p43_p4 = scmp.ge.s32.totalorder %s2627_s19, 2 }
  0x15   : > { %p346_p5 = scmp.ne.s32.totalorder %s2048_s26, %s2044_s25  ;;  %p347_p6 = scmp.eq.s32.totalorder %s1535_s17, 3 }
  0x16   : > { %s2597_s22 = scalar_select %p2219_p3, 1, 0 }
  0x17   : > { %p1536_p7 = scmp.ge.s32.totalorder %s2072_s15, 1  ;;  %s2629_s19 = smov (%p43_p4, %s2627_s19), 0 }
  0x18   : > { %2598 = sst [smem:[#allocation28_spill]] %s2629_s19  ;;  %p2228_p8 = por %p347_p6, %p346_p5 }
  0x19   : > { %p354_p9 = scmp.lt.s32.totalorder %s2072_s15, 5  ;;  %s325_s24 = ssub.s32 %s2068_s14, %s2629_s19 }
  0x1a   : > { %s2599_s23 = scalar_select %p2228_p8, 1, 0 }
  0x1b   : > { %s327_s13 = sor.u32 %s326_s21, %s325_s24  ;;  %p2235_p10 = pnand %p1536_p7, %p354_p9 }
  0x1c   : > { %2600 = sst [smem:[#allocation29_spill]] %s2599_s23  ;;  %p328_p11 = scmp.eq.s32.totalorder %s327_s13, 0 }
  0x1d   : > { %s2601_s18 = scalar_select %p2235_p10, 1, 0 }
  0x1e   : > { %p2239_p12 = scmp.eq.s32.totalorder %s1534_s16, 0  ;;  %p1638_p13 = pneg %p2235_p10 }
  0x1f   : > { %s2246_s17 = scalar_select %p328_p11, %s2052_s27, %s330_s20  }
  0x20   : > { %s2602_s30 = scalar_select %p2239_p12, 1, 0 }
  0x21   : > { %2603 = sst [smem:[#allocation30_spill]] %s2246_s17  ;;  %p2250_p0 = pnand %p2239_p12, %p1638_p13 }
  0x22   : > { %s2074_s21 = smov [#allocation12]   ;;  %s2075_s19 = smov [#allocation15]  }
  0x23   : > { %s395_s24 = sshll.u32 %s2074_s21, 4  ;;  %s416_s13 = sshll.u32 %s2075_s19, 4  ;;  %s396_s24 = int_to_ptr.vmem [resolvable:$true] %s395_s24  ;;  %s417_s13 = int_to_ptr.vmem [resolvable:$true] %s416_s13 }
  0x24   : > { %p2256_p1 = pneg %p2250_p0  ;;  %s1849_s14 = scalar_lea.vmem %s396_s24, 16 }
  0x25   : > { %p1850_p2 = scmp.ne.s32.totalorder %s396_s24, %s1849_s14  ;;  %s1856_s20 = scalar_lea.vmem %s396_s24, 32 }
  0x26   : > { %p1857_p6 = scmp.lt.s32.totalorder %s396_s24, %s396_s24  ;;  %p1858_p7 = scmp.lt.s32.totalorder %s1856_s20, %s1849_s14 }
  0x27   : > { %p1852_p4 = pnand %p1850_p2, %p2256_p1 }
  0x28   : > { %p1859_p9 = por %p1858_p7, %p1857_p6 }
  0x29   : > { %p1853_p5 = pneg %p1852_p4 }
  0x2b   : > { %p1860_p11 = pnand %p1859_p9, %p1853_p5 }
  0x2d   : > { %1863 = shalt.err (!%p1860_p11)
}
  0x2e   : > { %s2606_s7 = sld [smem:[#allocation31_spill]]  ;;  %s1875_s17 = scalar_lea.vmem %s417_s13, 256 }
  0x2f   : > { %p1876_p13 = scmp.ne.s32.totalorder %s417_s13, %s1875_s17  ;;  %p1883_p4 = scmp.lt.s32.totalorder %s417_s13, %s417_s13 }
  0x30   : > { %p1884_p3 = scmp.lt.s32.totalorder %s1875_s17, %s1875_s17 }
  0x31   : > { %p1878_p8 = pnand %p1876_p13, %p2256_p1 }
  0x32   : > { %p1885_p12 = por %p1884_p3, %p1883_p4 }
  0x33   : > { %p1879_p2 = pneg %p1878_p8 }
  0x34   : > { %1644 = dma.hbm_to_vmem [thread:$0]  (!%p2250_p0), %s2606_s7, 16, %s396_s24, [#allocation13]  }
  0x35   : > { %p1886_p10 = pnand %p1885_p12, %p1879_p2 }
  0x37   : > { %1889 = shalt.err (!%p1886_p10)
}
  0x38   : > { %s2076_s14 = smov 64   ;;  %s2077_s20 = smov 4  }
  0x39   : > { %s2607_s9 = sld [smem:[#allocation32_spill]]  ;;  %s2078_s24 = smov [#allocation9]  }
  0x3a   : > { %s378_s21 = sshll.u32 %s2078_s24, 4  ;;  %s379_s21 = int_to_ptr.vmem [resolvable:$true] %s378_s21 }
  0x3b   : > { %s1901_s7 = scalar_lea.vmem %s379_s21, 256  ;;  %p1909_p3 = scmp.lt.s32.totalorder %s379_s21, %s379_s21 }
  0x3c   : > { %p1902_p5 = scmp.ne.s32.totalorder %s379_s21, %s1901_s7  ;;  %p1910_p12 = scmp.lt.s32.totalorder %s1901_s7, %s1901_s7 }
  0x3e   : > { %p1904_p8 = pnand %p1902_p5, %p2256_p1  ;;  %p1911_p10 = por %p1910_p12, %p1909_p3 }
  0x3f   : > { %1650 = dma.hbm_to_vmem [thread:$0]  (!%p2250_p0), %s2607_s9, 256, %s417_s13, [#allocation16], %s2076_s14, %s2076_s14, %s2077_s20  }
  0x40   : > { %p1905_p6 = pneg %p1904_p8 }
  0x42   : > { %p1912_p7 = pnand %p1911_p10, %p1905_p6 }
  0x44   : > { %1915 = shalt.err (!%p1912_p7)
}
  0x45   : > { %s2079_s17 = smov 128   ;;  %s2080_s25 = smov 8  }
  0x46   : > { %1641 = dma.hbm_to_vmem [thread:$0]  (!%p2250_p0), %s2568_s5, 256, %s379_s21, [#allocation10], %s2079_s17, %s2079_s17, %s2080_s25  }
  0x47   : > { %s2081_s14 = smov [#allocation14]   ;;  %s2082_s19 = smov [#allocation17]  }
  0x48   : > { %s406_s20 = sshll.u32 %s2081_s14, 4  ;;  %s430_s24 = sshll.u32 %s2082_s19, 4  ;;  %s407_s20 = int_to_ptr.vmem [resolvable:$true] %s406_s20  ;;  %s431_s24 = int_to_ptr.vmem [resolvable:$true] %s430_s24 }
  0x49   : > { %s1927_s9 = scalar_lea.vmem %s407_s20, 16  ;;  %s1934_s7 = scalar_lea.vmem %s407_s20, 32 }
  0x4a   : > { %p1928_p9 = scmp.ne.s32.totalorder %s407_s20, %s1927_s9  ;;  %p1935_p2 = scmp.lt.s32.totalorder %s407_s20, %s407_s20 }
  0x4b   : > { %p1936_p4 = scmp.lt.s32.totalorder %s1934_s7, %s1927_s9 }
  0x4c   : > { %p1930_p11 = pnand %p1928_p9, %p2256_p1 }
  0x4d   : > { %p1937_p5 = por %p1936_p4, %p1935_p2 }
  0x4e   : > { %p1931_p13 = pneg %p1930_p11 }
  0x50   : > { %p1938_p8 = pnand %p1937_p5, %p1931_p13 }
  0x52   : > { %1941 = shalt.err (!%p1938_p8)
}
  0x53   : > { %1647 = dma.hbm_to_vmem [thread:$0]  (!%p2250_p0), %s2571_s8, 16, %s407_s20, [#allocation13]  }
  0x54   : > { %s1953_s17 = scalar_lea.vmem %s431_s24, 16  ;;  %s1960_s27 = scalar_lea.vmem %s431_s24, 32 }
  0x55   : > { %p1954_p6 = scmp.ne.s32.totalorder %s431_s24, %s1953_s17  ;;  %p1961_p10 = scmp.lt.s32.totalorder %s431_s24, %s431_s24 }
  0x56   : > { %p1962_p7 = scmp.lt.s32.totalorder %s1960_s27, %s1953_s17 }
  0x57   : > { %p1956_p3 = pnand %p1954_p6, %p2256_p1 }
  0x58   : > { %p1963_p9 = por %p1962_p7, %p1961_p10 }
  0x59   : > { %p1957_p12 = pneg %p1956_p3 }
  0x5b   : > { %p1964_p11 = pnand %p1963_p9, %p1957_p12 }
  0x5d   : > { %1967 = shalt.err (!%p1964_p11)
}
  0x5e   : > { %1653 = dma.hbm_to_vmem [thread:$0]  (!%p2250_p0), %s2573_s10, 16, %s431_s24, [#allocation16]  }
  0x5f   : > { %p2608_p13 = scmp.ne.s32.totalorder %s2601_s18, 0 }
  0x60   : > { %p2609_p2 = scmp.ne.s32.totalorder (!%p2608_p13), %s2602_s30, 0 }
  0x61   : > { %460 = sbr.rel (%p2608_p13) target bundleno = 1845 (0x735), region = 72 }
  0x66   : > { %2027 = dma.done.wait (%p2609_p2), [#allocation10], 256  }
  0x67   : > { %2029 = vsyncadd (%p2609_p2), [#allocation10], 4294967040 }
  0x68   : > { %2031 = dma.done.wait (%p2609_p2), [#allocation13], 32  }
  0x69   : > { %2033 = vsyncadd (%p2609_p2), [#allocation13], 4294967264 }
  0x6a   : > { %2035 = dma.done.wait (%p2609_p2), [#allocation16], 272  }
  0x6b   : > { %2037 = vsyncadd (%p2609_p2), [#allocation16], 4294967024  ;;  %s520_s18 = sand.u32 1, %s2048_s26   ;;  %p523_p0 = scmp.lt.s32.totalorder %s2060_s29, 1 }
  0x6c   : > { %s2313_s23 = sshll.u32 %s520_s18, 3  ;;  %p525_p1 = scmp.lt.s32.totalorder %s2056_s28, 1 }
  0x6d   : > { %s524_s16 = scalar_select %p523_p0, %s2060_s29, 1 }
  0x6e   : > { %s526_s14 = scalar_select %p525_p1, %s2056_s28, 1 }
  0x6f   : > { %s1550_s20 = sshll.u32 %s524_s16, 1  ;;  %s522_s21 = scalar_lea.vmem [#allocation18], %s2313_s23 }
  0x70   : > { %s528_s19 = sadd.s32 %s1550_s20, %s526_s14  ;;  %p1552_p4 = scmp.ne.s32.totalorder %s2056_s28, 0 }
  0x71   : > { %s1551_s24 = sshll.u32 %s528_s19, 3 }
  0x72   : > { %s530_s25 = scalar_lea.vmem %s2563_s0, %s1551_s24  ;;  %535 = sbr.rel (%p1552_p4) target bundleno = 121 (0x79), region = 96 }
  0x77   : > { %vm536_vm0 = vcmask 261120   ;;  %v2083_v0 = vmov 0.0  }
  0x78   : > { %537 = vst.msk [vmem:[#allocation2] sm:$0xff] %vm536_vm0, %v2083_v0  ;;  %538 = vst.msk [vmem:[#allocation2 + $0x8] sm:$0xff] %vm536_vm0, %v2083_v0 }
  0x79 PF: > { %v539_v1 = vld [vmem:[%s530_s25] sm:$0xff]  ;;  %vm540_vm1 = vcmask 261120   ;;  %v1787_v8 = vld [vmem:[%s2566_s3 + $0x8] sm:$0xff]   ;;  %v2084_v9 = vmov 0.0   ;;  %vm2085_vm2 = vmmov 0   ;;  %v2086_v25 = vmov 0  }
  0x7a   : > { %v541_v2 = vsel %vm540_vm1, %v539_v1, 0.0  ;;  %1588 = vmatprep.subr.bf16.mxu1 %v2084_v9  ;;  %1604 = vmatprep.subr.bf16.mxu0 %v2084_v9  ;;  %v1788_v10 = vld [vmem:[%s2566_s3] sm:$0xff]   ;;  %s2087_s17 = smov 96   ;;  %v2088_v39 = vmov 1966171168   ;;  %v676_v41 = vlaneseq  ;;  %v665_v58 = vld [vmem:[#allocation9] sm:$0xff] }
  0x7b   : > { %542 = vadd.xlane.f32.xlu0 %v541_v2  ;;  %1589 = vmatpush3.bf16.msra.mxu1 %v1787_v8  ;;  %v1553_v15 = vld [vmem:[%s2564_s1] ss:$0 sm:$0xff]  ;;  %v674_v40 = vunpack.c.l.s4 %v2088_v39  ;;  %vm1181_vm3 = vcmask 1040384   ;;  %vm1183_vm4 = vcmask 1041408   ;;  %vm1185_vm5 = vcmask 1042432   ;;  %s1573_s30 = sshll.u32 %s2060_s29, 1 }
  0x7c   : > { %1592 = vmatprep.mubr.msk.bf16.mxu1 %vm2085_vm2, %v2084_v9  ;;  %1590 = vmatprep.subr.bf16.mxu1 %v2084_v9  ;;  %v1554_v17 = vld [vmem:[%s2565_s2] ss:$0 sm:$0xff]  ;;  %v2357_v45 = vshrl.u32 %v676_v41, 7  ;;  %vm1187_vm6 = vcmask 1043456   ;;  %vm1189_vm7 = vcmask 1044480   ;;  %vm1191_vm8 = vcmask 1045504   ;;  %s1402_s7 = sadd.s32 %s2056_s28, %s1573_s30 }
  0x7d   : > { %1612 = vmatprep.mubr.msk.bf16.mxu0 %vm2085_vm2, %v2084_v9  ;;  %v1559_v19 = vld [vmem:[%s2569_s6] ss:$0 sm:$0xff]  ;;  %1755 = vset.pattern.permute.xlu0 %v2086_v25  ;;  %v675_v44 = vunpack.c.0.s8 %v674_v40  ;;  %vm1193_vm9 = vcmask 1046528   ;;  %vm1343_vm10 = vcmask 523264   ;;  %s1574_s27 = sshll.u32 %s1402_s7, 7  ;;  %s1406_s9 = sshll.u32 %s522_s21, 4  ;;  %s2508_s9 = int_to_ptr.vmem [resolvable:$true] %s1406_s9 }
  0x7e   : > { %v1555_v24 = vld [vmem:[%s2567_s4] ss:$0 sm:$0xff]  ;;  %v2362_v53 = vsub.s32 0, %v2357_v45  ;;  %s2610_s14 = sld [smem:[#allocation33_spill]]  ;;  %s1391_s28 = scalar_lea.sflag [#allocation11], %s520_s18 }
  0x7f   : > { %1591 = vmatpush3.bf16.msra.mxu1 %v1788_v10  ;;  %v678_v46 = vsub.s32 %v675_v44, %v2357_v45  ;;  %v666_v59 = vld [vmem:[#allocation9 + $0x8] sm:$0xff]  ;;  %s1968_s29 = scalar_lea.vmem %s2508_s9, 128  ;;  %p2612_p8 = scmp.ne.s32.totalorder %s2597_s22, 0 }
  0x80   : > { %1596 = vmatprep.subr.bf16.mxu1 %v2084_v9  ;;  %p1969_p5 = scmp.ne.s32.totalorder %s2508_s9, %s1968_s29  ;;  %s2096_s24 = smov [#allocation18]  }
  0x81   : > { %s1972_s30 = sshll.u32 %s2096_s24, 4  ;;  %s1973_s30 = int_to_ptr.vmem [resolvable:$false] %s1972_s30 }
  0x82   : > { %p1970_p6 = pnand %p1969_p5, %p2612_p8  ;;  %s1974_s7 = scalar_lea.vmem %s1973_s30, 256 }
  0x83   : > { %p1975_p12 = scmp.lt.s32.totalorder %s2508_s9, %s1973_s30  ;;  %p1976_p10 = scmp.lt.s32.totalorder %s1974_s7, %s1968_s29 }
  0x84   : > { %s2611_s20 = smov %s2610_s14  ;;  %s2506_s19 = scalar_lea.hbm %s2610_s14, %s1574_s27 }
  0x85   : > { %p1971_p3 = pneg %p1970_p6  ;;  %p1977_p7 = por %p1976_p10, %p1975_p12 }
  0x87   : > { %p1978_p9 = pnand %p1977_p7, %p1971_p3 }
 0x104   : > { %v543_v3 = vpop.xlane.xlu0 %542 }
 0x105   : > { %v545_v4 = vmul.f32 0.03125, %v543_v3 }
 0x107   : > { %v546_v5 = vsub.f32 %v539_v1, %v545_v4 }
 0x109   : > { %v547_v6 = vmul.f32 %v546_v5, %v546_v5 }
 0x10b   : > { %v548_v7 = vsel %vm540_vm1, %v547_v6, 0.0 }
 0x10c   : > { %549 = vadd.xlane.f32.xlu0 %v548_v7 }
 0x195   : > { %v550_v11 = vpop.xlane.xlu0 %549 }
 0x196   : > { %v551_v12 = vmul.f32 0.03125, %v550_v11 }
 0x198   : > { %v552_v13 = vadd.f32 1e-05, %v551_v12 }
 0x19a   : > { %1796 = vrsqrt.f32 %v552_v13 }
 0x1a7   : > { %v1797_v14 = vpop.eup %1796 }
 0x1a8   : > { %v554_v16 = vmul.f32 %v1797_v14, %v546_v5 }
 0x1aa   : > { %v562_v18 = vmul.f32 %v1553_v15, %v554_v16 }
 0x1ac   : > { %v570_v20 = vadd.f32 %v1554_v17, %v562_v18 }
 0x1ae   : > { %v571_v21 = vpack.c.bf16 %v570_v20, %v570_v20  ;;  %v662_v22 = vmul.f32 %v1559_v19, %v570_v20 }
 0x1b0   : > { %1593 = vmatmul.mubr.msk.bf16.vlgmr.msra.gmra.mxu1 %vm540_vm1, %v571_v21  ;;  %v663_v23 = vadd.f32 %v662_v22, %v539_v1 }
 0x1b1   : > { %1600 = vmatprep.mubr.msk.bf16.mxu1 %vm2085_vm2, %v2084_v9 }
 0x1b2   : > { %664 = vst.msk [vmem:[#allocation6] sm:$0xff] %vm540_vm1, %v663_v23 }
 0x270   : > { %v632_v26 = vpop.f32.mrf.mxu1 }
 0x271   : > { %v633_v27 = vadd.f32 %v1555_v24, %v632_v26 }
 0x272   : > { %v1594_v28 = vpop.f32.mrf.mxu1 }
 0x273   : > { %v639_v29 = vand.u32 2147483647, %v633_v27  ;;  %651 = vrot.lane.b32.xlu1 %v633_v27, %s2087_s17  ;;  %v638_v37 = vmax.f32 %v633_v27, 0.0 }
 0x274   : > { %v635_v30 = vpop.f32.mrf.mxu1 }
 0x275   : > { %v640_v31 = vsub.f32 0.0, %v639_v29 }
 0x276   : > { %v1595_v32 = vpop.f32.mrf.mxu1 }
 0x277   : > { %v641_v33 = vmul.f32 1.442695, %v640_v31 }
 0x279   : > { %1798 = vpow2.f32 %v641_v33 }
 0x286   : > { %v1799_v34 = vpop.eup %1798 }
 0x287   : > { %v643_v35 = vadd.f32 1.0, %v1799_v34 }
 0x289   : > { %1800 = vlog2.f32 %v643_v35 }
 0x296   : > { %v1801_v36 = vpop.eup %1800 }
 0x297   : > { %v645_v38 = vmul.f32 0.6931472, %v1801_v36 }
 0x299   : > { %v646_v42 = vadd.f32 %v645_v38, %v638_v37 }
 0x29b   : > { %647 = vst.msk [vmem:[#allocation3] sm:$0xff] %vm540_vm1, %v646_v42  ;;  %v648_v43 = vmul.f32 %v646_v42, %v570_v20 }
 0x29d   : > { %649 = vst.msk [vmem:[#allocation4] sm:$0xff] %vm540_vm1, %v648_v43 }
 0x2a2   : > { %v669_v47 = vld [vmem:[#allocation3] sm:$0xff] }
 0x2a3   : > { %v672_v48 = vcombine.high %v669_v47, %v669_v47  ;;  %v679_v49 = vrot.slane %v669_v47, %v678_v46 }
 0x2a5   : > { %v686_v50 = vrot.slane %v672_v48, %v678_v46  ;;  %v687_v51 = vcombine.high %v679_v49, %v679_v49  ;;  %v695_v52 = vrot.slane %v679_v49, %v678_v46 }
 0x2a7   : > { %v688_v54 = vcombine.high %v686_v50, %v686_v50  ;;  %v702_v55 = vrot.slane %v686_v50, %v678_v46  ;;  %v709_v56 = vrot.slane %v687_v51, %v678_v46  ;;  %v717_v57 = vcombine.high %v695_v52, %v695_v52 }
 0x2a8   : > { %v724_v60 = vrot.slane %v695_v52, %v2362_v53 }
 0x2a9   : > { %v719_v61 = vcombine.high %v709_v56, %v709_v56  ;;  %v728_v62 = vrot.slane %v709_v56, %v2362_v53  ;;  %v716_v63 = vrot.slane %v688_v54, %v678_v46  ;;  %v732_v0 = vrot.slane %v717_v57, %v2362_v53 }
 0x2aa   : > { %v740_v1 = vrot.slane %v702_v55, %v2362_v53  ;;  %v761_v2 = vmul.f32 %v724_v60, %v665_v58  ;;  %v762_v3 = vmul.f32 %v724_v60, %v666_v59  ;;  %v718_v4 = vcombine.high %v702_v55, %v702_v55 }
 0x2ab   : > { %v763_v5 = vmul.f32 %v728_v62, %v665_v58  ;;  %v764_v6 = vmul.f32 %v728_v62, %v666_v59  ;;  %v736_v7 = vrot.slane %v719_v61, %v2362_v53  ;;  %v765_v8 = vmul.f32 %v732_v0, %v665_v58 }
 0x2ac   : > { %v720_v10 = vcombine.high %v716_v63, %v716_v63  ;;  %v744_v11 = vrot.slane %v716_v63, %v2362_v53  ;;  %v766_v12 = vmul.f32 %v732_v0, %v666_v59  ;;  %v769_v13 = vmul.f32 %v740_v1, %v665_v58 }
 0x2ad   : > { %v777_v14 = vmul.f32 1.442695, %v761_v2  ;;  %v779_v15 = vmul.f32 1.442695, %v762_v3  ;;  %v781_v16 = vmul.f32 1.442695, %v763_v5  ;;  %v748_v17 = vrot.slane %v718_v4, %v2362_v53 }
 0x2ae   : > { %v770_v18 = vmul.f32 %v740_v1, %v666_v59  ;;  %v783_v19 = vmul.f32 1.442695, %v764_v6  ;;  %v768_v20 = vmul.f32 %v736_v7, %v666_v59  ;;  %v785_v21 = vmul.f32 1.442695, %v765_v8 }
 0x2af   : > { %1802 = vpow2.f32 %v777_v14  ;;  %v752_v22 = vrot.slane %v720_v10, %v2362_v53  ;;  %v767_v23 = vmul.f32 %v736_v7, %v665_v58  ;;  %v787_v24 = vmul.f32 1.442695, %v766_v12  ;;  %v667_v10 = vld [vmem:[#allocation2] sm:$0xff] }
 0x2b0   : > { %1804 = vpow2.f32 %v779_v15  ;;  %v771_v26 = vmul.f32 %v744_v11, %v665_v58  ;;  %v793_v27 = vmul.f32 1.442695, %v769_v13  ;;  %v773_v28 = vmul.f32 %v748_v17, %v665_v58 }
 0x2b1   : > { %1806 = vpow2.f32 %v781_v16  ;;  %v795_v29 = vmul.f32 1.442695, %v770_v18  ;;  %v772_v30 = vmul.f32 %v744_v11, %v666_v59  ;;  %v791_v31 = vmul.f32 1.442695, %v768_v20 }
 0x2b2   : > { %1808 = vpow2.f32 %v783_v19  ;;  %v789_v32 = vmul.f32 1.442695, %v767_v23  ;;  %v775_v33 = vmul.f32 %v752_v22, %v665_v58  ;;  %v774_v34 = vmul.f32 %v748_v17, %v666_v59 }
 0x2b3   : > { %1810 = vpow2.f32 %v785_v21  ;;  %v797_v35 = vmul.f32 1.442695, %v771_v26  ;;  %v801_v36 = vmul.f32 1.442695, %v773_v28  ;;  %v776_v37 = vmul.f32 %v752_v22, %v666_v59 }
 0x2b4   : > { %1812 = vpow2.f32 %v787_v24  ;;  %v799_v38 = vmul.f32 1.442695, %v772_v30  ;;  %v805_v39 = vmul.f32 1.442695, %v775_v33  ;;  %v803_v40 = vmul.f32 1.442695, %v774_v34 }
 0x2b5   : > { %1814 = vpow2.f32 %v793_v27  ;;  %v807_v41 = vmul.f32 1.442695, %v776_v37  ;;  %v2089_v62 = vmov 4   ;;  %v2090_v0 = vmov 5  }
 0x2b6   : > { %1816 = vpow2.f32 %v795_v29  ;;  %v2091_v1 = vmov 1   ;;  %v2092_v2 = vmov 7   ;;  %v2093_v3 = vmov 2  }
 0x2b7   : > { %1818 = vpow2.f32 %v791_v31  ;;  %v2094_v5 = vmov 3   ;;  %v2095_v6 = vmov 6   ;;  %v916_v15 = vsub.s32 1, %v2357_v45 }
 0x2b8   : > { %1820 = vpow2.f32 %v789_v32  ;;  %v956_v23 = vsub.s32 2, %v2357_v45  ;;  %v996_v31 = vsub.s32 3, %v2357_v45 }
 0x2b9   : > { %1822 = vpow2.f32 %v797_v35  ;;  %v1036_v35 = vsub.s32 4, %v2357_v45 }
 0x2ba   : > { %1824 = vpow2.f32 %v801_v36 }
 0x2bb   : > { %1826 = vpow2.f32 %v799_v38 }
 0x2bc   : > { %v1803_v42 = vpop.eup %1802  ;;  %1828 = vpow2.f32 %v805_v39 }
 0x2bd   : > { %v1805_v43 = vpop.eup %1804  ;;  %809 = vst.msk [vmem:[#allocation8] sm:$0xff] %vm540_vm1, %v1803_v42  ;;  %1830 = vpow2.f32 %v803_v40  ;;  %v668_v42 = vld [vmem:[#allocation2 + $0x8] sm:$0xff] }
 0x2be   : > { %v1807_v44 = vpop.eup %1806  ;;  %810 = vst.msk [vmem:[#allocation8 + $0x8] sm:$0xff] %vm540_vm1, %v1805_v43  ;;  %1832 = vpow2.f32 %v807_v41 }
 0x2bf   : > { %v1809_v46 = vpop.eup %1808  ;;  %811 = vst.msk [vmem:[#allocation8 + $0x10] sm:$0xff] %vm540_vm1, %v1807_v44 }
 0x2c0   : > { %v1811_v47 = vpop.eup %1810  ;;  %812 = vst.msk [vmem:[#allocation8 + $0x18] sm:$0xff] %vm540_vm1, %v1809_v46  ;;  %v1076_v46 = vsub.s32 5, %v2357_v45 }
 0x2c1   : > { %v1813_v48 = vpop.eup %1812  ;;  %813 = vst.msk [vmem:[#allocation8 + $0x20] sm:$0xff] %vm540_vm1, %v1811_v47 }
 0x2c2   : > { %v1815_v49 = vpop.eup %1814  ;;  %814 = vst.msk [vmem:[#allocation8 + $0x28] sm:$0xff] %vm540_vm1, %v1813_v48 }
 0x2c3   : > { %v1817_v50 = vpop.eup %1816  ;;  %817 = vst.msk [vmem:[#allocation8 + $0x40] sm:$0xff] %vm540_vm1, %v1815_v49 }
 0x2c4   : > { %v1819_v51 = vpop.eup %1818  ;;  %818 = vst.msk [vmem:[#allocation8 + $0x48] sm:$0xff] %vm540_vm1, %v1817_v50  ;;  %v858_v11 = vld [vmem:[#allocation8] sm:$0xff] }
 0x2c5   : > { %v1821_v52 = vpop.eup %1820  ;;  %816 = vst.msk [vmem:[#allocation8 + $0x38] sm:$0xff] %vm540_vm1, %v1819_v51  ;;  %v860_v17 = vmul.f32 %v858_v11, %v667_v10  ;;  %v859_v43 = vld [vmem:[#allocation8 + $0x8] sm:$0xff] }
 0x2c6   : > { %v1823_v54 = vpop.eup %1822  ;;  %815 = vst.msk [vmem:[#allocation8 + $0x30] sm:$0xff] %vm540_vm1, %v1821_v52  ;;  %v902_v20 = vld [vmem:[#allocation8 + $0x10] sm:$0xff]  ;;  %v861_v51 = vmul.f32 %v859_v43, %v668_v42 }
 0x2c7   : > { %v1825_v55 = vpop.eup %1824  ;;  %819 = vst.msk [vmem:[#allocation8 + $0x50] sm:$0xff] %vm540_vm1, %v1823_v54 }
 0x2c8   : > { %v1827_v56 = vpop.eup %1826  ;;  %821 = vst.msk [vmem:[#allocation8 + $0x60] sm:$0xff] %vm540_vm1, %v1825_v55  ;;  %v942_v28 = vld [vmem:[#allocation8 + $0x20] sm:$0xff] }
 0x2c9   : > { %v1829_v57 = vpop.eup %1828  ;;  %820 = vst.msk [vmem:[#allocation8 + $0x58] sm:$0xff] %vm540_vm1, %v1827_v56 }
 0x2ca   : > { %v1831_v58 = vpop.eup %1830  ;;  %823 = vst.msk [vmem:[#allocation8 + $0x70] sm:$0xff] %vm540_vm1, %v1829_v57  ;;  %v1022_v49 = vld [vmem:[#allocation8 + $0x40] sm:$0xff] }
 0x2cb   : > { %v1833_v59 = vpop.eup %1832  ;;  %822 = vst.msk [vmem:[#allocation8 + $0x68] sm:$0xff] %vm540_vm1, %v1831_v58  ;;  %v1116_v58 = vsub.s32 6, %v2357_v45 }
 0x2cc   : > { %824 = vst.msk [vmem:[#allocation8 + $0x78] sm:$0xff] %vm540_vm1, %v1833_v59 }
 0x2cd   : > { %v982_v37 = vld [vmem:[#allocation8 + $0x30] sm:$0xff] }
 0x2e5   : > { %v652_v60 = vpop.permute.xlu1 %651 }
 0x2e6   : > { %654 = vst.msk [vmem:[#allocation5] sm:$0xff] %vm540_vm1, %v652_v60  ;;  %v1062_v60 = vld [vmem:[#allocation8 + $0x50] sm:$0xff] }
 0x2ed   : > { %v825_v61 = vld [vmem:[#allocation5] sm:$0xff] }
 0x2ee   : > { %826 = vxpose.xlu1.b32.start.end [1/1] (short) (narrow) %v825_v61, 32 }
 0x30c   : > { %1759 = vset.pattern.permute.xlu1 %v2089_v62 }
 0x36a   : > { %v842_v63 = vpop.trf.xlu1 }
 0x36b   : > { %1027 = vperm.xlu1 %1759, %v842_v63   ;;  %864 = vperm.xlu0 %1755, %v842_v63  }
 0x36e   : > { %v843_v4 = vpop.trf.xlu1 }
 0x36f   : > { %1760 = vset.pattern.permute.xlu1 %v2090_v0  ;;  %1756 = vset.pattern.permute.xlu0 %v2091_v1 }
 0x370   : > { %1067 = vperm.xlu1 %1760, %v842_v63   ;;  %907 = vperm.xlu0 %1756, %v842_v63  }
 0x372   : > { %v844_v7 = vpop.trf.xlu1 }
 0x374   : > { %1762 = vset.pattern.permute.xlu1 %v2092_v2  ;;  %1757 = vset.pattern.permute.xlu0 %v2093_v3 }
 0x375   : > { %1147 = vperm.xlu1 %1762, %v842_v63   ;;  %947 = vperm.xlu0 %1757, %v842_v63  }
 0x376   : > { %v845_v8 = vpop.trf.xlu1 }
 0x379   : > { %1763 = vset.pattern.permute.xlu1 %v2086_v25  ;;  %1758 = vset.pattern.permute.xlu0 %v2094_v5 }
 0x37a   : > { %987 = vperm.xlu0 %1758, %v842_v63   ;;  %869 = vperm.xlu1 %1763, %v843_v4  }
 0x37e   : > { %1761 = vset.pattern.permute.xlu0 %v2095_v6  ;;  %1768 = vset.pattern.permute.xlu1 %v2090_v0 }
 0x37f   : > { %1107 = vperm.xlu0 %1761, %v842_v63   ;;  %1071 = vperm.xlu1 %1768, %v843_v4   ;;  %v1156_v63 = vsub.s32 7, %v2357_v45 }
 0x383   : > { %1764 = vset.pattern.permute.xlu0 %v2091_v1  ;;  %1769 = vset.pattern.permute.xlu1 %v2095_v6 }
 0x384   : > { %911 = vperm.xlu0 %1764, %v843_v4   ;;  %1111 = vperm.xlu1 %1769, %v843_v4  }
 0x388   : > { %1765 = vset.pattern.permute.xlu0 %v2093_v3  ;;  %1770 = vset.pattern.permute.xlu1 %v2092_v2 }
 0x389   : > { %951 = vperm.xlu0 %1765, %v843_v4   ;;  %1151 = vperm.xlu1 %1770, %v843_v4  }
 0x38d   : > { %1766 = vset.pattern.permute.xlu0 %v2094_v5  ;;  %1771 = vset.pattern.permute.xlu1 %v2086_v25 }
 0x38e   : > { %991 = vperm.xlu0 %1766, %v843_v4   ;;  %882 = vperm.xlu1 %1771, %v844_v7  }
 0x392   : > { %1767 = vset.pattern.permute.xlu0 %v2089_v62  ;;  %1772 = vset.pattern.permute.xlu1 %v2091_v1 }
 0x393   : > { %1031 = vperm.xlu0 %1767, %v843_v4   ;;  %923 = vperm.xlu1 %1772, %v844_v7  }
 0x397   : > { %1773 = vset.pattern.permute.xlu0 %v2093_v3  ;;  %1774 = vset.pattern.permute.xlu1 %v2094_v5 }
 0x398   : > { %963 = vperm.xlu0 %1773, %v844_v7   ;;  %1003 = vperm.xlu1 %1774, %v844_v7  }
 0x39c   : > { %1775 = vset.pattern.permute.xlu0 %v2089_v62  ;;  %1776 = vset.pattern.permute.xlu1 %v2090_v0 }
 0x39d   : > { %1043 = vperm.xlu0 %1775, %v844_v7   ;;  %1083 = vperm.xlu1 %1776, %v844_v7  }
 0x3a1   : > { %1778 = vset.pattern.permute.xlu0 %v2086_v25  ;;  %1777 = vset.pattern.permute.xlu1 %v2095_v6  ;;  %v2396_v25 = vld [vmem:[#allocation4] sm:$0xff] }
 0x3a2   : > { %1123 = vperm.xlu1 %1777, %v844_v7   ;;  %887 = vperm.xlu0 %1778, %v845_v8   ;;  %v875_v12 = vrot.slane %v2396_v25, %v2362_v53  ;;  %v917_v19 = vrot.slane %v2396_v25, %v916_v15  ;;  %v957_v53 = vrot.slane %v2396_v25, %v956_v23  ;;  %v983_v23 = vld [vmem:[#allocation8 + $0x38] sm:$0xff] }
 0x3a3   : > { %v997_v36 = vrot.slane %v2396_v25, %v996_v31  ;;  %v1037_v44 = vrot.slane %v2396_v25, %v1036_v35  ;;  %v1077_v56 = vrot.slane %v2396_v25, %v1076_v46  ;;  %v1103_v46 = vld [vmem:[#allocation8 + $0x68] sm:$0xff] }
 0x3a6   : > { %1779 = vset.pattern.permute.xlu1 %v2091_v1  ;;  %1781 = vset.pattern.permute.xlu0 %v2094_v5  ;;  %v903_v1 = vld [vmem:[#allocation8 + $0x18] sm:$0xff] }
 0x3a7   : > { %927 = vperm.xlu1 %1779, %v845_v8   ;;  %1007 = vperm.xlu0 %1781, %v845_v8  }
 0x3ab   : > { %1780 = vset.pattern.permute.xlu1 %v2093_v3  ;;  %1783 = vset.pattern.permute.xlu0 %v2090_v0  ;;  %v1117_v3 = vrot.slane %v2396_v25, %v1116_v58 }
 0x3ac   : > { %967 = vperm.xlu1 %1780, %v845_v8   ;;  %1087 = vperm.xlu0 %1783, %v845_v8  }
 0x3b0   : > { %1782 = vset.pattern.permute.xlu1 %v2089_v62  ;;  %1784 = vset.pattern.permute.xlu0 %v2092_v2 }
 0x3b1   : > { %1047 = vperm.xlu1 %1782, %v845_v8   ;;  %1163 = vperm.xlu0 %1784, %v844_v7   ;;  %v1102_v7 = vld [vmem:[#allocation8 + $0x60] sm:$0xff] }
 0x3b5   : > { %1785 = vset.pattern.permute.xlu1 %v2095_v6 }
 0x3b6   : > { %1127 = vperm.xlu1 %1785, %v845_v8  }
 0x3ba   : > { %1786 = vset.pattern.permute.xlu1 %v2092_v2 }
 0x3bb   : > { %1167 = vperm.xlu1 %1786, %v845_v8  }
 0x3e6   : > { %v865_v13 = vpop.permute.xlu0 %864  ;;  %v1028_v14 = vpop.permute.xlu1 %1027 }
 0x3e7   : > { %v876_v16 = vmul.f32 %v875_v12, %v865_v13  ;;  %v1038_v50 = vmul.f32 %v1037_v44, %v1028_v14  ;;  %v1157_v13 = vrot.slane %v2396_v25, %v1156_v63 }
 0x3e9   : > { %v2401_v18 = vadd.f32 %v876_v16, %v860_v17 }
 0x3eb   : > { %v908_v21 = vpop.permute.xlu0 %907  ;;  %v1068_v22 = vpop.permute.xlu1 %1067  ;;  %v904_v24 = vmul.f32 %v902_v20, %v2401_v18  ;;  %v1142_v20 = vld [vmem:[#allocation8 + $0x70] sm:$0xff] }
 0x3ec   : > { %v918_v26 = vmul.f32 %v917_v19, %v908_v21  ;;  %v1078_v61 = vmul.f32 %v1077_v56, %v1068_v22 }
 0x3ee   : > { %v2406_v27 = vadd.f32 %v918_v26, %v904_v24 }
 0x3f0   : > { %v948_v29 = vpop.permute.xlu0 %947  ;;  %v1148_v30 = vpop.permute.xlu1 %1147  ;;  %v944_v32 = vmul.f32 %v942_v28, %v2406_v27 }
 0x3f1   : > { %v958_v33 = vmul.f32 %v957_v53, %v948_v29  ;;  %v1158_v21 = vmul.f32 %v1157_v13, %v1148_v30 }
 0x3f3   : > { %v2411_v34 = vadd.f32 %v958_v33, %v944_v32  ;;  %v1023_v32 = vld [vmem:[#allocation8 + $0x48] sm:$0xff] }
 0x3f5   : > { %v988_v38 = vpop.permute.xlu0 %987  ;;  %v870_v39 = vpop.permute.xlu1 %869  ;;  %v984_v40 = vmul.f32 %v982_v37, %v2411_v34 }
 0x3f6   : > { %v998_v41 = vmul.f32 %v997_v36, %v988_v38  ;;  %v877_v47 = vmul.f32 %v875_v12, %v870_v39  ;;  %v943_v12 = vld [vmem:[#allocation8 + $0x28] sm:$0xff]  ;;  %v1063_v38 = vld [vmem:[#allocation8 + $0x58] sm:$0xff] }
 0x3f8   : > { %v2418_v48 = vadd.f32 %v998_v41, %v984_v40  ;;  %v879_v57 = vadd.f32 %v877_v47, %v861_v51 }
 0x3fa   : > { %v1108_v52 = vpop.permute.xlu0 %1107  ;;  %v1072_v54 = vpop.permute.xlu1 %1071  ;;  %v1024_v55 = vmul.f32 %v1022_v49, %v2418_v48  ;;  %v905_v4 = vmul.f32 %v903_v1, %v879_v57 }
 0x3fb   : > { %v1118_v8 = vmul.f32 %v1117_v3, %v1108_v52  ;;  %v1079_v39 = vmul.f32 %v1077_v56, %v1072_v54  ;;  %v1143_v52 = vld [vmem:[#allocation8 + $0x78] sm:$0xff] }
 0x3fc   : > { %v2423_v59 = vadd.f32 %v1038_v50, %v1024_v55 }
 0x3fe   : > { %v1064_v62 = vmul.f32 %v1062_v60, %v2423_v59 }
 0x3ff   : > { %v912_v0 = vpop.permute.xlu0 %911  ;;  %v1112_v2 = vpop.permute.xlu1 %1111 }
 0x400   : > { %v919_v5 = vmul.f32 %v917_v19, %v912_v0  ;;  %v2428_v6 = vadd.f32 %v1078_v61, %v1064_v62 }
 0x402   : > { %v921_v10 = vadd.f32 %v919_v5, %v905_v4  ;;  %v1104_v11 = vmul.f32 %v1102_v7, %v2428_v6 }
 0x404   : > { %v952_v14 = vpop.permute.xlu0 %951  ;;  %v945_v15 = vmul.f32 %v943_v12, %v921_v10  ;;  %v1152_v45 = vpop.permute.xlu1 %1151  ;;  %v2432_v16 = vadd.f32 %v1118_v8, %v1104_v11 }
 0x405   : > { %v959_v17 = vmul.f32 %v957_v53, %v952_v14  ;;  %v1159_v55 = vmul.f32 %v1157_v13, %v1152_v45 }
 0x406   : > { %v1144_v19 = vmul.f32 %v1142_v20, %v2432_v16 }
 0x407   : > { %v961_v22 = vadd.f32 %v959_v17, %v945_v15 }
 0x408   : > { %v2435_v24 = vadd.f32 %v1158_v21, %v1144_v19 }
 0x409   : > { %v992_v26 = vpop.permute.xlu0 %991  ;;  %v985_v28 = vmul.f32 %v983_v23, %v961_v22  ;;  %v883_v29 = vpop.permute.xlu1 %882 }
 0x40a   : > { %v999_v31 = vmul.f32 %v997_v36, %v992_v26  ;;  %1196 = vst.msk [vmem:[#allocation2] sm:$0xff] %vm540_vm1, %v2435_v24  ;;  %v1119_v36 = vmul.f32 %v1117_v3, %v1112_v2  ;;  %v890_v58 = vmul.f32 %v883_v29, %v2401_v18 }
 0x40c   : > { %v1001_v25 = vadd.f32 %v999_v31, %v985_v28  ;;  %v892_v62 = vsel %vm540_vm1, %v890_v58, 0.0 }
 0x40e   : > { %v1032_v33 = vpop.permute.xlu0 %1031  ;;  %v1025_v35 = vmul.f32 %v1023_v32, %v1001_v25  ;;  %v924_v53 = vpop.permute.xlu1 %923 }
 0x40f   : > { %v1039_v37 = vmul.f32 %v1037_v44, %v1032_v33  ;;  %v930_v63 = vmul.f32 %v924_v53, %v2406_v27 }
 0x411   : > { %v2439_v30 = vadd.f32 %v1039_v37, %v1025_v35  ;;  %v932_v8 = vsel %vm540_vm1, %v930_v63, 0.0 }
 0x413   : > { %v964_v40 = vpop.permute.xlu0 %963  ;;  %v1004_v41 = vpop.permute.xlu1 %1003  ;;  %v1065_v42 = vmul.f32 %v1063_v38, %v2439_v30 }
 0x414   : > { %v1010_v0 = vmul.f32 %v1004_v41, %v2418_v48 }
 0x415   : > { %v1081_v43 = vadd.f32 %v1079_v39, %v1065_v42 }
 0x416   : > { %v1012_v11 = vsel %vm540_vm1, %v1010_v0, 0.0 }
 0x417   : > { %v1105_v47 = vmul.f32 %v1103_v46, %v1081_v43 }
 0x418   : > { %v1044_v49 = vpop.permute.xlu0 %1043  ;;  %v1084_v50 = vpop.permute.xlu1 %1083 }
 0x419   : > { %v2442_v51 = vadd.f32 %v1119_v36, %v1105_v47  ;;  %v1090_v12 = vmul.f32 %v1084_v50, %v2428_v6  ;;  %v1050_v32 = vmul.f32 %v1044_v49, %v2423_v59 }
 0x41b   : > { %v1145_v44 = vmul.f32 %v1143_v52, %v2442_v51  ;;  %v1092_v26 = vsel %vm540_vm1, %v1090_v12, 0.0 }
 0x41d   : > { %v888_v60 = vpop.permute.xlu0 %887  ;;  %v1124_v54 = vpop.permute.xlu1 %1123  ;;  %v2446_v56 = vadd.f32 %v1159_v55, %v1145_v44 }
 0x41e   : > { %v891_v61 = vmul.f32 %v888_v60, %v879_v57  ;;  %v970_v57 = vmul.f32 %v964_v40, %v2411_v34  ;;  %v1130_v47 = vmul.f32 %v1124_v54, %v2432_v16 }
 0x41f   : > { %1197 = vst.msk [vmem:[#allocation2 + $0x8] sm:$0xff] %vm540_vm1, %v2446_v56 }
 0x420   : > { %v893_v1 = vsel %vm540_vm1, %v891_v61, 0.0  ;;  %v972_v34 = vsel %vm540_vm1, %v970_v57, 0.0 }
 0x421   : > { %v894_v2 = vadd.f32 %v893_v1, %v892_v62  ;;  %v1132_v1 = vsel %vm540_vm1, %v1130_v47, 0.0  ;;  %v1790_v47 = vld [vmem:[#allocation15 + $0x8] sm:$0xff]  }
 0x422   : > { %v1008_v3 = vpop.permute.xlu0 %1007  ;;  %v928_v4 = vpop.permute.xlu1 %927  ;;  %1597 = vmatpush3.bf16.msra.mxu1 %v1790_v47 }
 0x423   : > { %v895_v18 = vrot.slane %v894_v2, 4  ;;  %v1011_v5 = vmul.f32 %v1008_v3, %v1001_v25  ;;  %v931_v7 = vmul.f32 %v928_v4, %v921_v10  ;;  %1598 = vmatprep.subr.bf16.mxu1 %v2084_v9 }
 0x425   : > { %v896_v13 = vadd.f32 %v895_v18, %v894_v2  ;;  %v1013_v27 = vsel %vm540_vm1, %v1011_v5, 0.0  ;;  %v933_v48 = vsel %vm540_vm1, %v931_v7, 0.0 }
 0x426   : > { %v1014_v14 = vadd.f32 %v1013_v27, %v1012_v11  ;;  %v934_v15 = vadd.f32 %v933_v48, %v932_v8 }
 0x427   : > { %v897_v45 = vrot.slane %v896_v13, 2  ;;  %v1088_v17 = vpop.permute.xlu0 %1087  ;;  %v968_v20 = vpop.permute.xlu1 %967 }
 0x428   : > { %v1015_v21 = vrot.slane %v1014_v14, 4  ;;  %v935_v10 = vrot.slane %v934_v15, 4  ;;  %v1091_v19 = vmul.f32 %v1088_v17, %v1081_v43  ;;  %v971_v23 = vmul.f32 %v968_v20, %v961_v22 }
 0x429   : > { %v898_v28 = vadd.f32 %v897_v45, %v896_v13  ;;  %v1052_v43 = vsel %vm540_vm1, %v1050_v32, 0.0 }
 0x42a   : > { %v1016_v6 = vadd.f32 %v1015_v21, %v1014_v14  ;;  %v936_v29 = vadd.f32 %v935_v10, %v934_v15  ;;  %v1093_v31 = vsel %vm540_vm1, %v1091_v19, 0.0  ;;  %v973_v25 = vsel %vm540_vm1, %v971_v23, 0.0 }
 0x42b   : > { %v1094_v33 = vadd.f32 %v1093_v31, %v1092_v26  ;;  %v974_v35 = vadd.f32 %v973_v25, %v972_v34  ;;  %v899_v40 = vrot.slane %v898_v28, 1 }
 0x42c   : > { %v1017_v53 = vrot.slane %v1016_v6, 2  ;;  %v937_v37 = vrot.slane %v936_v29, 2  ;;  %v1048_v38 = vpop.permute.xlu1 %1047  ;;  %v1164_v63 = vpop.permute.xlu0 %1163 }
 0x42d   : > { %v1095_v39 = vrot.slane %v1094_v33, 4  ;;  %v975_v22 = vrot.slane %v974_v35, 4  ;;  %v1051_v42 = vmul.f32 %v1048_v38, %v2439_v30  ;;  %v900_v58 = vadd.f32 %v899_v40, %v898_v28  ;;  %v1198_v38 = vld [vmem:[#allocation6] sm:$0xff] }
 0x42e   : > { %v938_v41 = vadd.f32 %v937_v37, %v936_v29  ;;  %v1018_v50 = vadd.f32 %v1017_v53, %v1016_v6  ;;  %v1170_v7 = vmul.f32 %v1164_v63, %v2435_v24  ;;  %v1792_v63 = vld [vmem:[%s2574_s11 + $0x18] sm:$0xff]  }
 0x42f   : > { %v1096_v46 = vadd.f32 %v1095_v39, %v1094_v33  ;;  %v976_v36 = vadd.f32 %v975_v22, %v974_v35  ;;  %v1053_v59 = vsel %vm540_vm1, %v1051_v42, 0.0  ;;  %1605 = vmatpush3.bf16.msra.mxu0 %v1792_v63 }
 0x430   : > { %v939_v52 = vrot.slane %v938_v41, 1  ;;  %v1054_v55 = vadd.f32 %v1053_v59, %v1052_v43  ;;  %v1019_v2 = vrot.slane %v1018_v50, 1  ;;  %v1172_v45 = vsel %vm540_vm1, %v1170_v7, 0.0  ;;  %1606 = vmatprep.subr.bf16.mxu0 %v2084_v9 }
 0x431   : > { %v977_v49 = vrot.slane %v976_v36, 2  ;;  %v1128_v44 = vpop.permute.xlu1 %1127  ;;  %v1097_v61 = vrot.slane %v1096_v46, 2 }
 0x432   : > { %v940_v60 = vadd.f32 %v939_v52, %v938_v41  ;;  %v1131_v62 = vmul.f32 %v1128_v44, %v2442_v51  ;;  %v1055_v0 = vrot.slane %v1054_v55, 4  ;;  %v1020_v12 = vadd.f32 %v1019_v2, %v1018_v50  ;;  %v1791_v50 = vld [vmem:[#allocation15] sm:$0xff]   ;;  %v1560_v44 = vld [vmem:[#allocation12] ss:$0 sm:$0xff]  ;;  %v1795_v2 = vld [vmem:[%s2574_s11] sm:$0xff]  }
 0x433   : > { %v978_v30 = vadd.f32 %v977_v49, %v976_v36  ;;  %v1098_v5 = vadd.f32 %v1097_v61, %v1096_v46  ;;  %1599 = vmatpush3.bf16.msra.mxu1 %v1791_v50 }
 0x434   : > { %v1182_v16 = vsel %vm1181_vm3, %v900_v58, %v940_v60  ;;  %v1133_v54 = vsel %vm540_vm1, %v1131_v62, 0.0  ;;  %v1056_v4 = vadd.f32 %v1055_v0, %v1054_v55  ;;  %v1561_v60 = vld [vmem:[#allocation14] ss:$0 sm:$0xff]  ;;  %v1793_v0 = vld [vmem:[%s2574_s11 + $0x10] sm:$0xff]  }
 0x435   : > { %v979_v3 = vrot.slane %v978_v30, 1  ;;  %v1134_v18 = vadd.f32 %v1133_v54, %v1132_v1  ;;  %v1099_v15 = vrot.slane %v1098_v5, 1  ;;  %1607 = vmatpush3.bf16.msra.mxu0 %v1793_v0  ;;  %v1794_v1 = vld [vmem:[%s2574_s11 + $0x8] sm:$0xff]  }
 0x436   : > { %v1168_v8 = vpop.permute.xlu1 %1167  ;;  %v1057_v51 = vrot.slane %v1056_v4, 2  ;;  %1608 = vmatprep.subr.bf16.mxu0 %v2084_v9 }
 0x437   : > { %v980_v57 = vadd.f32 %v979_v3, %v978_v30  ;;  %v1135_v11 = vrot.slane %v1134_v18, 4  ;;  %v1171_v13 = vmul.f32 %v1168_v8, %v2446_v56  ;;  %v1100_v26 = vadd.f32 %v1099_v15, %v1098_v5 }
 0x438   : > { %v1058_v48 = vadd.f32 %v1057_v51, %v1056_v4 }
 0x439   : > { %v1184_v27 = vsel %vm1183_vm4, %v1182_v16, %v980_v57  ;;  %v1136_v14 = vadd.f32 %v1135_v11, %v1134_v18  ;;  %v1173_v20 = vsel %vm540_vm1, %v1171_v13, 0.0  ;;  %1609 = vmatpush3.bf16.msra.mxu0 %v1794_v1  ;;  %v1563_v16 = vld [vmem:[#allocation17] ss:$0 sm:$0xff] }
 0x43a   : > { %v1186_v17 = vsel %vm1185_vm5, %v1184_v27, %v1020_v12  ;;  %v1059_v21 = vrot.slane %v1058_v48, 1  ;;  %v1174_v24 = vadd.f32 %v1173_v20, %v1172_v45  ;;  %1610 = vmatprep.subr.bf16.mxu0 %v2084_v9  ;;  %v1562_v9 = vld [vmem:[%s2575_s12] ss:$0 sm:$0xff] }
 0x43b   : > { %v1137_v10 = vrot.slane %v1136_v14, 2 }
 0x43c   : > { %v1060_v19 = vadd.f32 %v1059_v21, %v1058_v48  ;;  %v1175_v34 = vrot.slane %v1174_v24, 4 }
 0x43d   : > { %v1138_v23 = vadd.f32 %v1137_v10, %v1136_v14  ;;  %1611 = vmatpush3.bf16.msra.mxu0 %v1795_v2 }
 0x43e   : > { %v1188_v28 = vsel %vm1187_vm6, %v1186_v17, %v1060_v19  ;;  %v1176_v6 = vadd.f32 %v1175_v34, %v1174_v24 }
 0x43f   : > { %v1139_v56 = vrot.slane %v1138_v23, 1  ;;  %v1190_v29 = vsel %vm1189_vm7, %v1188_v28, %v1100_v26 }
 0x440   : > { %v1177_v25 = vrot.slane %v1176_v6, 2 }
 0x441   : > { %v1140_v31 = vadd.f32 %v1139_v56, %v1138_v23 }
 0x442   : > { %v1178_v33 = vadd.f32 %v1177_v25, %v1176_v6 }
 0x443   : > { %v1192_v32 = vsel %vm1191_vm8, %v1190_v29, %v1140_v31 }
 0x444   : > { %v1179_v35 = vrot.slane %v1178_v33, 1 }
 0x446   : > { %v1180_v53 = vadd.f32 %v1179_v35, %v1178_v33 }
 0x448   : > { %v1194_v37 = vsel %vm1193_vm9, %v1192_v32, %v1180_v53 }
 0x449   : > { %1195 = vst.msk [vmem:[#allocation7] sm:$0xff] %vm540_vm1, %v1194_v37 }
 0x450   : > { %v1199_v39 = vld [vmem:[#allocation7] sm:$0xff] }
 0x451   : > { %v1200_v22 = vadd.f32 %v1199_v39, %v1198_v38 }
 0x453   : > { %v1201_v40 = vsel %vm540_vm1, %v1200_v22, 0.0 }
 0x454   : > { %1202 = vadd.xlane.f32.xlu1 %v1201_v40 }
 0x4dd   : > { %v1203_v41 = vpop.xlane.xlu1 %1202 }
 0x4de   : > { %v1204_v42 = vmul.f32 0.03125, %v1203_v41 }
 0x4e0   : > { %v1205_v43 = vsub.f32 %v1200_v22, %v1204_v42 }
 0x4e2   : > { %v1206_v46 = vmul.f32 %v1205_v43, %v1205_v43 }
 0x4e4   : > { %v1207_v36 = vsel %vm540_vm1, %v1206_v46, 0.0 }
 0x4e5   : > { %1208 = vadd.xlane.f32.xlu0 %v1207_v36 }
 0x56e   : > { %v1209_v52 = vpop.xlane.xlu0 %1208 }
 0x56f   : > { %v1210_v59 = vmul.f32 0.03125, %v1209_v52 }
 0x571   : > { %v1211_v49 = vadd.f32 1e-05, %v1210_v59 }
 0x573   : > { %1834 = vrsqrt.f32 %v1211_v49 }
 0x580   : > { %v1835_v55 = vpop.eup %1834 }
 0x581   : > { %v1213_v58 = vmul.f32 %v1835_v55, %v1205_v43 }
 0x583   : > { %v1221_v61 = vmul.f32 %v1560_v44, %v1213_v58 }
 0x585   : > { %v1229_v62 = vadd.f32 %v1561_v60, %v1221_v61 }
 0x587   : > { %v1230_v30 = vpack.c.bf16 %v1229_v62, %v1229_v62 }
 0x589   : > { %1601 = vmatmul.mubr.msk.bf16.vlgmr.msra.gmra.mxu1 %vm540_vm1, %v1230_v30 }
 0x649   : > { %v1299_v54 = vpop.f32.mrf.mxu1 }
 0x64a   : > { %v1300_v3 = vadd.f32 %v1563_v16, %v1299_v54 }
 0x64b   : > { %v1602_v4 = vpop.f32.mrf.mxu1 }
 0x64c   : > { %v1306_v18 = vmul.f32 0.70710677, %v1300_v3  ;;  %v1305_v57 = vmul.f32 0.5, %v1300_v3 }
 0x64d   : > { %v1302_v5 = vpop.f32.mrf.mxu1 }
 0x64e   : > { %1836 = verf.f32 %v1306_v18 }
 0x64f   : > { %v1603_v7 = vpop.f32.mrf.mxu1 }
 0x65b   : > { %v1837_v8 = vpop.eup %1836 }
 0x65c   : > { %v1308_v51 = vadd.f32 1.0, %v1837_v8 }
 0x65e   : > { %v1309_v11 = vmul.f32 %v1308_v51, %v1305_v57 }
 0x660   : > { %v1310_v12 = vpack.c.bf16 %v1309_v11, %v1309_v11 }
 0x662   : > { %1613 = vmatmul.mubr.msk.bf16.vlgmr.msra.gmra.mxu0 %vm1343_vm10, %v1310_v12 }
 0x722   : > { %v1381_v13 = vpop.f32.mrf.mxu0 }
 0x723   : > { %v1387_v27 = vadd.f32 %v1562_v9, %v1381_v13 }
 0x724   : > { %v1614_v48 = vpop.f32.mrf.mxu0 }
 0x725   : > { %v1388_v14 = vadd.f32 %v1387_v27, %v1200_v22 }
 0x726   : > { %v1384_v15 = vpop.f32.mrf.mxu0 }
 0x727   : > { %1389 = vst.msk [vmem:[%s522_s21] sm:$0xff] %vm540_vm1, %v1388_v14 }
 0x728   : > { %v1615_v45 = vpop.f32.mrf.mxu0 }
 0x729   : > { %1981 = shalt.err (!%p1978_p9)
}
 0x72a   : > { %s1982_s23 = scalar_lea.hbm %s2506_s19, 128  ;;  %s1986_s25 = scalar_lea.hbm %s2611_s20, 512 }
 0x72b   : > { %p1983_p11 = scmp.ne.s32.totalorder %s2506_s19, %s1982_s23  ;;  %p1987_p0 = scmp.lt.s32.totalorder %s2506_s19, %s2611_s20 }
 0x72c   : > { %p1988_p1 = scmp.lt.s32.totalorder %s1986_s25, %s1982_s23 }
 0x72d   : > { %p1984_p13 = pnand %p1983_p11, %p2612_p8 }
 0x72e   : > { %p1989_p4 = por %p1988_p1, %p1987_p0 }
 0x72f   : > { %p1985_p2 = pneg %p1984_p13 }
 0x731   : > { %p1990_p5 = pnand %p1989_p4, %p1985_p2 }
 0x733   : > { %1993 = shalt.err (!%p1990_p5)
}
 0x734   : > { %1636 = dma.vmem_to_hbm [thread:$0]  (%p2612_p8), %s2508_s9, 128, %s2506_s19, %s1391_s28  }
 0x735 PF: > { %s2613_s13 = sld [smem:[#allocation23_spill]]  ;;  %p1668_p6 = scmp.ge.s32.totalorder %s2072_s15, 2 }
 0x736   : > { %s2614_s16 = sld [smem:[#allocation29_spill]] }
 0x73b   : > { %s1418_s14 = sand.u32 1, %s2613_s13  }
 0x73c   : > { %p2615_p3 = scmp.ne.s32.totalorder %s2614_s16, 0  ;;  %s1419_s29 = scalar_lea.sflag [#allocation11], %s1418_s14 }
 0x73e   : > { %p1655_p12 = pnand %p1668_p6, %p2615_p3 }
 0x740   : > { %p1656_p10 = pneg %p1655_p12 }
 0x742   : > { %2039 = dma.done.wait (%p1656_p10), %s1419_s29, 128  }
 0x743   : > { %2041 = vsyncadd (%p1656_p10), %s1419_s29, 4294967168  ;;  %s29_s15 = sadd.s32 1, %s2072_s15   ;;  %s2616_s22 = sld [smem:[#allocation24_spill]] }
 0x744   : > { %p26_p7 = scmp.ge.s32.totalorder %s29_s15, 6   ;;  %s2617_s27 = sld [smem:[#allocation30_spill]] }
 0x745   : > { %s2618_s28 = sld [smem:[#allocation25_spill]]  ;;  %s2622_s25 = smov %s2048_s26 }
 0x746   : > { %s2619_s29 = sld [smem:[#allocation26_spill]]  ;;  %28 = sbr.rel (!%p26_p7) target bundleno = 12 (0xc), region = 139 }
 0x747   : > { %s2620_s30 = sld [smem:[#allocation27_spill]] }
 0x748   : > { %s2621_s14 = sld [smem:[#allocation28_spill]] }
 0x749   : > { %s2623_s26 = smov %s2616_s22 }
 0x74b   :  { %1424 = vsyncpa [#allocation10], 1 }
 0x74c   :  { %1426 = vsyncpa [#allocation10 + $0x1], 1 }
 0x74d   :  { %1427 = vsyncpa [#allocation13], 1 }
 0x74e   :  { %1428 = vsyncpa [#allocation16], 1 }
 0x74f   :  { %1429 = vsyncpa [#allocation11], 1 }
 0x750   :  { %1431 = vsyncpa [#allocation11 + $0x1], 1 }

</bundles_post_ra>
